<compile_context>
chip_gen: v6e
topology: v6e:2x2x1
jax: 0.10.0
libtpu: 0.0.40
codegen_flags: <defaults>
</compile_context>

<pallas_src>
import jax
import jax.numpy as jnp
from jax.experimental import pallas as pl
from jax.experimental.pallas import tpu as pltpu

EPS = 1e-5                      # torch.nn.BatchNorm2d default
INTER_DTYPE = jnp.bfloat16      # HBM intermediates (BN stats stay f32)


def _vmem_capacity_bytes():
    try:
        return int(pltpu.get_tpu_info().vmem_capacity_bytes)
    except Exception:
        return 64 * 1024 * 1024                     # conservative fallback


_VMEM_CAP = _vmem_capacity_bytes()
# ~112 MiB scoped limit on 128 MiB parts (v5e/v6e), ~48 MiB on 64 MiB v7x.
VMEM_LIMIT_BYTES = int(min(max(_VMEM_CAP - (16 << 20), 32 << 20), 112 << 20))
# Per-block streaming budget (before double-buffering) for the 1x1/elementwise passes.
TILE_BUDGET_BYTES = (12 << 20) if _VMEM_CAP >= (96 << 20) else (5 << 20)


def _pick_rows(total, bytes_per_row, budget_bytes=TILE_BUDGET_BYTES):
    """Rows per grid step: a multiple-of-16 divisor of `total` whose streamed
    footprint (bytes_per_row per row, before double-buffering) fits budget."""
    if total % 16 != 0:
        return total                                 # single-block fallback
    cap = max(16, budget_bytes // max(bytes_per_row, 1))
    r = min(total, (cap // 16) * 16)
    while r > 16 and total % r != 0:
        r -= 16
    return max(r, 16)


def _bn_affine(s, q, count, gamma, beta):
    """Fold batch-stat BatchNorm into a per-channel affine y*a + c."""
    mean = s / count
    var = jnp.maximum(q / count - mean * mean, 0.0)   # single-pass, clamped
    a = gamma * jax.lax.rsqrt(var + EPS)
    c = beta - mean * a
    return a, c


# ---------------------------------------------------------------------------
# pass 1: 1x1 conv (4 parity planes) + 1x1 stride-2 downsample conv
# ---------------------------------------------------------------------------
def _conv1_kernel(xp_ref, w1_ref, wd_ref, y1_ref, yd_ref, st_ref):
    _, r, cin = xp_ref.shape
    cout = y1_ref.shape[-1]
    # One long MXU stream over all 4 parity planes (leading-dim merge is free
    # when r is a multiple of the sublane tile).
    x_all = xp_ref[...].astype(jnp.float32).reshape(4 * r, cin)
    y1 = jnp.dot(x_all, w1_ref[...], preferred_element_type=jnp.float32)
    # Downsample branch only samples the even/even plane (= rows [0:r]).
    yd = jnp.dot(x_all[:r], wd_ref[...], preferred_element_type=jnp.float32)
    st_ref[0, 0:1, :] = jnp.sum(y1, axis=0, keepdims=True)
    st_ref[0, 1:2, :] = jnp.sum(y1 * y1, axis=0, keepdims=True)
    st_ref[0, 2:3, :] = jnp.sum(yd, axis=0, keepdims=True)
    st_ref[0, 3:4, :] = jnp.sum(yd * yd, axis=0, keepdims=True)
    y1_ref[...] = y1.reshape(4, r, cout).astype(y1_ref.dtype)
    yd_ref[...] = yd.astype(yd_ref.dtype)


# ---------------------------------------------------------------------------
# pass 2: BN1-normalize + 3x3 stride-2 conv (9 accumulated MXU dots)
# ---------------------------------------------------------------------------
def _conv2_kernel(y1p_ref, a1_ref, c1_ref, w2_ref, z_ref, st_ref, pad_ref):
    _, _, Ho, Wo, C = y1p_ref.shape
    a1 = a1_ref[...]
    c1 = c1_ref[...]

    def plane(p):
        yp = y1p_ref[p, 0].astype(jnp.float32).reshape(Ho * Wo, C)
        return yp * a1 + c1                          # BN1 folded into affine

    # Parity planes of y1: p = 2*row_parity + col_parity.
    p00 = plane(0)
    p01 = plane(1)
    p10 = plane(2)
    p11 = plane(3)

    def tap(x, kh, kw):
        return jnp.dot(x, w2_ref[3 * kh + kw],
                       preferred_element_type=jnp.float32)

    # Contribution of tap (kh,kw) at output (ho,wo) reads plane(kh-parity,
    # kw-parity) at (ho+dh, wo+dw) with dh/dw = -1 iff kh/kw == 0.  Compute
    # each tap on the UNshifted plane and group by the shift it needs.
    g00 = tap(p00, 1, 1) + tap(p01, 1, 2) + tap(p10, 2, 1) + tap(p11, 2, 2)
    gr = tap(p10, 0, 1) + tap(p11, 0, 2)        # needs shift down 1 output row
    gc = tap(p01, 1, 0) + tap(p11, 2, 0)        # needs shift right 1 output col
    grc = tap(p11, 0, 0)                        # needs both shifts

    g00 = g00.reshape(Ho, Wo, C)
    gr = gr.reshape(Ho, Wo, C)
    gc = gc.reshape(Ho, Wo, C)
    grc = grc.reshape(Ho, Wo, C)

    zero_row = jnp.zeros((1, Wo, C), jnp.float32)

    def down(x):                                 # leading-axis shift: cheap
        return jnp.concatenate([zero_row, x[:Ho - 1]], axis=0)

    # Single column (sublane) shift via a small padded VMEM scratch:
    #   right(t)[h, w] = t[h, w-1] (zero at w == 0).
    pad_ref[:, 1:Wo + 1, :] = gc + down(grc)
    pad_ref[:, 0:1, :] = jnp.zeros((Ho, 1, C), jnp.float32)
    z3 = g00 + down(gr) + pad_ref[:, 0:Wo, :]

    z2 = z3.reshape(Ho * Wo, C)
    st_ref[0, 0:1, :] = jnp.sum(z2, axis=0, keepdims=True)
    st_ref[0, 1:2, :] = jnp.sum(z2 * z2, axis=0, keepdims=True)
    z_ref[...] = z3.reshape(1, Ho, Wo, C).astype(z_ref.dtype)


# ---------------------------------------------------------------------------
# pass 3: BN2-normalize + 1x1 conv
# ---------------------------------------------------------------------------
def _conv3_kernel(z_ref, a2_ref, c2_ref, w3_ref, y3_ref, st_ref):
    zn = z_ref[...].astype(jnp.float32) * a2_ref[...] + c2_ref[...]
    y3 = jnp.dot(zn, w3_ref[...], preferred_element_type=jnp.float32)
    st_ref[0, 0:1, :] = jnp.sum(y3, axis=0, keepdims=True)
    st_ref[0, 1:2, :] = jnp.sum(y3 * y3, axis=0, keepdims=True)
    y3_ref[...] = y3.astype(y3_ref.dtype)


# ---------------------------------------------------------------------------
# pass 4: BN3/BNd-normalize + residual add + ReLU
# ---------------------------------------------------------------------------
def _out_kernel(y3_ref, yd_ref, a3_ref, c3_ref, ad_ref, cd_ref, o_ref):
    y3 = y3_ref[...].astype(jnp.float32) * a3_ref[...] + c3_ref[...]
    yd = yd_ref[...].astype(jnp.float32) * ad_ref[...] + cd_ref[...]
    o_ref[...] = jnp.maximum(y3 + yd, 0.0).astype(o_ref.dtype)


# ---------------------------------------------------------------------------
# wrapper
# ---------------------------------------------------------------------------
def bottleneck_unit(x_nchw, params):
    """x_nchw: (N, Cin, H, W) f32 -> (N, Cout, H//2, W//2) f32."""
    N, Cin, H, W = x_nchw.shape
    assert H % 2 == 0 and W % 2 == 0, "stride-2 block assumes even H and W"
    Cout = params["w1"].shape[1]
    Ho, Wo = H // 2, W // 2
    Rq = N * Ho * Wo                                 # stride-2 positions

    x = x_nchw.astype(jnp.float32)
    # TODO(synk): fold this parity-split transpose (and the final NCHW
    # transpose) into the first/last kernels to save a full-res HBM round
    # trip each; left as XLA layout plumbing for now.
    xp = x.reshape(N, Cin, Ho, 2, Wo, 2)
    xp = jnp.transpose(xp, (3, 5, 0, 2, 4, 1)).reshape(4, Rq, Cin)

    w1, wd, w2, w3 = params["w1"], params["wd"], params["w2"], params["w3"]

    cparams = pltpu.CompilerParams(dimension_semantics=("parallel",),
                                   vmem_limit_bytes=VMEM_LIMIT_BYTES)

    # ---- pass 1 ----------------------------------------------------------
    r1 = _pick_rows(Rq, 16 * Cin + 10 * Cout)
    nb1 = Rq // r1
    y1_pre, yd_pre, st1 = pl.pallas_call(
        _conv1_kernel,
        out_shape=(jax.ShapeDtypeStruct((4, Rq, Cout), INTER_DTYPE),
                   jax.ShapeDtypeStruct((Rq, Cout), INTER_DTYPE),
                   jax.ShapeDtypeStruct((nb1, 4, Cout), jnp.float32)),
        grid=(nb1,),
        in_specs=[pl.BlockSpec((4, r1, Cin), lambda g: (0, g, 0)),
                  pl.BlockSpec((Cin, Cout), lambda g: (0, 0)),
                  pl.BlockSpec((Cin, Cout), lambda g: (0, 0))],
        out_specs=(pl.BlockSpec((4, r1, Cout), lambda g: (0, g, 0)),
                   pl.BlockSpec((r1, Cout), lambda g: (g, 0)),
                   pl.BlockSpec((1, 4, Cout), lambda g: (g, 0, 0))),
        compiler_params=cparams,
    )(xp, w1, wd)

    tot1 = jnp.sum(st1, axis=0)                       # (4, Cout)
    a1, c1 = _bn_affine(tot1[0:1], tot1[1:2], 4.0 * Rq, params["g1"], params["b1"])
    ad, cd = _bn_affine(tot1[2:3], tot1[3:4], 1.0 * Rq, params["gd"], params["bd"])

    # ---- pass 2 ----------------------------------------------------------
    # TODO(synk): for very large feature maps, additionally tile this pass
    # spatially (1-row halo) and/or over output-channel blocks so v7x's 64 MiB
    # VMEM and both TensorCores are used; grid=(N,) suffices at TransUNet sizes.
    y1sp = y1_pre.reshape(4, N, Ho, Wo, Cout)
    z_pre, st2 = pl.pallas_call(
        _conv2_kernel,
        out_shape=(jax.ShapeDtypeStruct((N, Ho, Wo, Cout), INTER_DTYPE),
                   jax.ShapeDtypeStruct((N, 2, Cout), jnp.float32)),
        grid=(N,),
        in_specs=[pl.BlockSpec((4, 1, Ho, Wo, Cout), lambda n: (0, n, 0, 0, 0)),
                  pl.BlockSpec((1, Cout), lambda n: (0, 0)),
                  pl.BlockSpec((1, Cout), lambda n: (0, 0)),
                  pl.BlockSpec((9, Cout, Cout), lambda n: (0, 0, 0))],
        out_specs=(pl.BlockSpec((1, Ho, Wo, Cout), lambda n: (n, 0, 0, 0)),
                   pl.BlockSpec((1, 2, Cout), lambda n: (n, 0, 0))),
        scratch_shapes=[pltpu.VMEM((Ho, Wo + 1, Cout), jnp.float32)],
        compiler_params=cparams,
    )(y1sp, a1, c1, w2)

    tot2 = jnp.sum(st2, axis=0)
    a2, c2 = _bn_affine(tot2[0:1], tot2[1:2], 1.0 * Rq, params["g2"], params["b2"])

    # ---- pass 3 ----------------------------------------------------------
    z_flat = z_pre.reshape(Rq, Cout)
    r3 = _pick_rows(Rq, 4 * Cout)
    nb3 = Rq // r3
    y3_pre, st3 = pl.pallas_call(
        _conv3_kernel,
        out_shape=(jax.ShapeDtypeStruct((Rq, Cout), INTER_DTYPE),
                   jax.ShapeDtypeStruct((nb3, 2, Cout), jnp.float32)),
        grid=(nb3,),
        in_specs=[pl.BlockSpec((r3, Cout), lambda g: (g, 0)),
                  pl.BlockSpec((1, Cout), lambda g: (0, 0)),
                  pl.BlockSpec((1, Cout), lambda g: (0, 0)),
                  pl.BlockSpec((Cout, Cout), lambda g: (0, 0))],
        out_specs=(pl.BlockSpec((r3, Cout), lambda g: (g, 0)),
                   pl.BlockSpec((1, 2, Cout), lambda g: (g, 0, 0))),
        compiler_params=cparams,
    )(z_flat, a2, c2, w3)

    tot3 = jnp.sum(st3, axis=0)
    a3, c3 = _bn_affine(tot3[0:1], tot3[1:2], 1.0 * Rq, params["g3"], params["b3"])

    # ---- pass 4 ----------------------------------------------------------
    r4 = _pick_rows(Rq, 6 * Cout)
    nb4 = Rq // r4
    out_flat = pl.pallas_call(
        _out_kernel,
        out_shape=jax.ShapeDtypeStruct((Rq, Cout), INTER_DTYPE),
        grid=(nb4,),
        in_specs=[pl.BlockSpec((r4, Cout), lambda g: (g, 0)),
                  pl.BlockSpec((r4, Cout), lambda g: (g, 0)),
                  pl.BlockSpec((1, Cout), lambda g: (0, 0)),
                  pl.BlockSpec((1, Cout), lambda g: (0, 0)),
                  pl.BlockSpec((1, Cout), lambda g: (0, 0)),
                  pl.BlockSpec((1, Cout), lambda g: (0, 0))],
        out_specs=pl.BlockSpec((r4, Cout), lambda g: (g, 0)),
        input_output_aliases={0: 0},                 # reuse y3_pre's HBM buffer
        compiler_params=cparams,
    )(y3_pre, yd_pre, a3, c3, ad, cd)

    out = out_flat.astype(jnp.float32).reshape(N, Ho, Wo, Cout)
    return jnp.transpose(out, (0, 3, 1, 2))          # NCHW


# ---------------------------------------------------------------------------
# pure-JAX reference (mirrors the PyTorch module in train mode)
# ---------------------------------------------------------------------------
def _reference(x, params):
    Cin = x.shape[1]
    Cout = params["w1"].shape[1]

    def bn(y, g, b):
        m = jnp.mean(y, axis=(0, 2, 3), keepdims=True)
        v = jnp.mean(jnp.square(y - m), axis=(0, 2, 3), keepdims=True)
        return ((y - m) * jax.lax.rsqrt(v + EPS) * g.reshape(1, -1, 1, 1)
                + b.reshape(1, -1, 1, 1))

    def conv(y, w_oihw, stride, pad):
        return jax.lax.conv_general_dilated(
            y, w_oihw, window_strides=(stride, stride),
            padding=((pad, pad), (pad, pad)),
            dimension_numbers=("NCHW", "OIHW", "NCHW"))

    w1 = params["w1"].T.reshape(Cout, Cin, 1, 1)
    wd = params["wd"].T.reshape(Cout, Cin, 1, 1)
    w3 = params["w3"].T.reshape(Cout, Cout, 1, 1)
    w2 = params["w2"].reshape(3, 3, Cout, Cout).transpose(3, 2, 0, 1)

    y = bn(conv(x, w1, 1, 0), params["g1"], params["b1"])
    y = bn(conv(y, w2, 2, 1), params["g2"], params["b2"])
    y = bn(conv(y, w3, 1, 0), params["g3"], params["b3"])
    d = bn(conv(x, wd, 2, 0), params["gd"], params["bd"])
    return jnp.maximum(y + d, 0.0)


if __name__ == "__main__":
    key = jax.random.PRNGKey(0)
    N, Cin, Cout, H, W = 2, 4, 8, 16, 16

    ks = jax.random.split(key, 16)
    params = {
        # conv weights as (in_ch, out_ch) / (tap=kh*3+kw, in_ch, out_ch)
        "w1": 0.1 * jax.random.normal(ks[0], (Cin, Cout), jnp.float32),
        "w2": 0.1 * jax.random.normal(ks[1], (9, Cout, Cout), jnp.float32),
        "w3": 0.1 * jax.random.normal(ks[2], (Cout, Cout), jnp.float32),
        "wd": 0.1 * jax.random.normal(ks[3], (Cin, Cout), jnp.float32),
        # BatchNorm affine params (gamma, beta), shape (1, Cout)
        "g1": 1.0 + 0.1 * jax.random.normal(ks[4], (1, Cout), jnp.float32),
        "b1": 0.1 * jax.random.normal(ks[5], (1, Cout), jnp.float32),
        "g2": 1.0 + 0.1 * jax.random.normal(ks[6], (1, Cout), jnp.float32),
        "b2": 0.1 * jax.random.normal(ks[7], (1, Cout), jnp.float32),
        "g3": 1.0 + 0.1 * jax.random.normal(ks[8], (1, Cout), jnp.float32),
        "b3": 0.1 * jax.random.normal(ks[9], (1, Cout), jnp.float32),
        "gd": 1.0 + 0.1 * jax.random.normal(ks[10], (1, Cout), jnp.float32),
        "bd": 0.1 * jax.random.normal(ks[11], (1, Cout), jnp.float32),
    }

    x = jax.random.normal(ks[15], (N, Cin, H, W), jnp.float32)

    fwd = jax.jit(bottleneck_unit)
    out = fwd(x, params)
    jax.block_until_ready(out)

    assert out.shape == (N, Cout, H // 2, W // 2)
    assert bool(jnp.all(out >= 0.0))                 # ReLU output

    # Tolerance accounts for bf16 storage of the HBM intermediates
    # (BN statistics themselves are accumulated in f32).
    ref = _reference(x, params)
    err = float(jnp.max(jnp.abs(out - ref)))
    assert bool(jnp.allclose(out, ref, atol=2e-2, rtol=2e-2)), err

    print("KERNEL_OK")
</pallas_src>

<mosaic_0001>
module attributes {stable_mosaic.version = 11 : i64} {
  func.func @_conv1_kernel(%arg0: i32, %arg1: memref<4x128x4xf32, #tpu.memory_space<vmem>>, %arg2: memref<4x8xf32, #tpu.memory_space<vmem>>, %arg3: memref<4x8xf32, #tpu.memory_space<vmem>>, %arg4: memref<4x128x8xbf16, #tpu.memory_space<vmem>>, %arg5: memref<128x8xbf16, #tpu.memory_space<vmem>>, %arg6: memref<1x4x8xf32, #tpu.memory_space<vmem>>) attributes {dimension_semantics = [#tpu.dimension_semantics<parallel>], iteration_bounds = array<i64: 1>, scalar_prefetch = 0 : i64, scratch_operands = 0 : i64, tpu.core_type = #tpu.core_type<tc>, window_params = [{transform_indices = @transform_0, window_bounds = array<i64: 4, 128, 4>}, {pipeline_mode = #tpu.pipeline_mode<synchronous>, transform_indices = @transform_1, window_bounds = array<i64: 4, 8>}, {pipeline_mode = #tpu.pipeline_mode<synchronous>, transform_indices = @transform_2, window_bounds = array<i64: 4, 8>}, {transform_indices = @transform_3, window_bounds = array<i64: 4, 128, 8>}, {transform_indices = @transform_4, window_bounds = array<i64: 128, 8>}, {transform_indices = @transform_5, window_bounds = array<i64: 1, 4, 8>}]} {
    %c0 = arith.constant 0 : index
    %c0_0 = arith.constant 0 : index
    %c0_1 = arith.constant 0 : index
    %0 = vector.load %arg1[%c0, %c0_0, %c0_1] : memref<4x128x4xf32, #tpu.memory_space<vmem>>, vector<4x128x4xf32>
    %1 = vector.shape_cast %0 : vector<4x128x4xf32> to vector<512x4xf32>
    %c0_2 = arith.constant 0 : index
    %c0_3 = arith.constant 0 : index
    %2 = vector.load %arg2[%c0_2, %c0_3] : memref<4x8xf32, #tpu.memory_space<vmem>>, vector<4x8xf32>
    %cst = arith.constant dense<0.000000e+00> : vector<512x8xf32>
    %3 = tpu.matmul %1, %2, %cst {dimension_numbers = #tpu.dot_dimension_numbers<[1], [0], [0], [1], [0, 0, 1, 1], [], []>} : vector<512x4xf32>, vector<4x8xf32>, vector<512x8xf32> -> vector<512x8xf32>
    %4 = vector.extract_strided_slice %1 {offsets = [0, 0], sizes = [128, 4], strides = [1, 1]} : vector<512x4xf32> to vector<128x4xf32>
    %c0_4 = arith.constant 0 : index
    %c0_5 = arith.constant 0 : index
    %5 = vector.load %arg3[%c0_4, %c0_5] : memref<4x8xf32, #tpu.memory_space<vmem>>, vector<4x8xf32>
    %cst_6 = arith.constant dense<0.000000e+00> : vector<128x8xf32>
    %6 = tpu.matmul %4, %5, %cst_6 {dimension_numbers = #tpu.dot_dimension_numbers<[1], [0], [0], [1], [0, 0, 1, 1], [], []>} : vector<128x4xf32>, vector<4x8xf32>, vector<128x8xf32> -> vector<128x8xf32>
    %cst_7 = arith.constant dense<0.000000e+00> : vector<8xf32>
    %7 = vector.multi_reduction <add>, %3, %cst_7 [0] : vector<512x8xf32> to vector<8xf32>
    %8 = vector.shape_cast %7 : vector<8xf32> to vector<1x8xf32>
    %c0_8 = arith.constant 0 : index
    %c0_9 = arith.constant 0 : index
    %c0_10 = arith.constant 0 : index
    %9 = vector.load %arg6[%c0_8, %c0_9, %c0_10] : memref<1x4x8xf32, #tpu.memory_space<vmem>>, vector<1x1x8xf32>
    %10 = vector.shape_cast %9 : vector<1x1x8xf32> to vector<1x8xf32>
    %11 = vector.shape_cast %8 : vector<1x8xf32> to vector<1x1x8xf32>
    tpu.vector_store %arg6[%c0_8, %c0_9, %c0_10], %11 {strides = array<i32>} : memref<1x4x8xf32, #tpu.memory_space<vmem>>, vector<1x1x8xf32>,
    %12 = arith.mulf %3, %3 : vector<512x8xf32>
    %cst_11 = arith.constant dense<0.000000e+00> : vector<8xf32>
    %13 = vector.multi_reduction <add>, %12, %cst_11 [0] : vector<512x8xf32> to vector<8xf32>
    %14 = vector.shape_cast %13 : vector<8xf32> to vector<1x8xf32>
    %c0_12 = arith.constant 0 : index
    %c1 = arith.constant 1 : index
    %c0_13 = arith.constant 0 : index
    %15 = vector.load %arg6[%c0_12, %c1, %c0_13] : memref<1x4x8xf32, #tpu.memory_space<vmem>>, vector<1x1x8xf32>
    %16 = vector.shape_cast %15 : vector<1x1x8xf32> to vector<1x8xf32>
    %17 = vector.shape_cast %14 : vector<1x8xf32> to vector<1x1x8xf32>
    tpu.vector_store %arg6[%c0_12, %c1, %c0_13], %17 {strides = array<i32>} : memref<1x4x8xf32, #tpu.memory_space<vmem>>, vector<1x1x8xf32>,
    %cst_14 = arith.constant dense<0.000000e+00> : vector<8xf32>
    %18 = vector.multi_reduction <add>, %6, %cst_14 [0] : vector<128x8xf32> to vector<8xf32>
    %19 = vector.shape_cast %18 : vector<8xf32> to vector<1x8xf32>
    %c0_15 = arith.constant 0 : index
    %c2 = arith.constant 2 : index
    %c0_16 = arith.constant 0 : index
    %20 = vector.load %arg6[%c0_15, %c2, %c0_16] : memref<1x4x8xf32, #tpu.memory_space<vmem>>, vector<1x1x8xf32>
    %21 = vector.shape_cast %20 : vector<1x1x8xf32> to vector<1x8xf32>
    %22 = vector.shape_cast %19 : vector<1x8xf32> to vector<1x1x8xf32>
    tpu.vector_store %arg6[%c0_15, %c2, %c0_16], %22 {strides = array<i32>} : memref<1x4x8xf32, #tpu.memory_space<vmem>>, vector<1x1x8xf32>,
    %23 = arith.mulf %6, %6 : vector<128x8xf32>
    %cst_17 = arith.constant dense<0.000000e+00> : vector<8xf32>
    %24 = vector.multi_reduction <add>, %23, %cst_17 [0] : vector<128x8xf32> to vector<8xf32>
    %25 = vector.shape_cast %24 : vector<8xf32> to vector<1x8xf32>
    %c0_18 = arith.constant 0 : index
    %c3 = arith.constant 3 : index
    %c0_19 = arith.constant 0 : index
    %26 = vector.load %arg6[%c0_18, %c3, %c0_19] : memref<1x4x8xf32, #tpu.memory_space<vmem>>, vector<1x1x8xf32>
    %27 = vector.shape_cast %26 : vector<1x1x8xf32> to vector<1x8xf32>
    %28 = vector.shape_cast %25 : vector<1x8xf32> to vector<1x1x8xf32>
    tpu.vector_store %arg6[%c0_18, %c3, %c0_19], %28 {strides = array<i32>} : memref<1x4x8xf32, #tpu.memory_space<vmem>>, vector<1x1x8xf32>,
    %29 = vector.shape_cast %3 : vector<512x8xf32> to vector<4x128x8xf32>
    %30 = arith.truncf %29 : vector<4x128x8xf32> to vector<4x128x8xbf16>
    %c0_20 = arith.constant 0 : index
    %c0_21 = arith.constant 0 : index
    %c0_22 = arith.constant 0 : index
    %31 = vector.load %arg4[%c0_20, %c0_21, %c0_22] : memref<4x128x8xbf16, #tpu.memory_space<vmem>>, vector<4x128x8xbf16>
    tpu.vector_store %arg4[%c0_20, %c0_21, %c0_22], %30 {strides = array<i32>} : memref<4x128x8xbf16, #tpu.memory_space<vmem>>, vector<4x128x8xbf16>,
    %32 = arith.truncf %6 : vector<128x8xf32> to vector<128x8xbf16>
    %c0_23 = arith.constant 0 : index
    %c0_24 = arith.constant 0 : index
    %33 = vector.load %arg5[%c0_23, %c0_24] : memref<128x8xbf16, #tpu.memory_space<vmem>>, vector<128x8xbf16>
    tpu.vector_store %arg5[%c0_23, %c0_24], %32 {strides = array<i32>} : memref<128x8xbf16, #tpu.memory_space<vmem>>, vector<128x8xbf16>,
    return
  }
  func.func @transform_0(%arg0: i32) -> (i32, i32, i32) {
    %c0_i32 = arith.constant 0 : i32
    %c0_i32_0 = arith.constant 0 : i32
    %c0_i32_1 = arith.constant 0 : i32
    return %c0_i32, %arg0, %c0_i32_0 : i32, i32, i32
  }
  func.func @transform_1(%arg0: i32) -> (i32, i32) {
    %c0_i32 = arith.constant 0 : i32
    %c0_i32_0 = arith.constant 0 : i32
    %c0_i32_1 = arith.constant 0 : i32
    return %c0_i32, %c0_i32_0 : i32, i32
  }
  func.func @transform_2(%arg0: i32) -> (i32, i32) {
    %c0_i32 = arith.constant 0 : i32
    %c0_i32_0 = arith.constant 0 : i32
    %c0_i32_1 = arith.constant 0 : i32
    return %c0_i32, %c0_i32_0 : i32, i32
  }
  func.func @transform_3(%arg0: i32) -> (i32, i32, i32) {
    %c0_i32 = arith.constant 0 : i32
    %c0_i32_0 = arith.constant 0 : i32
    %c0_i32_1 = arith.constant 0 : i32
    return %c0_i32, %arg0, %c0_i32_0 : i32, i32, i32
  }
  func.func @transform_4(%arg0: i32) -> (i32, i32) {
    %c0_i32 = arith.constant 0 : i32
    %c0_i32_0 = arith.constant 0 : i32
    return %arg0, %c0_i32 : i32, i32
  }
  func.func @transform_5(%arg0: i32) -> (i32, i32, i32) {
    %c0_i32 = arith.constant 0 : i32
    %c0_i32_0 = arith.constant 0 : i32
    %c0_i32_1 = arith.constant 0 : i32
    return %arg0, %c0_i32, %c0_i32_0 : i32, i32, i32
  }
}

module attributes {stable_mosaic.version = 11 : i64} {
  func.func @_conv2_kernel(%arg0: i32, %arg1: memref<4x1x8x8x8xbf16, #tpu.memory_space<vmem>>, %arg2: memref<1x8xf32, #tpu.memory_space<vmem>>, %arg3: memref<1x8xf32, #tpu.memory_space<vmem>>, %arg4: memref<9x8x8xf32, #tpu.memory_space<vmem>>, %arg5: memref<1x8x8x8xbf16, #tpu.memory_space<vmem>>, %arg6: memref<1x2x8xf32, #tpu.memory_space<vmem>>, %arg7: memref<8x9x8xf32, #tpu.memory_space<vmem>>) attributes {dimension_semantics = [#tpu.dimension_semantics<parallel>], iteration_bounds = array<i64: 2>, scalar_prefetch = 0 : i64, scratch_operands = 1 : i64, tpu.core_type = #tpu.core_type<tc>, window_params = [{transform_indices = @transform_0, window_bounds = array<i64: 4, 1, 8, 8, 8>}, {pipeline_mode = #tpu.pipeline_mode<synchronous>, transform_indices = @transform_1, window_bounds = array<i64: 1, 8>}, {pipeline_mode = #tpu.pipeline_mode<synchronous>, transform_indices = @transform_2, window_bounds = array<i64: 1, 8>}, {pipeline_mode = #tpu.pipeline_mode<synchronous>, transform_indices = @transform_3, window_bounds = array<i64: 9, 8, 8>}, {transform_indices = @transform_4, window_bounds = array<i64: 1, 8, 8, 8>}, {transform_indices = @transform_5, window_bounds = array<i64: 1, 2, 8>}]} {
    %c0 = arith.constant 0 : index
    %c0_0 = arith.constant 0 : index
    %0 = vector.load %arg2[%c0, %c0_0] : memref<1x8xf32, #tpu.memory_space<vmem>>, vector<1x8xf32>
    %c0_1 = arith.constant 0 : index
    %c0_2 = arith.constant 0 : index
    %1 = vector.load %arg3[%c0_1, %c0_2] : memref<1x8xf32, #tpu.memory_space<vmem>>, vector<1x8xf32>
    %c0_3 = arith.constant 0 : index
    %c0_4 = arith.constant 0 : index
    %c0_5 = arith.constant 0 : index
    %c0_6 = arith.constant 0 : index
    %c0_7 = arith.constant 0 : index
    %2 = vector.load %arg1[%c0_3, %c0_4, %c0_5, %c0_6, %c0_7] : memref<4x1x8x8x8xbf16, #tpu.memory_space<vmem>>, vector<1x1x8x8x8xbf16>
    %3 = vector.shape_cast %2 : vector<1x1x8x8x8xbf16> to vector<8x8x8xbf16>
    %4 = arith.extf %3 : vector<8x8x8xbf16> to vector<8x8x8xf32>
    %5 = vector.shape_cast %4 : vector<8x8x8xf32> to vector<64x8xf32>
    %6 = vector.broadcast %0 : vector<1x8xf32> to vector<64x8xf32>
    %7 = arith.mulf %5, %6 : vector<64x8xf32>
    %8 = vector.broadcast %1 : vector<1x8xf32> to vector<64x8xf32>
    %9 = arith.addf %7, %8 : vector<64x8xf32>
    %c1 = arith.constant 1 : index
    %c0_8 = arith.constant 0 : index
    %c0_9 = arith.constant 0 : index
    %c0_10 = arith.constant 0 : index
    %c0_11 = arith.constant 0 : index
    %10 = vector.load %arg1[%c1, %c0_8, %c0_9, %c0_10, %c0_11] : memref<4x1x8x8x8xbf16, #tpu.memory_space<vmem>>, vector<1x1x8x8x8xbf16>
    %11 = vector.shape_cast %10 : vector<1x1x8x8x8xbf16> to vector<8x8x8xbf16>
    %12 = arith.extf %11 : vector<8x8x8xbf16> to vector<8x8x8xf32>
    %13 = vector.shape_cast %12 : vector<8x8x8xf32> to vector<64x8xf32>
    %14 = vector.broadcast %0 : vector<1x8xf32> to vector<64x8xf32>
    %15 = arith.mulf %13, %14 : vector<64x8xf32>
    %16 = vector.broadcast %1 : vector<1x8xf32> to vector<64x8xf32>
    %17 = arith.addf %15, %16 : vector<64x8xf32>
    %c2 = arith.constant 2 : index
    %c0_12 = arith.constant 0 : index
    %c0_13 = arith.constant 0 : index
    %c0_14 = arith.constant 0 : index
    %c0_15 = arith.constant 0 : index
    %18 = vector.load %arg1[%c2, %c0_12, %c0_13, %c0_14, %c0_15] : memref<4x1x8x8x8xbf16, #tpu.memory_space<vmem>>, vector<1x1x8x8x8xbf16>
    %19 = vector.shape_cast %18 : vector<1x1x8x8x8xbf16> to vector<8x8x8xbf16>
    %20 = arith.extf %19 : vector<8x8x8xbf16> to vector<8x8x8xf32>
    %21 = vector.shape_cast %20 : vector<8x8x8xf32> to vector<64x8xf32>
    %22 = vector.broadcast %0 : vector<1x8xf32> to vector<64x8xf32>
    %23 = arith.mulf %21, %22 : vector<64x8xf32>
    %24 = vector.broadcast %1 : vector<1x8xf32> to vector<64x8xf32>
    %25 = arith.addf %23, %24 : vector<64x8xf32>
    %c3 = arith.constant 3 : index
    %c0_16 = arith.constant 0 : index
    %c0_17 = arith.constant 0 : index
    %c0_18 = arith.constant 0 : index
    %c0_19 = arith.constant 0 : index
    %26 = vector.load %arg1[%c3, %c0_16, %c0_17, %c0_18, %c0_19] : memref<4x1x8x8x8xbf16, #tpu.memory_space<vmem>>, vector<1x1x8x8x8xbf16>
    %27 = vector.shape_cast %26 : vector<1x1x8x8x8xbf16> to vector<8x8x8xbf16>
    %28 = arith.extf %27 : vector<8x8x8xbf16> to vector<8x8x8xf32>
    %29 = vector.shape_cast %28 : vector<8x8x8xf32> to vector<64x8xf32>
    %30 = vector.broadcast %0 : vector<1x8xf32> to vector<64x8xf32>
    %31 = arith.mulf %29, %30 : vector<64x8xf32>
    %32 = vector.broadcast %1 : vector<1x8xf32> to vector<64x8xf32>
    %33 = arith.addf %31, %32 : vector<64x8xf32>
    %c4 = arith.constant 4 : index
    %c0_20 = arith.constant 0 : index
    %c0_21 = arith.constant 0 : index
    %34 = vector.load %arg4[%c4, %c0_20, %c0_21] : memref<9x8x8xf32, #tpu.memory_space<vmem>>, vector<1x8x8xf32>
    %35 = vector.shape_cast %34 : vector<1x8x8xf32> to vector<8x8xf32>
    %cst = arith.constant dense<0.000000e+00> : vector<64x8xf32>
    %36 = tpu.matmul %9, %35, %cst {dimension_numbers = #tpu.dot_dimension_numbers<[1], [0], [0], [1], [0, 0, 1, 1], [], []>} : vector<64x8xf32>, vector<8x8xf32>, vector<64x8xf32> -> vector<64x8xf32>
    %c5 = arith.constant 5 : index
    %c0_22 = arith.constant 0 : index
    %c0_23 = arith.constant 0 : index
    %37 = vector.load %arg4[%c5, %c0_22, %c0_23] : memref<9x8x8xf32, #tpu.memory_space<vmem>>, vector<1x8x8xf32>
    %38 = vector.shape_cast %37 : vector<1x8x8xf32> to vector<8x8xf32>
    %cst_24 = arith.constant dense<0.000000e+00> : vector<64x8xf32>
    %39 = tpu.matmul %17, %38, %cst_24 {dimension_numbers = #tpu.dot_dimension_numbers<[1], [0], [0], [1], [0, 0, 1, 1], [], []>} : vector<64x8xf32>, vector<8x8xf32>, vector<64x8xf32> -> vector<64x8xf32>
    %40 = arith.addf %36, %39 : vector<64x8xf32>
    %c7 = arith.constant 7 : index
    %c0_25 = arith.constant 0 : index
    %c0_26 = arith.constant 0 : index
    %41 = vector.load %arg4[%c7, %c0_25, %c0_26] : memref<9x8x8xf32, #tpu.memory_space<vmem>>, vector<1x8x8xf32>
    %42 = vector.shape_cast %41 : vector<1x8x8xf32> to vector<8x8xf32>
    %cst_27 = arith.constant dense<0.000000e+00> : vector<64x8xf32>
    %43 = tpu.matmul %25, %42, %cst_27 {dimension_numbers = #tpu.dot_dimension_numbers<[1], [0], [0], [1], [0, 0, 1, 1], [], []>} : vector<64x8xf32>, vector<8x8xf32>, vector<64x8xf32> -> vector<64x8xf32>
    %44 = arith.addf %40, %43 : vector<64x8xf32>
    %c8 = arith.constant 8 : index
    %c0_28 = arith.constant 0 : index
    %c0_29 = arith.constant 0 : index
    %45 = vector.load %arg4[%c8, %c0_28, %c0_29] : memref<9x8x8xf32, #tpu.memory_space<vmem>>, vector<1x8x8xf32>
    %46 = vector.shape_cast %45 : vector<1x8x8xf32> to vector<8x8xf32>
    %cst_30 = arith.constant dense<0.000000e+00> : vector<64x8xf32>
    %47 = tpu.matmul %33, %46, %cst_30 {dimension_numbers = #tpu.dot_dimension_numbers<[1], [0], [0], [1], [0, 0, 1, 1], [], []>} : vector<64x8xf32>, vector<8x8xf32>, vector<64x8xf32> -> vector<64x8xf32>
    %48 = arith.addf %44, %47 : vector<64x8xf32>
    %c1_31 = arith.constant 1 : index
    %c0_32 = arith.constant 0 : index
    %c0_33 = arith.constant 0 : index
    %49 = vector.load %arg4[%c1_31, %c0_32, %c0_33] : memref<9x8x8xf32, #tpu.memory_space<vmem>>, vector<1x8x8xf32>
    %50 = vector.shape_cast %49 : vector<1x8x8xf32> to vector<8x8xf32>
    %cst_34 = arith.constant dense<0.000000e+00> : vector<64x8xf32>
    %51 = tpu.matmul %25, %50, %cst_34 {dimension_numbers = #tpu.dot_dimension_numbers<[1], [0], [0], [1], [0, 0, 1, 1], [], []>} : vector<64x8xf32>, vector<8x8xf32>, vector<64x8xf32> -> vector<64x8xf32>
    %c2_35 = arith.constant 2 : index
    %c0_36 = arith.constant 0 : index
    %c0_37 = arith.constant 0 : index
    %52 = vector.load %arg4[%c2_35, %c0_36, %c0_37] : memref<9x8x8xf32, #tpu.memory_space<vmem>>, vector<1x8x8xf32>
    %53 = vector.shape_cast %52 : vector<1x8x8xf32> to vector<8x8xf32>
    %cst_38 = arith.constant dense<0.000000e+00> : vector<64x8xf32>
    %54 = tpu.matmul %33, %53, %cst_38 {dimension_numbers = #tpu.dot_dimension_numbers<[1], [0], [0], [1], [0, 0, 1, 1], [], []>} : vector<64x8xf32>, vector<8x8xf32>, vector<64x8xf32> -> vector<64x8xf32>
    %55 = arith.addf %51, %54 : vector<64x8xf32>
    %c3_39 = arith.constant 3 : index
    %c0_40 = arith.constant 0 : index
    %c0_41 = arith.constant 0 : index
    %56 = vector.load %arg4[%c3_39, %c0_40, %c0_41] : memref<9x8x8xf32, #tpu.memory_space<vmem>>, vector<1x8x8xf32>
    %57 = vector.shape_cast %56 : vector<1x8x8xf32> to vector<8x8xf32>
    %cst_42 = arith.constant dense<0.000000e+00> : vector<64x8xf32>
    %58 = tpu.matmul %17, %57, %cst_42 {dimension_numbers = #tpu.dot_dimension_numbers<[1], [0], [0], [1], [0, 0, 1, 1], [], []>} : vector<64x8xf32>, vector<8x8xf32>, vector<64x8xf32> -> vector<64x8xf32>
    %c6 = arith.constant 6 : index
    %c0_43 = arith.constant 0 : index
    %c0_44 = arith.constant 0 : index
    %59 = vector.load %arg4[%c6, %c0_43, %c0_44] : memref<9x8x8xf32, #tpu.memory_space<vmem>>, vector<1x8x8xf32>
    %60 = vector.shape_cast %59 : vector<1x8x8xf32> to vector<8x8xf32>
    %cst_45 = arith.constant dense<0.000000e+00> : vector<64x8xf32>
    %61 = tpu.matmul %33, %60, %cst_45 {dimension_numbers = #tpu.dot_dimension_numbers<[1], [0], [0], [1], [0, 0, 1, 1], [], []>} : vector<64x8xf32>, vector<8x8xf32>, vector<64x8xf32> -> vector<64x8xf32>
    %62 = arith.addf %58, %61 : vector<64x8xf32>
    %c0_46 = arith.constant 0 : index
    %c0_47 = arith.constant 0 : index
    %c0_48 = arith.constant 0 : index
    %63 = vector.load %arg4[%c0_46, %c0_47, %c0_48] : memref<9x8x8xf32, #tpu.memory_space<vmem>>, vector<1x8x8xf32>
    %64 = vector.shape_cast %63 : vector<1x8x8xf32> to vector<8x8xf32>
    %cst_49 = arith.constant dense<0.000000e+00> : vector<64x8xf32>
    %65 = tpu.matmul %33, %64, %cst_49 {dimension_numbers = #tpu.dot_dimension_numbers<[1], [0], [0], [1], [0, 0, 1, 1], [], []>} : vector<64x8xf32>, vector<8x8xf32>, vector<64x8xf32> -> vector<64x8xf32>
    %66 = vector.shape_cast %48 : vector<64x8xf32> to vector<8x8x8xf32>
    %67 = vector.shape_cast %55 : vector<64x8xf32> to vector<8x8x8xf32>
    %68 = vector.shape_cast %62 : vector<64x8xf32> to vector<8x8x8xf32>
    %69 = vector.shape_cast %65 : vector<64x8xf32> to vector<8x8x8xf32>
    %cst_50 = arith.constant 0.000000e+00 : f32
    %70 = vector.broadcast %cst_50 : f32 to vector<1x8x8xf32>
    %71 = vector.extract_strided_slice %69 {offsets = [0, 0, 0], sizes = [7, 8, 8], strides = [1, 1, 1]} : vector<8x8x8xf32> to vector<7x8x8xf32>
    %72 = tpu.concatenate %70, %71 in 0 : vector<1x8x8xf32>, vector<7x8x8xf32> -> vector<8x8x8xf32>
    %73 = arith.addf %68, %72 : vector<8x8x8xf32>
    %c0_51 = arith.constant 0 : index
    %c1_52 = arith.constant 1 : index
    %c0_53 = arith.constant 0 : index
    %74 = vector.load %arg7[%c0_51, %c1_52, %c0_53] : memref<8x9x8xf32, #tpu.memory_space<vmem>>, vector<8x8x8xf32>
    tpu.vector_store %arg7[%c0_51, %c1_52, %c0_53], %73 {strides = array<i32>} : memref<8x9x8xf32, #tpu.memory_space<vmem>>, vector<8x8x8xf32>,
    %cst_54 = arith.constant 0.000000e+00 : f32
    %75 = vector.broadcast %cst_54 : f32 to vector<8x1x8xf32>
    %c0_55 = arith.constant 0 : index
    %c0_56 = arith.constant 0 : index
    %c0_57 = arith.constant 0 : index
    %76 = vector.load %arg7[%c0_55, %c0_56, %c0_57] : memref<8x9x8xf32, #tpu.memory_space<vmem>>, vector<8x1x8xf32>
    tpu.vector_store %arg7[%c0_55, %c0_56, %c0_57], %75 {strides = array<i32>} : memref<8x9x8xf32, #tpu.memory_space<vmem>>, vector<8x1x8xf32>,
    %77 = vector.extract_strided_slice %67 {offsets = [0, 0, 0], sizes = [7, 8, 8], strides = [1, 1, 1]} : vector<8x8x8xf32> to vector<7x8x8xf32>
    %78 = tpu.concatenate %70, %77 in 0 : vector<1x8x8xf32>, vector<7x8x8xf32> -> vector<8x8x8xf32>
    %79 = arith.addf %66, %78 : vector<8x8x8xf32>
    %c0_58 = arith.constant 0 : index
    %c0_59 = arith.constant 0 : index
    %c0_60 = arith.constant 0 : index
    %80 = vector.load %arg7[%c0_58, %c0_59, %c0_60] : memref<8x9x8xf32, #tpu.memory_space<vmem>>, vector<8x8x8xf32>
    %81 = arith.addf %79, %80 : vector<8x8x8xf32>
    %82 = vector.shape_cast %81 : vector<8x8x8xf32> to vector<64x8xf32>
    %cst_61 = arith.constant dense<0.000000e+00> : vector<8xf32>
    %83 = vector.multi_reduction <add>, %82, %cst_61 [0] : vector<64x8xf32> to vector<8xf32>
    %84 = vector.shape_cast %83 : vector<8xf32> to vector<1x8xf32>
    %c0_62 = arith.constant 0 : index
    %c0_63 = arith.constant 0 : index
    %c0_64 = arith.constant 0 : index
    %85 = vector.load %arg6[%c0_62, %c0_63, %c0_64] : memref<1x2x8xf32, #tpu.memory_space<vmem>>, vector<1x1x8xf32>
    %86 = vector.shape_cast %85 : vector<1x1x8xf32> to vector<1x8xf32>
    %87 = vector.shape_cast %84 : vector<1x8xf32> to vector<1x1x8xf32>
    tpu.vector_store %arg6[%c0_62, %c0_63, %c0_64], %87 {strides = array<i32>} : memref<1x2x8xf32, #tpu.memory_space<vmem>>, vector<1x1x8xf32>,
    %88 = arith.mulf %82, %82 : vector<64x8xf32>
    %cst_65 = arith.constant dense<0.000000e+00> : vector<8xf32>
    %89 = vector.multi_reduction <add>, %88, %cst_65 [0] : vector<64x8xf32> to vector<8xf32>
    %90 = vector.shape_cast %89 : vector<8xf32> to vector<1x8xf32>
    %c0_66 = arith.constant 0 : index
    %c1_67 = arith.constant 1 : index
    %c0_68 = arith.constant 0 : index
    %91 = vector.load %arg6[%c0_66, %c1_67, %c0_68] : memref<1x2x8xf32, #tpu.memory_space<vmem>>, vector<1x1x8xf32>
    %92 = vector.shape_cast %91 : vector<1x1x8xf32> to vector<1x8xf32>
    %93 = vector.shape_cast %90 : vector<1x8xf32> to vector<1x1x8xf32>
    tpu.vector_store %arg6[%c0_66, %c1_67, %c0_68], %93 {strides = array<i32>} : memref<1x2x8xf32, #tpu.memory_space<vmem>>, vector<1x1x8xf32>,
    %94 = vector.shape_cast %81 : vector<8x8x8xf32> to vector<1x8x8x8xf32>
    %95 = arith.truncf %94 : vector<1x8x8x8xf32> to vector<1x8x8x8xbf16>
    %c0_69 = arith.constant 0 : index
    %c0_70 = arith.constant 0 : index
    %c0_71 = arith.constant 0 : index
    %c0_72 = arith.constant 0 : index
    %96 = vector.load %arg5[%c0_69, %c0_70, %c0_71, %c0_72] : memref<1x8x8x8xbf16, #tpu.memory_space<vmem>>, vector<1x8x8x8xbf16>
    tpu.vector_store %arg5[%c0_69, %c0_70, %c0_71, %c0_72], %95 {strides = array<i32>} : memref<1x8x8x8xbf16, #tpu.memory_space<vmem>>, vector<1x8x8x8xbf16>,
    return
  }
  func.func @transform_0(%arg0: i32) -> (i32, i32, i32, i32, i32) {
    %c0_i32 = arith.constant 0 : i32
    %c0_i32_0 = arith.constant 0 : i32
    %c0_i32_1 = arith.constant 0 : i32
    %c0_i32_2 = arith.constant 0 : i32
    %c0_i32_3 = arith.constant 0 : i32
    return %c0_i32, %arg0, %c0_i32_0, %c0_i32_1, %c0_i32_2 : i32, i32, i32, i32, i32
  }
  func.func @transform_1(%arg0: i32) -> (i32, i32) {
    %c0_i32 = arith.constant 0 : i32
    %c0_i32_0 = arith.constant 0 : i32
    %c0_i32_1 = arith.constant 0 : i32
    return %c0_i32, %c0_i32_0 : i32, i32
  }
  func.func @transform_2(%arg0: i32) -> (i32, i32) {
    %c0_i32 = arith.constant 0 : i32
    %c0_i32_0 = arith.constant 0 : i32
    %c0_i32_1 = arith.constant 0 : i32
    return %c0_i32, %c0_i32_0 : i32, i32
  }
  func.func @transform_3(%arg0: i32) -> (i32, i32, i32) {
    %c0_i32 = arith.constant 0 : i32
    %c0_i32_0 = arith.constant 0 : i32
    %c0_i32_1 = arith.constant 0 : i32
    %c0_i32_2 = arith.constant 0 : i32
    return %c0_i32, %c0_i32_0, %c0_i32_1 : i32, i32, i32
  }
  func.func @transform_4(%arg0: i32) -> (i32, i32, i32, i32) {
    %c0_i32 = arith.constant 0 : i32
    %c0_i32_0 = arith.constant 0 : i32
    %c0_i32_1 = arith.constant 0 : i32
    %c0_i32_2 = arith.constant 0 : i32
    return %arg0, %c0_i32, %c0_i32_0, %c0_i32_1 : i32, i32, i32, i32
  }
  func.func @transform_5(%arg0: i32) -> (i32, i32, i32) {
    %c0_i32 = arith.constant 0 : i32
    %c0_i32_0 = arith.constant 0 : i32
    %c0_i32_1 = arith.constant 0 : i32
    return %arg0, %c0_i32, %c0_i32_0 : i32, i32, i32
  }
}

module attributes {stable_mosaic.version = 11 : i64} {
  func.func @_conv3_kernel(%arg0: i32, %arg1: memref<128x8xbf16, #tpu.memory_space<vmem>>, %arg2: memref<1x8xf32, #tpu.memory_space<vmem>>, %arg3: memref<1x8xf32, #tpu.memory_space<vmem>>, %arg4: memref<8x8xf32, #tpu.memory_space<vmem>>, %arg5: memref<128x8xbf16, #tpu.memory_space<vmem>>, %arg6: memref<1x2x8xf32, #tpu.memory_space<vmem>>) attributes {dimension_semantics = [#tpu.dimension_semantics<parallel>], iteration_bounds = array<i64: 1>, scalar_prefetch = 0 : i64, scratch_operands = 0 : i64, tpu.core_type = #tpu.core_type<tc>, window_params = [{transform_indices = @transform_0, window_bounds = array<i64: 128, 8>}, {pipeline_mode = #tpu.pipeline_mode<synchronous>, transform_indices = @transform_1, window_bounds = array<i64: 1, 8>}, {pipeline_mode = #tpu.pipeline_mode<synchronous>, transform_indices = @transform_2, window_bounds = array<i64: 1, 8>}, {pipeline_mode = #tpu.pipeline_mode<synchronous>, transform_indices = @transform_3, window_bounds = array<i64: 8, 8>}, {transform_indices = @transform_4, window_bounds = array<i64: 128, 8>}, {transform_indices = @transform_5, window_bounds = array<i64: 1, 2, 8>}]} {
    %c0 = arith.constant 0 : index
    %c0_0 = arith.constant 0 : index
    %0 = vector.load %arg1[%c0, %c0_0] : memref<128x8xbf16, #tpu.memory_space<vmem>>, vector<128x8xbf16>
    %1 = arith.extf %0 : vector<128x8xbf16> to vector<128x8xf32>
    %c0_1 = arith.constant 0 : index
    %c0_2 = arith.constant 0 : index
    %2 = vector.load %arg2[%c0_1, %c0_2] : memref<1x8xf32, #tpu.memory_space<vmem>>, vector<1x8xf32>
    %3 = vector.broadcast %2 : vector<1x8xf32> to vector<128x8xf32>
    %4 = arith.mulf %1, %3 : vector<128x8xf32>
    %c0_3 = arith.constant 0 : index
    %c0_4 = arith.constant 0 : index
    %5 = vector.load %arg3[%c0_3, %c0_4] : memref<1x8xf32, #tpu.memory_space<vmem>>, vector<1x8xf32>
    %6 = vector.broadcast %5 : vector<1x8xf32> to vector<128x8xf32>
    %7 = arith.addf %4, %6 : vector<128x8xf32>
    %c0_5 = arith.constant 0 : index
    %c0_6 = arith.constant 0 : index
    %8 = vector.load %arg4[%c0_5, %c0_6] : memref<8x8xf32, #tpu.memory_space<vmem>>, vector<8x8xf32>
    %cst = arith.constant dense<0.000000e+00> : vector<128x8xf32>
    %9 = tpu.matmul %7, %8, %cst {dimension_numbers = #tpu.dot_dimension_numbers<[1], [0], [0], [1], [0, 0, 1, 1], [], []>} : vector<128x8xf32>, vector<8x8xf32>, vector<128x8xf32> -> vector<128x8xf32>
    %cst_7 = arith.constant dense<0.000000e+00> : vector<8xf32>
    %10 = vector.multi_reduction <add>, %9, %cst_7 [0] : vector<128x8xf32> to vector<8xf32>
    %11 = vector.shape_cast %10 : vector<8xf32> to vector<1x8xf32>
    %c0_8 = arith.constant 0 : index
    %c0_9 = arith.constant 0 : index
    %c0_10 = arith.constant 0 : index
    %12 = vector.load %arg6[%c0_8, %c0_9, %c0_10] : memref<1x2x8xf32, #tpu.memory_space<vmem>>, vector<1x1x8xf32>
    %13 = vector.shape_cast %12 : vector<1x1x8xf32> to vector<1x8xf32>
    %14 = vector.shape_cast %11 : vector<1x8xf32> to vector<1x1x8xf32>
    tpu.vector_store %arg6[%c0_8, %c0_9, %c0_10], %14 {strides = array<i32>} : memref<1x2x8xf32, #tpu.memory_space<vmem>>, vector<1x1x8xf32>,
    %15 = arith.mulf %9, %9 : vector<128x8xf32>
    %cst_11 = arith.constant dense<0.000000e+00> : vector<8xf32>
    %16 = vector.multi_reduction <add>, %15, %cst_11 [0] : vector<128x8xf32> to vector<8xf32>
    %17 = vector.shape_cast %16 : vector<8xf32> to vector<1x8xf32>
    %c0_12 = arith.constant 0 : index
    %c1 = arith.constant 1 : index
    %c0_13 = arith.constant 0 : index
    %18 = vector.load %arg6[%c0_12, %c1, %c0_13] : memref<1x2x8xf32, #tpu.memory_space<vmem>>, vector<1x1x8xf32>
    %19 = vector.shape_cast %18 : vector<1x1x8xf32> to vector<1x8xf32>
    %20 = vector.shape_cast %17 : vector<1x8xf32> to vector<1x1x8xf32>
    tpu.vector_store %arg6[%c0_12, %c1, %c0_13], %20 {strides = array<i32>} : memref<1x2x8xf32, #tpu.memory_space<vmem>>, vector<1x1x8xf32>,
    %21 = arith.truncf %9 : vector<128x8xf32> to vector<128x8xbf16>
    %c0_14 = arith.constant 0 : index
    %c0_15 = arith.constant 0 : index
    %22 = vector.load %arg5[%c0_14, %c0_15] : memref<128x8xbf16, #tpu.memory_space<vmem>>, vector<128x8xbf16>
    tpu.vector_store %arg5[%c0_14, %c0_15], %21 {strides = array<i32>} : memref<128x8xbf16, #tpu.memory_space<vmem>>, vector<128x8xbf16>,
    return
  }
  func.func @transform_0(%arg0: i32) -> (i32, i32) {
    %c0_i32 = arith.constant 0 : i32
    %c0_i32_0 = arith.constant 0 : i32
    return %arg0, %c0_i32 : i32, i32
  }
  func.func @transform_1(%arg0: i32) -> (i32, i32) {
    %c0_i32 = arith.constant 0 : i32
    %c0_i32_0 = arith.constant 0 : i32
    %c0_i32_1 = arith.constant 0 : i32
    return %c0_i32, %c0_i32_0 : i32, i32
  }
  func.func @transform_2(%arg0: i32) -> (i32, i32) {
    %c0_i32 = arith.constant 0 : i32
    %c0_i32_0 = arith.constant 0 : i32
    %c0_i32_1 = arith.constant 0 : i32
    return %c0_i32, %c0_i32_0 : i32, i32
  }
  func.func @transform_3(%arg0: i32) -> (i32, i32) {
    %c0_i32 = arith.constant 0 : i32
    %c0_i32_0 = arith.constant 0 : i32
    %c0_i32_1 = arith.constant 0 : i32
    return %c0_i32, %c0_i32_0 : i32, i32
  }
  func.func @transform_4(%arg0: i32) -> (i32, i32) {
    %c0_i32 = arith.constant 0 : i32
    %c0_i32_0 = arith.constant 0 : i32
    return %arg0, %c0_i32 : i32, i32
  }
  func.func @transform_5(%arg0: i32) -> (i32, i32, i32) {
    %c0_i32 = arith.constant 0 : i32
    %c0_i32_0 = arith.constant 0 : i32
    %c0_i32_1 = arith.constant 0 : i32
    return %arg0, %c0_i32, %c0_i32_0 : i32, i32, i32
  }
}

module attributes {stable_mosaic.version = 11 : i64} {
  func.func @_out_kernel(%arg0: i32, %arg1: memref<128x8xbf16, #tpu.memory_space<vmem>>, %arg2: memref<128x8xbf16, #tpu.memory_space<vmem>>, %arg3: memref<1x8xf32, #tpu.memory_space<vmem>>, %arg4: memref<1x8xf32, #tpu.memory_space<vmem>>, %arg5: memref<1x8xf32, #tpu.memory_space<vmem>>, %arg6: memref<1x8xf32, #tpu.memory_space<vmem>>, %arg7: memref<128x8xbf16, #tpu.memory_space<vmem>>) attributes {dimension_semantics = [#tpu.dimension_semantics<parallel>], iteration_bounds = array<i64: 1>, scalar_prefetch = 0 : i64, scratch_operands = 0 : i64, tpu.core_type = #tpu.core_type<tc>, window_params = [{transform_indices = @transform_0, window_bounds = array<i64: 128, 8>}, {transform_indices = @transform_1, window_bounds = array<i64: 128, 8>}, {pipeline_mode = #tpu.pipeline_mode<synchronous>, transform_indices = @transform_2, window_bounds = array<i64: 1, 8>}, {pipeline_mode = #tpu.pipeline_mode<synchronous>, transform_indices = @transform_3, window_bounds = array<i64: 1, 8>}, {pipeline_mode = #tpu.pipeline_mode<synchronous>, transform_indices = @transform_4, window_bounds = array<i64: 1, 8>}, {pipeline_mode = #tpu.pipeline_mode<synchronous>, transform_indices = @transform_5, window_bounds = array<i64: 1, 8>}, {transform_indices = @transform_6, window_bounds = array<i64: 128, 8>}]} {
    %c0 = arith.constant 0 : index
    %c0_0 = arith.constant 0 : index
    %0 = vector.load %arg1[%c0, %c0_0] : memref<128x8xbf16, #tpu.memory_space<vmem>>, vector<128x8xbf16>
    %1 = arith.extf %0 : vector<128x8xbf16> to vector<128x8xf32>
    %c0_1 = arith.constant 0 : index
    %c0_2 = arith.constant 0 : index
    %2 = vector.load %arg3[%c0_1, %c0_2] : memref<1x8xf32, #tpu.memory_space<vmem>>, vector<1x8xf32>
    %3 = vector.broadcast %2 : vector<1x8xf32> to vector<128x8xf32>
    %4 = arith.mulf %1, %3 : vector<128x8xf32>
    %c0_3 = arith.constant 0 : index
    %c0_4 = arith.constant 0 : index
    %5 = vector.load %arg4[%c0_3, %c0_4] : memref<1x8xf32, #tpu.memory_space<vmem>>, vector<1x8xf32>
    %6 = vector.broadcast %5 : vector<1x8xf32> to vector<128x8xf32>
    %7 = arith.addf %4, %6 : vector<128x8xf32>
    %c0_5 = arith.constant 0 : index
    %c0_6 = arith.constant 0 : index
    %8 = vector.load %arg2[%c0_5, %c0_6] : memref<128x8xbf16, #tpu.memory_space<vmem>>, vector<128x8xbf16>
    %9 = arith.extf %8 : vector<128x8xbf16> to vector<128x8xf32>
    %c0_7 = arith.constant 0 : index
    %c0_8 = arith.constant 0 : index
    %10 = vector.load %arg5[%c0_7, %c0_8] : memref<1x8xf32, #tpu.memory_space<vmem>>, vector<1x8xf32>
    %11 = vector.broadcast %10 : vector<1x8xf32> to vector<128x8xf32>
    %12 = arith.mulf %9, %11 : vector<128x8xf32>
    %c0_9 = arith.constant 0 : index
    %c0_10 = arith.constant 0 : index
    %13 = vector.load %arg6[%c0_9, %c0_10] : memref<1x8xf32, #tpu.memory_space<vmem>>, vector<1x8xf32>
    %14 = vector.broadcast %13 : vector<1x8xf32> to vector<128x8xf32>
    %15 = arith.addf %12, %14 : vector<128x8xf32>
    %16 = arith.addf %7, %15 : vector<128x8xf32>
    %cst = arith.constant 0.000000e+00 : f32
    %17 = vector.broadcast %cst : f32 to vector<128x8xf32>
    %18 = arith.maximumf %16, %17 : vector<128x8xf32>
    %19 = arith.truncf %18 : vector<128x8xf32> to vector<128x8xbf16>
    %c0_11 = arith.constant 0 : index
    %c0_12 = arith.constant 0 : index
    %20 = vector.load %arg7[%c0_11, %c0_12] : memref<128x8xbf16, #tpu.memory_space<vmem>>, vector<128x8xbf16>
    tpu.vector_store %arg7[%c0_11, %c0_12], %19 {strides = array<i32>} : memref<128x8xbf16, #tpu.memory_space<vmem>>, vector<128x8xbf16>,
    return
  }
  func.func @transform_0(%arg0: i32) -> (i32, i32) {
    %c0_i32 = arith.constant 0 : i32
    %c0_i32_0 = arith.constant 0 : i32
    return %arg0, %c0_i32 : i32, i32
  }
  func.func @transform_1(%arg0: i32) -> (i32, i32) {
    %c0_i32 = arith.constant 0 : i32
    %c0_i32_0 = arith.constant 0 : i32
    return %arg0, %c0_i32 : i32, i32
  }
  func.func @transform_2(%arg0: i32) -> (i32, i32) {
    %c0_i32 = arith.constant 0 : i32
    %c0_i32_0 = arith.constant 0 : i32
    %c0_i32_1 = arith.constant 0 : i32
    return %c0_i32, %c0_i32_0 : i32, i32
  }
  func.func @transform_3(%arg0: i32) -> (i32, i32) {
    %c0_i32 = arith.constant 0 : i32
    %c0_i32_0 = arith.constant 0 : i32
    %c0_i32_1 = arith.constant 0 : i32
    return %c0_i32, %c0_i32_0 : i32, i32
  }
  func.func @transform_4(%arg0: i32) -> (i32, i32) {
    %c0_i32 = arith.constant 0 : i32
    %c0_i32_0 = arith.constant 0 : i32
    %c0_i32_1 = arith.constant 0 : i32
    return %c0_i32, %c0_i32_0 : i32, i32
  }
  func.func @transform_5(%arg0: i32) -> (i32, i32) {
    %c0_i32 = arith.constant 0 : i32
    %c0_i32_0 = arith.constant 0 : i32
    %c0_i32_1 = arith.constant 0 : i32
    return %c0_i32, %c0_i32_0 : i32, i32
  }
  func.func @transform_6(%arg0: i32) -> (i32, i32) {
    %c0_i32 = arith.constant 0 : i32
    %c0_i32_0 = arith.constant 0 : i32
    return %arg0, %c0_i32 : i32, i32
  }
}

</mosaic_0001>

<bundles_post_ra>
// kernel: bottleneck_unit.6
= control target key start
LH: loop header
LB: loop body
LE: loop exit
PB: predicated region body
PF: predicated region fallthrough
CT: control target
= control target key end

     0   :  { %vm98_vm0 = vcmask 64512   ;;  %vm449_vm1 = vcmask 60416   ;;  %vm329_vm2 = vcmask 57344   ;;  %s839_s3 = inlined_call_operand.vmem [shape: f32[8,8], index: 3, kind: input, shape index: {}]   ;;  %s840_s0 = inlined_call_operand.vmem [shape: bf16[128,8], index: 0, kind: input, shape index: {}]   ;;  %s841_s1 = inlined_call_operand.vmem [shape: f32[1,8], index: 1, kind: input, shape index: {}]   ;;  %s842_s2 = inlined_call_operand.vmem [shape: f32[1,8], index: 2, kind: input, shape index: {}]   ;;  %s843_s4 = inlined_call_operand.vmem [shape: bf16[128,8], index: 4, kind: output, shape index: {0}]   ;;  %s844_s5 = inlined_call_operand.vmem [shape: f32[1,2,8], index: 5, kind: output, shape index: {1}]  }
   0x1   :  { %v97_v0 = vld [vmem:[%s839_s3] sm:$0xff]  ;;  %v556_v5 = vld [vmem:[%s840_s0 + $0x8] sm:$0xff]   ;;  %v557_v6 = vld [vmem:[%s840_s0 + $0x10] sm:$0xff]  }
   0x2   :  { %v525_v1 = vld [vmem:[%s840_s0] sm:$0xff]   ;;  %580 = vmatprep.subr.mxu0 %v97_v0  ;;  %606 = vmatprep.subr.mxu1 %v97_v0  ;;  %v530_v8 = vunpack.c.l.bf16 %v556_v5  ;;  %v531_v9 = vunpack.c.h.bf16 %v556_v5  ;;  %v534_v10 = vunpack.c.l.bf16 %v557_v6  ;;  %v558_v11 = vld [vmem:[%s840_s0 + $0x18] sm:$0xff]   ;;  %v535_v14 = vunpack.c.h.bf16 %v557_v6  ;;  %v560_v22 = vld [vmem:[%s840_s0 + $0x28] sm:$0xff]  }
   0x3   :  { %v647_v2 = vld [vmem:[%s841_s1] ss:$0 sm:$0xff]  ;;  %v526_v3 = vunpack.c.l.bf16 %v525_v1  ;;  %v527_v4 = vunpack.c.h.bf16 %v525_v1  ;;  %581 = vmatpush3.msra.mxu0 %v97_v0  ;;  %607 = vmatpush3.msra.mxu1 %v97_v0  ;;  %v538_v21 = vunpack.c.l.bf16 %v558_v11  ;;  %v561_v23 = vld [vmem:[%s840_s0 + $0x30] sm:$0xff]   ;;  %v539_v26 = vunpack.c.h.bf16 %v558_v11  ;;  %v562_v33 = vld [vmem:[%s840_s0 + $0x38] sm:$0xff]  }
   0x4   :  { %v658_v7 = vld [vmem:[%s842_s2] ss:$0 sm:$0xff]  ;;  %v60_v15 = vmul.f32 %v530_v8, %v647_v2  ;;  %v61_v16 = vmul.f32 %v531_v9, %v647_v2  ;;  %v62_v20 = vmul.f32 %v534_v10, %v647_v2  ;;  %v63_v25 = vmul.f32 %v535_v14, %v647_v2 }
   0x5   :  { %v58_v12 = vmul.f32 %v526_v3, %v647_v2  ;;  %v59_v13 = vmul.f32 %v527_v4, %v647_v2  ;;  %v559_v17 = vld [vmem:[%s840_s0 + $0x20] sm:$0xff]   ;;  %v546_v30 = vunpack.c.l.bf16 %v560_v22  ;;  %v547_v31 = vunpack.c.h.bf16 %v560_v22 }
   0x6   :  { %v83_v24 = vadd.f32 %v658_v7, %v60_v15  ;;  %v542_v27 = vunpack.c.l.bf16 %v559_v17  ;;  %v543_v28 = vunpack.c.h.bf16 %v559_v17  ;;  %v84_v29 = vadd.f32 %v658_v7, %v61_v16 }
   0x7   :  { %v81_v18 = vadd.f32 %v658_v7, %v58_v12  ;;  %v82_v19 = vadd.f32 %v658_v7, %v59_v13  ;;  %v550_v32 = vunpack.c.l.bf16 %v561_v23  ;;  %v85_v34 = vadd.f32 %v658_v7, %v62_v20 }
   0x8   :  { %v64_v35 = vmul.f32 %v538_v21, %v647_v2  ;;  %v66_v36 = vmul.f32 %v542_v27, %v647_v2  ;;  %v67_v37 = vmul.f32 %v543_v28, %v647_v2  ;;  %v68_v38 = vmul.f32 %v546_v30, %v647_v2 }
   0x9   :  { %582 = vmatprep.mubr.msk.f32.mxu0 %vm98_vm0, %v81_v18  ;;  %v69_v39 = vmul.f32 %v547_v31, %v647_v2  ;;  %v551_v40 = vunpack.c.h.bf16 %v561_v23  ;;  %v70_v43 = vmul.f32 %v550_v32, %v647_v2  ;;  %v554_v44 = vunpack.c.l.bf16 %v562_v33 }
   0xa   :  { %583 = vmatmul.mubr.msk.f32.vlgmr.msra.gmra.mxu0 %vm98_vm0, %v82_v19  ;;  %v89_v41 = vadd.f32 %v658_v7, %v66_v36  ;;  %v90_v42 = vadd.f32 %v658_v7, %v67_v37  ;;  %v86_v45 = vadd.f32 %v658_v7, %v63_v25  ;;  %v65_v46 = vmul.f32 %v539_v26, %v647_v2 }
   0xb   :  { %585 = vmatprep.mubr.msk.f32.mxu0 %vm98_vm0, %v83_v24  ;;  %v91_v47 = vadd.f32 %v658_v7, %v68_v38  ;;  %v87_v48 = vadd.f32 %v658_v7, %v64_v35  ;;  %v92_v49 = vadd.f32 %v658_v7, %v69_v39  ;;  %v71_v50 = vmul.f32 %v551_v40, %v647_v2 }
   0xc   :  { %594 = vmatprep.mubr.msk.f32.mxu1 %vm98_vm0, %v89_v41  ;;  %v555_v51 = vunpack.c.h.bf16 %v562_v33  ;;  %v93_v52 = vadd.f32 %v658_v7, %v70_v43  ;;  %v72_v53 = vmul.f32 %v554_v44, %v647_v2  ;;  %v88_v54 = vadd.f32 %v658_v7, %v65_v46 }
   0xd   :  { %595 = vmatmul.mubr.msk.f32.vlgmr.msra.gmra.mxu1 %vm98_vm0, %v90_v42  ;;  %v94_v55 = vadd.f32 %v658_v7, %v71_v50 }
   0xe   :  { %586 = vmatmul.mubr.msk.f32.gmra.mxu0 %vm98_vm0, %v84_v29  ;;  %597 = vmatprep.mubr.msk.f32.mxu1 %vm98_vm0, %v91_v47  ;;  %v73_v56 = vmul.f32 %v555_v51, %v647_v2  ;;  %v95_v57 = vadd.f32 %v658_v7, %v72_v53 }
   0xf   :  { %588 = vmatprep.mubr.msk.f32.mxu0 %vm98_vm0, %v85_v34 }
  0x10   :  { %v96_v58 = vadd.f32 %v658_v7, %v73_v56 }
  0x11   :  { %598 = vmatmul.mubr.msk.f32.gmra.mxu1 %vm98_vm0, %v92_v49 }
  0x12   :  { %589 = vmatmul.mubr.msk.f32.gmra.mxu0 %vm98_vm0, %v86_v45  ;;  %600 = vmatprep.mubr.msk.f32.mxu1 %vm98_vm0, %v93_v52 }
  0x13   :  { %591 = vmatprep.mubr.msk.f32.mxu0 %vm98_vm0, %v87_v48 }
  0x15   :  { %601 = vmatmul.mubr.msk.f32.gmra.mxu1 %vm98_vm0, %v94_v55 }
  0x16   :  { %592 = vmatmul.mubr.msk.f32.gmra.mxu0 %vm98_vm0, %v88_v54  ;;  %603 = vmatprep.mubr.msk.f32.mxu1 %vm98_vm0, %v95_v57 }
  0x19   :  { %604 = vmatmul.mubr.msk.f32.gmra.mxu1 %vm98_vm0, %v96_v58 }
  0xca   :  { %v584_v59 = vpop.f32.mrf.mxu0 }
  0xcb   :  { %v509_v60 = vpack.c.bf16 %v584_v59, %v584_v59  ;;  %v332_v61 = vmul.f32 %v584_v59, %v584_v59  ;;  %v293_v3 = vsel %vm98_vm0, %v584_v59, 0.0 }
  0xcc   :  { %v213_v62 = vpop.f32.mrf.mxu0 }
  0xcd   :  { %451 = vst.msk [vmem:[%s843_s4 + $0x4] sm:$0xf] %vm449_vm1, %v509_v60  ;;  %v292_v63 = vsel %vm98_vm0, %v213_v62, 0.0  ;;  %v331_v0 = vmul.f32 %v213_v62, %v213_v62  ;;  %v508_v1 = vpack.c.bf16 %v213_v62, %v213_v62  ;;  %v348_v6 = vsel %vm98_vm0, %v332_v61, 0.0  ;;  %v735_v9 = vpop.f32.mrf.mxu1 }
  0xce   :  { %v587_v2 = vpop.f32.mrf.mxu0  ;;  %v294_v7 = vadd.f32 %v293_v3, %v292_v63  ;;  %v517_v17 = vpack.c.bf16 %v735_v9, %v735_v9  ;;  %v340_v60 = vmul.f32 %v735_v9, %v735_v9  ;;  %v309_v3 = vsel %vm98_vm0, %v735_v9, 0.0 }
  0xcf   :  { %v347_v4 = vsel %vm98_vm0, %v331_v0, 0.0  ;;  %450 = vst.msk [vmem:[%s843_s4] sm:$0xf] %vm449_vm1, %v508_v1  ;;  %v511_v5 = vpack.c.bf16 %v587_v2, %v587_v2  ;;  %v334_v10 = vmul.f32 %v587_v2, %v587_v2  ;;  %v253_v18 = vpop.f32.mrf.mxu1  ;;  %v297_v19 = vsel %vm98_vm0, %v587_v2, 0.0 }
  0xd0   :  { %v223_v8 = vpop.f32.mrf.mxu0  ;;  %v349_v14 = vadd.f32 %v348_v6, %v347_v4  ;;  %459 = vst.msk [vmem:[%s843_s4 + $0x24] sm:$0xf] %vm449_vm1, %v517_v17  ;;  %v516_v34 = vpack.c.bf16 %v253_v18, %v253_v18  ;;  %v339_v54 = vmul.f32 %v253_v18, %v253_v18  ;;  %v307_v61 = vsel %vm98_vm0, %v253_v18, 0.0 }
  0xd1   :  { %453 = vst.msk [vmem:[%s843_s4 + $0xc] sm:$0xf] %vm449_vm1, %v511_v5  ;;  %v295_v11 = vsel %vm98_vm0, %v223_v8, 0.0  ;;  %v333_v12 = vmul.f32 %v223_v8, %v223_v8  ;;  %v510_v13 = vpack.c.bf16 %v223_v8, %v223_v8  ;;  %v754_v26 = vpop.f32.mrf.mxu1  ;;  %v352_v27 = vsel %vm98_vm0, %v334_v10, 0.0 }
  0xd2   :  { %v296_v15 = vadd.f32 %v295_v11, %v294_v7  ;;  %v590_v16 = vpop.f32.mrf.mxu0  ;;  %458 = vst.msk [vmem:[%s843_s4 + $0x20] sm:$0xf] %vm449_vm1, %v516_v34  ;;  %v519_v50 = vpack.c.bf16 %v754_v26, %v754_v26  ;;  %v362_v4 = vsel %vm98_vm0, %v339_v54, 0.0  ;;  %v364_v10 = vsel %vm98_vm0, %v340_v60, 0.0 }
  0xd3   :  { %v350_v20 = vsel %vm98_vm0, %v333_v12, 0.0  ;;  %452 = vst.msk [vmem:[%s843_s4 + $0x8] sm:$0xf] %vm449_vm1, %v510_v13  ;;  %v513_v21 = vpack.c.bf16 %v590_v16, %v590_v16  ;;  %v336_v23 = vmul.f32 %v590_v16, %v590_v16  ;;  %v263_v35 = vpop.f32.mrf.mxu1  ;;  %v301_v36 = vsel %vm98_vm0, %v590_v16, 0.0 }
  0xd4   :  { %v351_v22 = vadd.f32 %v350_v20, %v349_v14  ;;  %v233_v24 = vpop.f32.mrf.mxu0  ;;  %v298_v25 = vadd.f32 %v297_v19, %v296_v15  ;;  %v518_v55 = vpack.c.bf16 %v263_v35, %v263_v35  ;;  %461 = vst.msk [vmem:[%s843_s4 + $0x2c] sm:$0xf] %vm449_vm1, %v519_v50  ;;  %v341_v5 = vmul.f32 %v263_v35, %v263_v35 }
  0xd5   :  { %455 = vst.msk [vmem:[%s843_s4 + $0x14] sm:$0xf] %vm449_vm1, %v513_v21  ;;  %v299_v28 = vsel %vm98_vm0, %v233_v24, 0.0  ;;  %v335_v29 = vmul.f32 %v233_v24, %v233_v24  ;;  %v512_v30 = vpack.c.bf16 %v233_v24, %v233_v24  ;;  %v356_v39 = vsel %vm98_vm0, %v336_v23, 0.0  ;;  %v602_v43 = vpop.f32.mrf.mxu1 }
  0xd6   :  { %v300_v31 = vadd.f32 %v299_v28, %v298_v25  ;;  %v353_v32 = vadd.f32 %v352_v27, %v351_v22  ;;  %v593_v33 = vpop.f32.mrf.mxu0  ;;  %460 = vst.msk [vmem:[%s843_s4 + $0x28] sm:$0xf] %vm449_vm1, %v518_v55  ;;  %v521_v62 = vpack.c.bf16 %v602_v43, %v602_v43  ;;  %v342_v9 = vmul.f32 %v754_v26, %v754_v26 }
  0xd7   :  { %v354_v37 = vsel %vm98_vm0, %v335_v29, 0.0  ;;  %454 = vst.msk [vmem:[%s843_s4 + $0x10] sm:$0xf] %vm449_vm1, %v512_v30  ;;  %v515_v38 = vpack.c.bf16 %v593_v33, %v593_v33  ;;  %v338_v44 = vmul.f32 %v593_v33, %v593_v33  ;;  %v273_v51 = vpop.f32.mrf.mxu1  ;;  %v305_v52 = vsel %vm98_vm0, %v593_v33, 0.0 }
  0xd8   :  { %v355_v40 = vadd.f32 %v354_v37, %v353_v32  ;;  %v243_v41 = vpop.f32.mrf.mxu0  ;;  %v302_v42 = vadd.f32 %v301_v36, %v300_v31  ;;  %v520_v1 = vpack.c.bf16 %v273_v51, %v273_v51  ;;  %463 = vst.msk [vmem:[%s843_s4 + $0x34] sm:$0xf] %vm449_vm1, %v521_v62  ;;  %v311_v11 = vsel %vm98_vm0, %v263_v35, 0.0 }
  0xd9   :  { %457 = vst.msk [vmem:[%s843_s4 + $0x1c] sm:$0xf] %vm449_vm1, %v515_v38  ;;  %v303_v45 = vsel %vm98_vm0, %v243_v41, 0.0  ;;  %v337_v46 = vmul.f32 %v243_v41, %v243_v41  ;;  %v514_v47 = vpack.c.bf16 %v243_v41, %v243_v41  ;;  %v605_v58 = vpop.f32.mrf.mxu1  ;;  %v360_v59 = vsel %vm98_vm0, %v338_v44, 0.0 }
  0xda   :  { %v304_v48 = vadd.f32 %v303_v45, %v302_v42  ;;  %v357_v49 = vadd.f32 %v356_v39, %v355_v40  ;;  %v523_v6 = vpack.c.bf16 %v605_v58, %v605_v58  ;;  %462 = vst.msk [vmem:[%s843_s4 + $0x30] sm:$0xf] %vm449_vm1, %v520_v1  ;;  %v313_v15 = vsel %vm98_vm0, %v754_v26, 0.0 }
  0xdb   :  { %v358_v53 = vsel %vm98_vm0, %v337_v46, 0.0  ;;  %456 = vst.msk [vmem:[%s843_s4 + $0x18] sm:$0xf] %vm449_vm1, %v514_v47  ;;  %v283_v2 = vpop.f32.mrf.mxu1  ;;  %v366_v16 = vsel %vm98_vm0, %v341_v5, 0.0  ;;  %v343_v17 = vmul.f32 %v273_v51, %v273_v51  ;;  %v368_v20 = vsel %vm98_vm0, %v342_v9, 0.0 }
  0xdc   :  { %v306_v56 = vadd.f32 %v305_v52, %v304_v48  ;;  %v359_v57 = vadd.f32 %v358_v53, %v357_v49  ;;  %465 = vst.msk [vmem:[%s843_s4 + $0x3c] sm:$0xf] %vm449_vm1, %v523_v6  ;;  %v522_v12 = vpack.c.bf16 %v283_v2, %v283_v2  ;;  %v344_v21 = vmul.f32 %v602_v43, %v602_v43 }
  0xdd   :  { %v315_v22 = vsel %vm98_vm0, %v273_v51, 0.0  ;;  %v317_v25 = vsel %vm98_vm0, %v602_v43, 0.0  ;;  %v370_v26 = vsel %vm98_vm0, %v343_v17, 0.0  ;;  %v345_v27 = vmul.f32 %v283_v2, %v283_v2 }
  0xde   :  { %v361_v63 = vadd.f32 %v360_v59, %v359_v57  ;;  %v308_v0 = vadd.f32 %v307_v61, %v306_v56  ;;  %464 = vst.msk [vmem:[%s843_s4 + $0x38] sm:$0xf] %vm449_vm1, %v522_v12  ;;  %v372_v30 = vsel %vm98_vm0, %v344_v21, 0.0  ;;  %v346_v31 = vmul.f32 %v605_v58, %v605_v58 }
  0xdf   :  { %v319_v32 = vsel %vm98_vm0, %v283_v2, 0.0  ;;  %v321_v35 = vsel %vm98_vm0, %v605_v58, 0.0  ;;  %v374_v36 = vsel %vm98_vm0, %v345_v27, 0.0 }
  0xe0   :  { %v363_v7 = vadd.f32 %v362_v4, %v361_v63  ;;  %v310_v8 = vadd.f32 %v309_v3, %v308_v0  ;;  %v376_v39 = vsel %vm98_vm0, %v346_v31, 0.0 }
  0xe2   :  { %v312_v13 = vadd.f32 %v311_v11, %v310_v8  ;;  %v365_v14 = vadd.f32 %v364_v10, %v363_v7 }
  0xe4   :  { %v367_v18 = vadd.f32 %v366_v16, %v365_v14  ;;  %v314_v19 = vadd.f32 %v313_v15, %v312_v13 }
  0xe6   :  { %v316_v23 = vadd.f32 %v315_v22, %v314_v19  ;;  %v369_v24 = vadd.f32 %v368_v20, %v367_v18 }
  0xe8   :  { %v371_v28 = vadd.f32 %v370_v26, %v369_v24  ;;  %v318_v29 = vadd.f32 %v317_v25, %v316_v23 }
  0xea   :  { %v320_v33 = vadd.f32 %v319_v32, %v318_v29  ;;  %v373_v34 = vadd.f32 %v372_v30, %v371_v28 }
  0xec   :  { %v322_v37 = vadd.f32 %v321_v35, %v320_v33  ;;  %v375_v38 = vadd.f32 %v374_v36, %v373_v34 }
  0xee   :  { %v323_v40 = vrot.slane %v322_v37, 4  ;;  %v377_v41 = vadd.f32 %v376_v39, %v375_v38 }
  0xf0   :  { %v324_v42 = vadd.f32 %v323_v40, %v322_v37  ;;  %v378_v43 = vrot.slane %v377_v41, 4 }
  0xf2   :  { %v325_v44 = vrot.slane %v324_v42, 2  ;;  %v379_v45 = vadd.f32 %v378_v43, %v377_v41 }
  0xf4   :  { %v326_v46 = vadd.f32 %v325_v44, %v324_v42  ;;  %v380_v47 = vrot.slane %v379_v45, 2 }
  0xf6   :  { %v327_v48 = vrot.slane %v326_v46, 1  ;;  %v381_v49 = vadd.f32 %v380_v47, %v379_v45 }
  0xf8   :  { %v328_v50 = vadd.f32 %v327_v48, %v326_v46  ;;  %v382_v51 = vrot.slane %v381_v49, 1 }
  0xfa   :  { %330 = vst.msk [vmem:[%s844_s5] sm:$0x1] %vm329_vm2, %v328_v50  ;;  %v383_v52 = vadd.f32 %v382_v51, %v381_v49 }
  0xfc   :  { %384 = vst.msk [vmem:[%s844_s5 + $0x1] sm:$0x1] %vm329_vm2, %v383_v52 }

// kernel: bottleneck_unit.7
= control target key start
LH: loop header
LB: loop body
LE: loop exit
PB: predicated region body
PF: predicated region fallthrough
CT: control target
= control target key end

     0   :  { %vm275_vm0 = vcmask 60416   ;;  %s641_s0 = inlined_call_operand.vmem [shape: bf16[128,8], index: 0, kind: input, shape index: {}, may-alias: {0,6}]   ;;  %s642_s1 = inlined_call_operand.vmem [shape: bf16[128,8], index: 1, kind: input, shape index: {}]   ;;  %s643_s2 = inlined_call_operand.vmem [shape: f32[1,8], index: 2, kind: input, shape index: {}]   ;;  %s644_s3 = inlined_call_operand.vmem [shape: f32[1,8], index: 3, kind: input, shape index: {}]   ;;  %s645_s4 = inlined_call_operand.vmem [shape: f32[1,8], index: 4, kind: input, shape index: {}]   ;;  %s646_s5 = inlined_call_operand.vmem [shape: f32[1,8], index: 5, kind: input, shape index: {}]   ;;  %s647_s6 = inlined_call_operand.vmem [shape: bf16[128,8], index: 6, kind: output, shape index: {}, may-alias: {0,6}]  }
   0x1   :  { %v333_v0 = vld [vmem:[%s641_s0] sm:$0xff]   ;;  %v396_v9 = vld [vmem:[%s641_s0 + $0x8] sm:$0xff]   ;;  %v397_v20 = vld [vmem:[%s641_s0 + $0x10] sm:$0xff]  }
   0x2   :  { %v451_v1 = vld [vmem:[%s643_s2] ss:$0 sm:$0xff]  ;;  %v334_v2 = vunpack.c.l.bf16 %v333_v0  ;;  %v335_v3 = vunpack.c.h.bf16 %v333_v0  ;;  %v403_v10 = vld [vmem:[%s642_s1 + $0x8] sm:$0xff]   ;;  %v338_v14 = vunpack.c.l.bf16 %v396_v9  ;;  %v339_v15 = vunpack.c.h.bf16 %v396_v9  ;;  %v404_v29 = vld [vmem:[%s642_s1 + $0x10] sm:$0xff]  }
   0x3   :  { %v365_v4 = vld [vmem:[%s642_s1] sm:$0xff]   ;;  %v370_v18 = vunpack.c.l.bf16 %v403_v10  ;;  %v371_v19 = vunpack.c.h.bf16 %v403_v10  ;;  %v342_v32 = vunpack.c.l.bf16 %v397_v20  ;;  %v343_v33 = vunpack.c.h.bf16 %v397_v20  ;;  %v398_v46 = vld [vmem:[%s641_s0 + $0x18] sm:$0xff]  }
   0x4   :  { %v459_v5 = vld [vmem:[%s645_s4] ss:$0 sm:$0xff]  ;;  %v366_v7 = vunpack.c.l.bf16 %v365_v4  ;;  %v367_v8 = vunpack.c.h.bf16 %v365_v4  ;;  %v62_v11 = vmul.f32 %v334_v2, %v451_v1  ;;  %v63_v12 = vmul.f32 %v335_v3, %v451_v1  ;;  %v405_v51 = vld [vmem:[%s642_s1 + $0x18] sm:$0xff]  }
   0x5   :  { %v464_v6 = vld [vmem:[%s644_s3] ss:$0 sm:$0xff]  ;;  %v64_v23 = vmul.f32 %v338_v14, %v451_v1  ;;  %v65_v24 = vmul.f32 %v339_v15, %v451_v1  ;;  %v142_v27 = vmul.f32 %v370_v18, %v459_v5  ;;  %v143_v28 = vmul.f32 %v371_v19, %v459_v5 }
   0x6   :  { %v477_v13 = vld [vmem:[%s646_s5] ss:$0 sm:$0xff]  ;;  %v140_v16 = vmul.f32 %v366_v7, %v459_v5  ;;  %v141_v17 = vmul.f32 %v367_v8, %v459_v5  ;;  %v85_v21 = vadd.f32 %v464_v6, %v62_v11  ;;  %v86_v22 = vadd.f32 %v464_v6, %v63_v12 }
   0x7   :  { %v87_v30 = vadd.f32 %v464_v6, %v64_v23  ;;  %v88_v31 = vadd.f32 %v464_v6, %v65_v24  ;;  %v165_v36 = vadd.f32 %v477_v13, %v142_v27  ;;  %v166_v37 = vadd.f32 %v477_v13, %v143_v28  ;;  %v399_v60 = vld [vmem:[%s641_s0 + $0x20] sm:$0xff]   ;;  %v407_v27 = vld [vmem:[%s642_s1 + $0x28] sm:$0xff]  }
   0x8   :  { %v163_v25 = vadd.f32 %v477_v13, %v140_v16  ;;  %v164_v26 = vadd.f32 %v477_v13, %v141_v17  ;;  %v66_v38 = vmul.f32 %v342_v32, %v451_v1  ;;  %v67_v39 = vmul.f32 %v343_v33, %v451_v1  ;;  %v406_v12 = vld [vmem:[%s642_s1 + $0x20] sm:$0xff]  }
   0x9   :  { %v374_v40 = vunpack.c.l.bf16 %v404_v29  ;;  %v375_v41 = vunpack.c.h.bf16 %v404_v29  ;;  %v181_v44 = vadd.f32 %v165_v36, %v87_v30  ;;  %v182_v45 = vadd.f32 %v166_v37, %v88_v31 }
   0xa   :  { %v179_v34 = vadd.f32 %v163_v25, %v85_v21  ;;  %v180_v35 = vadd.f32 %v164_v26, %v86_v22  ;;  %v89_v47 = vadd.f32 %v464_v6, %v66_v38  ;;  %v90_v49 = vadd.f32 %v464_v6, %v67_v39 }
   0xb   :  { %v144_v48 = vmul.f32 %v374_v40, %v459_v5  ;;  %v145_v50 = vmul.f32 %v375_v41, %v459_v5  ;;  %v197_v54 = vmax.f32 %v181_v44, 0.0  ;;  %v198_v55 = vmax.f32 %v182_v45, 0.0 }
   0xc   :  { %v195_v42 = vmax.f32 %v179_v34, 0.0  ;;  %v196_v43 = vmax.f32 %v180_v35, 0.0  ;;  %v346_v58 = vunpack.c.l.bf16 %v398_v46  ;;  %v347_v59 = vunpack.c.h.bf16 %v398_v46 }
   0xd   :  { %v167_v56 = vadd.f32 %v477_v13, %v144_v48  ;;  %v168_v57 = vadd.f32 %v477_v13, %v145_v50  ;;  %v318_v61 = vpack.c.bf16 %v197_v54, %v197_v54  ;;  %v319_v62 = vpack.c.bf16 %v198_v55, %v198_v55 }
   0xe   :  { %v316_v52 = vpack.c.bf16 %v195_v42, %v195_v42  ;;  %v317_v53 = vpack.c.bf16 %v196_v43, %v196_v43  ;;  %v378_v63 = vunpack.c.l.bf16 %v405_v51  ;;  %v379_v0 = vunpack.c.h.bf16 %v405_v51 }
   0xf   :  { %v183_v2 = vadd.f32 %v167_v56, %v89_v47  ;;  %v184_v3 = vadd.f32 %v168_v57, %v90_v49  ;;  %v68_v4 = vmul.f32 %v346_v58, %v451_v1  ;;  %v69_v7 = vmul.f32 %v347_v59, %v451_v1  ;;  %278 = vst.msk [vmem:[%s647_s6 + $0x8] sm:$0xf] %vm275_vm0, %v318_v61  ;;  %v408_v49 = vld [vmem:[%s642_s1 + $0x30] sm:$0xff]  }
  0x10   :  { %276 = vst.msk [vmem:[%s647_s6] sm:$0xf] %vm275_vm0, %v316_v52  ;;  %277 = vst.msk [vmem:[%s647_s6 + $0x4] sm:$0xf] %vm275_vm0, %v317_v53  ;;  %v146_v8 = vmul.f32 %v378_v63, %v459_v5  ;;  %v147_v9 = vmul.f32 %v379_v0, %v459_v5  ;;  %v350_v10 = vunpack.c.l.bf16 %v399_v60  ;;  %v351_v11 = vunpack.c.h.bf16 %v399_v60 }
  0x11   :  { %279 = vst.msk [vmem:[%s647_s6 + $0xc] sm:$0xf] %vm275_vm0, %v319_v62  ;;  %v199_v14 = vmax.f32 %v183_v2, 0.0  ;;  %v200_v15 = vmax.f32 %v184_v3, 0.0  ;;  %v91_v16 = vadd.f32 %v464_v6, %v68_v4  ;;  %v92_v17 = vadd.f32 %v464_v6, %v69_v7 }
  0x12   :  { %v169_v18 = vadd.f32 %v477_v13, %v146_v8  ;;  %v170_v19 = vadd.f32 %v477_v13, %v147_v9  ;;  %v70_v20 = vmul.f32 %v350_v10, %v451_v1  ;;  %v71_v21 = vmul.f32 %v351_v11, %v451_v1  ;;  %v409_v10 = vld [vmem:[%s642_s1 + $0x38] sm:$0xff]  }
  0x13   :  { %v320_v23 = vpack.c.bf16 %v199_v14, %v199_v14  ;;  %v321_v24 = vpack.c.bf16 %v200_v15, %v200_v15  ;;  %v382_v25 = vunpack.c.l.bf16 %v406_v12  ;;  %v383_v26 = vunpack.c.h.bf16 %v406_v12 }
  0x14   :  { %v185_v28 = vadd.f32 %v169_v18, %v91_v16  ;;  %v186_v29 = vadd.f32 %v170_v19, %v92_v17  ;;  %v93_v30 = vadd.f32 %v464_v6, %v70_v20  ;;  %v94_v31 = vadd.f32 %v464_v6, %v71_v21 }
  0x15   :  { %v148_v32 = vmul.f32 %v382_v25, %v459_v5  ;;  %v149_v33 = vmul.f32 %v383_v26, %v459_v5  ;;  %v386_v38 = vunpack.c.l.bf16 %v407_v27  ;;  %v387_v39 = vunpack.c.h.bf16 %v407_v27 }
  0x16   :  { %v201_v36 = vmax.f32 %v185_v28, 0.0  ;;  %v202_v37 = vmax.f32 %v186_v29, 0.0  ;;  %v390_v60 = vunpack.c.l.bf16 %v408_v49  ;;  %v391_v61 = vunpack.c.h.bf16 %v408_v49 }
  0x17   :  { %v171_v40 = vadd.f32 %v477_v13, %v148_v32  ;;  %v172_v41 = vadd.f32 %v477_v13, %v149_v33  ;;  %v150_v47 = vmul.f32 %v386_v38, %v459_v5  ;;  %v151_v48 = vmul.f32 %v387_v39, %v459_v5 }
  0x18   :  { %v400_v22 = vld [vmem:[%s641_s0 + $0x28] sm:$0xff]   ;;  %v322_v45 = vpack.c.bf16 %v201_v36, %v201_v36  ;;  %v323_v46 = vpack.c.bf16 %v202_v37, %v202_v37  ;;  %v152_v8 = vmul.f32 %v390_v60, %v459_v5  ;;  %v153_v9 = vmul.f32 %v391_v61, %v459_v5 }
  0x19   :  { %280 = vst.msk [vmem:[%s647_s6 + $0x10] sm:$0xf] %vm275_vm0, %v320_v23  ;;  %281 = vst.msk [vmem:[%s647_s6 + $0x14] sm:$0xf] %vm275_vm0, %v321_v24  ;;  %v354_v34 = vunpack.c.l.bf16 %v400_v22  ;;  %v355_v35 = vunpack.c.h.bf16 %v400_v22  ;;  %v187_v50 = vadd.f32 %v171_v40, %v93_v30  ;;  %v188_v51 = vadd.f32 %v172_v41, %v94_v31 }
  0x1a   :  { %v173_v54 = vadd.f32 %v477_v13, %v150_v47  ;;  %v174_v55 = vadd.f32 %v477_v13, %v151_v48  ;;  %v175_v16 = vadd.f32 %v477_v13, %v152_v8  ;;  %v176_v17 = vadd.f32 %v477_v13, %v153_v9 }
  0x1b   :  { %v72_v42 = vmul.f32 %v354_v34, %v451_v1  ;;  %v73_v43 = vmul.f32 %v355_v35, %v451_v1  ;;  %v203_v58 = vmax.f32 %v187_v50, 0.0  ;;  %v204_v59 = vmax.f32 %v188_v51, 0.0 }
  0x1c   :  { %v394_v22 = vunpack.c.l.bf16 %v409_v10  ;;  %v395_v23 = vunpack.c.h.bf16 %v409_v10 }
  0x1d   :  { %v95_v52 = vadd.f32 %v464_v6, %v72_v42  ;;  %v96_v53 = vadd.f32 %v464_v6, %v73_v43  ;;  %v324_v4 = vpack.c.bf16 %v203_v58, %v203_v58  ;;  %v325_v7 = vpack.c.bf16 %v204_v59, %v204_v59 }
  0x1e   :  { %v154_v28 = vmul.f32 %v394_v22, %v459_v5  ;;  %v155_v29 = vmul.f32 %v395_v23, %v459_v5 }
  0x1f   :  { %v189_v62 = vadd.f32 %v173_v54, %v95_v52  ;;  %v190_v63 = vadd.f32 %v174_v55, %v96_v53 }
  0x20   :  { %v401_v44 = vld [vmem:[%s641_s0 + $0x30] sm:$0xff]   ;;  %v177_v33 = vadd.f32 %v477_v13, %v154_v28  ;;  %v178_v34 = vadd.f32 %v477_v13, %v155_v29 }
  0x21   :  { %282 = vst.msk [vmem:[%s647_s6 + $0x18] sm:$0xf] %vm275_vm0, %v322_v45  ;;  %283 = vst.msk [vmem:[%s647_s6 + $0x1c] sm:$0xf] %vm275_vm0, %v323_v46  ;;  %v358_v56 = vunpack.c.l.bf16 %v401_v44  ;;  %v359_v57 = vunpack.c.h.bf16 %v401_v44  ;;  %v205_v11 = vmax.f32 %v189_v62, 0.0  ;;  %v206_v12 = vmax.f32 %v190_v63, 0.0 }
  0x23   :  { %v74_v0 = vmul.f32 %v358_v56, %v451_v1  ;;  %v75_v2 = vmul.f32 %v359_v57, %v451_v1  ;;  %v326_v20 = vpack.c.bf16 %v205_v11, %v205_v11  ;;  %v327_v21 = vpack.c.bf16 %v206_v12, %v206_v12 }
  0x25   :  { %v97_v14 = vadd.f32 %v464_v6, %v74_v0  ;;  %v98_v15 = vadd.f32 %v464_v6, %v75_v2 }
  0x27   :  { %v191_v24 = vadd.f32 %v175_v16, %v97_v14  ;;  %v192_v25 = vadd.f32 %v176_v17, %v98_v15 }
  0x28   :  { %v402_v3 = vld [vmem:[%s641_s0 + $0x38] sm:$0xff]  }
  0x29   :  { %284 = vst.msk [vmem:[%s647_s6 + $0x20] sm:$0xf] %vm275_vm0, %v324_v4  ;;  %285 = vst.msk [vmem:[%s647_s6 + $0x24] sm:$0xf] %vm275_vm0, %v325_v7  ;;  %v362_v18 = vunpack.c.l.bf16 %v402_v3  ;;  %v363_v19 = vunpack.c.h.bf16 %v402_v3  ;;  %v207_v30 = vmax.f32 %v191_v24, 0.0  ;;  %v208_v31 = vmax.f32 %v192_v25, 0.0 }
  0x2a   :  { %286 = vst.msk [vmem:[%s647_s6 + $0x28] sm:$0xf] %vm275_vm0, %v326_v20  ;;  %287 = vst.msk [vmem:[%s647_s6 + $0x2c] sm:$0xf] %vm275_vm0, %v327_v21 }
  0x2b   :  { %v76_v26 = vmul.f32 %v362_v18, %v451_v1  ;;  %v77_v27 = vmul.f32 %v363_v19, %v451_v1  ;;  %v328_v35 = vpack.c.bf16 %v207_v30, %v207_v30  ;;  %v329_v36 = vpack.c.bf16 %v208_v31, %v208_v31 }
  0x2d   :  { %v99_v32 = vadd.f32 %v464_v6, %v76_v26  ;;  %v100_v1 = vadd.f32 %v464_v6, %v77_v27  ;;  %288 = vst.msk [vmem:[%s647_s6 + $0x30] sm:$0xf] %vm275_vm0, %v328_v35  ;;  %289 = vst.msk [vmem:[%s647_s6 + $0x34] sm:$0xf] %vm275_vm0, %v329_v36 }
  0x2f   :  { %v193_v37 = vadd.f32 %v177_v33, %v99_v32  ;;  %v194_v38 = vadd.f32 %v178_v34, %v100_v1 }
  0x31   :  { %v209_v5 = vmax.f32 %v193_v37, 0.0  ;;  %v210_v6 = vmax.f32 %v194_v38, 0.0 }
  0x33   :  { %v330_v39 = vpack.c.bf16 %v209_v5, %v209_v5  ;;  %v331_v40 = vpack.c.bf16 %v210_v6, %v210_v6 }
  0x35   :  { %290 = vst.msk [vmem:[%s647_s6 + $0x38] sm:$0xf] %vm275_vm0, %v330_v39  ;;  %291 = vst.msk [vmem:[%s647_s6 + $0x3c] sm:$0xf] %vm275_vm0, %v331_v40 }

// kernel: bottleneck_unit.5
= control target key start
LH: loop header
LB: loop body
LE: loop exit
PB: predicated region body
PF: predicated region fallthrough
CT: control target
= control target key end

     0   :  { %s2321_s18 = smov 0   ;;  %s2323_s19 = smov 0   ;;  %s2831_s0 = inlined_call_operand.vmem [shape: bf16[4,2,8,8,8], index: 0, kind: input, shape index: {}]   ;;  %s2832_s1 = inlined_call_operand.vmem [shape: f32[1,8], index: 1, kind: input, shape index: {}]   ;;  %s2833_s2 = inlined_call_operand.vmem [shape: f32[1,8], index: 2, kind: input, shape index: {}]   ;;  %s2834_s3 = inlined_call_operand.vmem [shape: f32[9,8,8], index: 3, kind: input, shape index: {}]   ;;  %s2835_s4 = inlined_call_operand.vmem [shape: bf16[2,8,8,8], index: 4, kind: output, shape index: {0}]   ;;  %s2836_s5 = inlined_call_operand.vmem [shape: f32[2,2,8], index: 5, kind: output, shape index: {1}]  }
   0x1   :  { %s2325_s20 = smov 0  }
   0x2 LB: > { %s1831_s21 = sadd.s32 4294967295, %s2288_s20   ;;  %s2338_s22 = sadd.s32 1, %s2288_s20   ;;  %s2288_s20 = sphi %s2325_s20, %s2848_s20   ;;  %s2284_s19 = sphi %s2323_s19, %s2847_s19   ;;  %s2280_s18 = sphi %s2321_s18, %s2846_s18  }
   0x3   : > { %s20_s23 = ssub.s32 %s2288_s20, %s2338_s22  ;;  %s23_s24 = sadd.s32 1, %s2284_s19 }
   0x4   : > { %p21_p0 = scmp.eq.s32.totalorder %s20_s23, 0  ;;  %p30_p1 = scmp.ne.s32.totalorder %s2284_s19, %s2280_s18 }
   0x5   : > { %p31_p2 = scmp.eq.s32.totalorder %s2288_s20, 0  ;;  %p1834_p4 = scmp.ge.s32.totalorder %s2288_s20, 2 }
   0x6   : > { %s2347_s25 = scalar_select %p21_p0, %s2284_s19, %s23_s24  }
   0x7   : > { %p32_p3 = por %p31_p2, %p30_p1  ;;  %180 = sbr.rel (%p1834_p4) target bundleno = 24 (0x18), region = 28 }
   0xc   : > { %183 = sbr.rel (!%p32_p3) target bundleno = 24 (0x18), region = 32  ;;  %s185_s26 = sand.u32 (%p32_p3), 1, %s2284_s19  }
   0xd   : > { %s1951_s27 = sshll.u32 (%p32_p3), %s2288_s20, 5  ;;  %s1835_s28 = sshll.u32 (%p32_p3), %s185_s26, 7 }
   0xe   : > { %s2355_s6 = scalar_lea.vmem (%p32_p3), %s2831_s0, %s1951_s27  ;;  %s187_s7 = scalar_lea.vmem (%p32_p3), [#allocation3], %s1835_s28 }
   0xf   : > { %v207_v0 = vld [vmem:[%s2355_s6] sm:$0xff] (%p32_p3)   ;;  %v211_v1 = vld [vmem:[%s2355_s6 + $0x8] sm:$0xff] (%p32_p3)   ;;  %v215_v2 = vld [vmem:[%s2355_s6 + $0x10] sm:$0xff] (%p32_p3)  }
  0x10   : > { %208 = vst [vmem:[%s187_s7] sm:$0xff] (%p32_p3), %v207_v0   ;;  %212 = vst [vmem:[%s187_s7 + $0x8] sm:$0xff] (%p32_p3), %v211_v1   ;;  %v219_v3 = vld [vmem:[%s2355_s6 + $0x18] sm:$0xff] (%p32_p3)   ;;  %v223_v4 = vld [vmem:[%s2355_s6 + $0x40] sm:$0xff] (%p32_p3)  }
  0x11   : > { %216 = vst [vmem:[%s187_s7 + $0x10] sm:$0xff] %v215_v2   ;;  %v227_v5 = vld [vmem:[%s2355_s6 + $0x48] sm:$0xff]   ;;  %220 = vst [vmem:[%s187_s7 + $0x18] sm:$0xff] %v219_v3   ;;  %v231_v6 = vld [vmem:[%s2355_s6 + $0x50] sm:$0xff]  }
  0x12   : > { %224 = vst [vmem:[%s187_s7 + $0x20] sm:$0xff] %v223_v4   ;;  %228 = vst [vmem:[%s187_s7 + $0x28] sm:$0xff] %v227_v5   ;;  %v235_v7 = vld [vmem:[%s2355_s6 + $0x58] sm:$0xff]   ;;  %v239_v8 = vld [vmem:[%s2355_s6 + $0x80] sm:$0xff]  }
  0x13   : > { %232 = vst [vmem:[%s187_s7 + $0x30] sm:$0xff] %v231_v6   ;;  %236 = vst [vmem:[%s187_s7 + $0x38] sm:$0xff] %v235_v7   ;;  %v243_v9 = vld [vmem:[%s2355_s6 + $0x88] sm:$0xff]   ;;  %v247_v10 = vld [vmem:[%s2355_s6 + $0x90] sm:$0xff]  }
  0x14   : > { %240 = vst [vmem:[%s187_s7 + $0x40] sm:$0xff] %v239_v8   ;;  %v251_v11 = vld [vmem:[%s2355_s6 + $0x98] sm:$0xff]   ;;  %244 = vst [vmem:[%s187_s7 + $0x48] sm:$0xff] %v243_v9   ;;  %v255_v12 = vld [vmem:[%s2355_s6 + $0xc0] sm:$0xff]  }
  0x15   : > { %248 = vst [vmem:[%s187_s7 + $0x50] sm:$0xff] %v247_v10   ;;  %252 = vst [vmem:[%s187_s7 + $0x58] sm:$0xff] %v251_v11   ;;  %v259_v13 = vld [vmem:[%s2355_s6 + $0xc8] sm:$0xff]   ;;  %v263_v14 = vld [vmem:[%s2355_s6 + $0xd0] sm:$0xff]  }
  0x16   : > { %256 = vst [vmem:[%s187_s7 + $0x60] sm:$0xff] %v255_v12   ;;  %260 = vst [vmem:[%s187_s7 + $0x68] sm:$0xff] %v259_v13   ;;  %v267_v15 = vld [vmem:[%s2355_s6 + $0xd8] sm:$0xff]  }
  0x17   : > { %264 = vst [vmem:[%s187_s7 + $0x70] sm:$0xff] %v263_v14   ;;  %268 = vst [vmem:[%s187_s7 + $0x78] sm:$0xff] %v267_v15  }
  0x18 PF: > { %p1838_p5 = scmp.ge.s32.totalorder %s2288_s20, 1  ;;  %p357_p6 = scmp.lt.s32.totalorder %s2288_s20, 3 }
  0x1a   : > { %p358_p7 = pnand %p1838_p5, %p357_p6 }
  0x1c   : > { %361 = sbr.rel (%p358_p7) target bundleno = 342 (0x156), region = 73 }
  0x21   : > { %v1870_v16 = vld [vmem:[%s2834_s3 + $0x28] sm:$0xff]  ;;  %s364_s10 = sand.u32 1, %s2280_s18   ;;  %v1869_v17 = vld [vmem:[%s2834_s3 + $0x20] sm:$0xff]  ;;  %v2385_v18 = vld [vmem:[%s2834_s3 + $0x38] sm:$0xff]  ;;  %vm553_vm0 = vcmask 64512   ;;  %vm1637_vm1 = vcmask 57344  }
  0x22   : > { %2239 = vmatprep.subr.mxu1 %v1870_v16  ;;  %2113 = vmatprep.subr.mxu0 %v1870_v16  ;;  %s1839_s11 = sshll.u32 %s364_s10, 7  ;;  %v2390_v19 = vld [vmem:[%s2832_s1] ss:$0 sm:$0xff]  ;;  %v1906_v62 = vld [vmem:[%s2834_s3 + $0x10] sm:$0xff]  ;;  %p2721_p8 = scmp.lt.s32.totalorder %s1831_s21, 1  ;;  %vm1730_vm2 = vcmask 60416  }
  0x23   : > { %2240 = vmatpush3.msra.mxu1 %v1870_v16  ;;  %2114 = vmatpush3.msra.mxu0 %v1870_v16  ;;  %s2392_s18 = scalar_lea.vmem [#allocation3], %s1839_s11  ;;  %v2402_v28 = vld [vmem:[%s2833_s2] ss:$0 sm:$0xff] }
  0x24   : > { %v2020_v20 = vld [vmem:[%s2392_s18 + $0x20] sm:$0xff]   ;;  %v2022_v21 = vld [vmem:[%s2392_s18 + $0x30] sm:$0xff]   ;;  %2127 = vmatprep.subr.mxu1 %v1869_v17  ;;  %v2021_v22 = vld [vmem:[%s2392_s18 + $0x28] sm:$0xff]   ;;  %2141 = vmatprep.subr.mxu0 %v2385_v18  ;;  %s2850_s21 = smov (!%p2721_p8, %s1831_s21), 1 }
  0x25   : > { %v1971_v23 = vunpack.c.l.bf16 %v2020_v20  ;;  %v1972_v24 = vunpack.c.h.bf16 %v2020_v20  ;;  %v1979_v25 = vunpack.c.l.bf16 %v2022_v21  ;;  %v1980_v26 = vunpack.c.h.bf16 %v2022_v21  ;;  %v2023_v27 = vld [vmem:[%s2392_s18 + $0x38] sm:$0xff]   ;;  %v1954_v41 = vld [vmem:[%s2392_s18] sm:$0xff]   ;;  %v2017_v47 = vld [vmem:[%s2392_s18 + $0x8] sm:$0xff]   ;;  %s1952_s20 = sshll.u32 %s2850_s21, 5  ;;  %s1842_s17 = sshll.u32 %s2850_s21, 1 }
  0x26   : > { %v1975_v29 = vunpack.c.l.bf16 %v2021_v22  ;;  %v1983_v30 = vunpack.c.l.bf16 %v2023_v27  ;;  %v1976_v31 = vunpack.c.h.bf16 %v2021_v22  ;;  %v1984_v32 = vunpack.c.h.bf16 %v2023_v27  ;;  %v2024_v42 = vld [vmem:[%s2392_s18 + $0x40] sm:$0xff]   ;;  %v2025_v48 = vld [vmem:[%s2392_s18 + $0x48] sm:$0xff]   ;;  %v2018_v53 = vld [vmem:[%s2392_s18 + $0x10] sm:$0xff]   ;;  %s2766_s16 = scalar_lea.vmem %s2835_s4, %s1952_s20  ;;  %s403_s24 = scalar_lea.vmem %s2836_s5, %s1842_s17 }
  0x27   : > { %v467_v33 = vmul.f32 %v1971_v23, %v2390_v19  ;;  %v471_v34 = vmul.f32 %v1979_v25, %v2390_v19  ;;  %v468_v35 = vmul.f32 %v1972_v24, %v2390_v19  ;;  %v472_v36 = vmul.f32 %v1980_v26, %v2390_v19  ;;  %v2026_v58 = vld [vmem:[%s2392_s18 + $0x50] sm:$0xff]   ;;  %v1896_v59 = vld [vmem:[%s2834_s3 + $0x40] sm:$0xff]  ;;  %v2019_v9 = vld [vmem:[%s2392_s18 + $0x18] sm:$0xff]  }
  0x28   : > { %v469_v37 = vmul.f32 %v1975_v29, %v2390_v19  ;;  %v473_v38 = vmul.f32 %v1983_v30, %v2390_v19  ;;  %v470_v39 = vmul.f32 %v1976_v31, %v2390_v19  ;;  %v474_v40 = vmul.f32 %v1984_v32, %v2390_v19  ;;  %v2027_v13 = vld [vmem:[%s2392_s18 + $0x58] sm:$0xff]   ;;  %v2028_v26 = vld [vmem:[%s2392_s18 + $0x60] sm:$0xff]  }
  0x29   : > { %v2415_v43 = vadd.f32 %v2402_v28, %v467_v33  ;;  %v2418_v44 = vadd.f32 %v2402_v28, %v471_v34  ;;  %v2421_v45 = vadd.f32 %v2402_v28, %v468_v35  ;;  %v2424_v46 = vadd.f32 %v2402_v28, %v472_v36  ;;  %v1905_v35 = vld [vmem:[%s2834_s3 + $0x8] sm:$0xff]  ;;  %v1924_v36 = vld [vmem:[%s2834_s3 + $0x30] sm:$0xff] }
  0x2a   : > { %v2429_v49 = vadd.f32 %v2402_v28, %v469_v37  ;;  %v2432_v50 = vadd.f32 %v2402_v28, %v473_v38  ;;  %v2435_v51 = vadd.f32 %v2402_v28, %v470_v39  ;;  %v2438_v52 = vadd.f32 %v2402_v28, %v474_v40 }
  0x2b   : > { %2115 = vmatprep.mubr.msk.f32.mxu0 %vm553_vm0, %v2415_v43  ;;  %2121 = vmatprep.mubr.msk.f32.mxu1 %vm553_vm0, %v2418_v44  ;;  %v1955_v54 = vunpack.c.l.bf16 %v1954_v41  ;;  %v1956_v55 = vunpack.c.h.bf16 %v1954_v41  ;;  %v1987_v56 = vunpack.c.l.bf16 %v2024_v42  ;;  %v1988_v57 = vunpack.c.h.bf16 %v2024_v42  ;;  %v2029_v41 = vld [vmem:[%s2392_s18 + $0x68] sm:$0xff]  }
  0x2c   : > { %2116 = vmatmul.mubr.msk.f32.vlgmr.msra.gmra.mxu0 %vm553_vm0, %v2421_v45  ;;  %2122 = vmatmul.mubr.msk.f32.vlgmr.msra.gmra.mxu1 %vm553_vm0, %v2424_v46  ;;  %v1959_v60 = vunpack.c.l.bf16 %v2017_v47  ;;  %v1991_v61 = vunpack.c.l.bf16 %v2025_v48  ;;  %v1960_v63 = vunpack.c.h.bf16 %v2017_v47  ;;  %v1992_v0 = vunpack.c.h.bf16 %v2025_v48 }
  0x2d   : > { %2128 = vmatpush3.msra.mxu1 %v1869_v17  ;;  %2118 = vmatprep.mubr.msk.f32.mxu0 %vm553_vm0, %v2429_v49  ;;  %v428_v1 = vmul.f32 %v1955_v54, %v2390_v19  ;;  %v429_v2 = vmul.f32 %v1956_v55, %v2390_v19  ;;  %v500_v3 = vmul.f32 %v1987_v56, %v2390_v19  ;;  %v1963_v4 = vunpack.c.l.bf16 %v2018_v53 }
  0x2e   : > { %2124 = vmatprep.mubr.msk.f32.mxu1 %vm553_vm0, %v2432_v50  ;;  %2142 = vmatpush3.msra.mxu0 %v2385_v18  ;;  %v501_v5 = vmul.f32 %v1988_v57, %v2390_v19  ;;  %v430_v6 = vmul.f32 %v1959_v60, %v2390_v19  ;;  %v502_v7 = vmul.f32 %v1991_v61, %v2390_v19  ;;  %v1995_v8 = vunpack.c.l.bf16 %v2026_v58 }
  0x2f   : > { %v442_v10 = vadd.f32 %v2402_v28, %v428_v1  ;;  %v2470_v11 = vadd.f32 %v2402_v28, %v500_v3  ;;  %2155 = vmatprep.subr.mxu1 %v1896_v59  ;;  %2169 = vmatprep.subr.mxu0 %v1906_v62  ;;  %v1964_v12 = vunpack.c.h.bf16 %v2018_v53  ;;  %v443_v14 = vadd.f32 %v2402_v28, %v429_v2  ;;  %v2031_v3 = vld [vmem:[%s2392_s18 + $0x78] sm:$0xff]  }
  0x30   : > { %2119 = vmatmul.mubr.msk.f32.gmra.mxu0 %vm553_vm0, %v2435_v51  ;;  %2125 = vmatmul.mubr.msk.f32.gmra.mxu1 %vm553_vm0, %v2438_v52  ;;  %v2479_v15 = vadd.f32 %v2402_v28, %v501_v5  ;;  %v444_v16 = vadd.f32 %v2402_v28, %v430_v6  ;;  %v1996_v17 = vunpack.c.h.bf16 %v2026_v58  ;;  %v431_v18 = vmul.f32 %v1960_v63, %v2390_v19 }
  0x31   : > { %2129 = vmatprep.mubr.msk.f32.mxu1 %vm553_vm0, %v442_v10  ;;  %2143 = vmatprep.mubr.msk.f32.mxu0 %vm553_vm0, %v2470_v11  ;;  %v503_v20 = vmul.f32 %v1992_v0, %v2390_v19  ;;  %v432_v21 = vmul.f32 %v1963_v4, %v2390_v19  ;;  %v1967_v22 = vunpack.c.l.bf16 %v2019_v9  ;;  %v2489_v23 = vadd.f32 %v2402_v28, %v502_v7 }
  0x32   : > { %v504_v24 = vmul.f32 %v1995_v8, %v2390_v19  ;;  %v1999_v25 = vunpack.c.l.bf16 %v2027_v13  ;;  %v445_v27 = vadd.f32 %v2402_v28, %v431_v18  ;;  %v433_v29 = vmul.f32 %v1964_v12, %v2390_v19 }
  0x33   : > { %v505_v30 = vmul.f32 %v1996_v17, %v2390_v19  ;;  %v2500_v31 = vadd.f32 %v2402_v28, %v503_v20  ;;  %v446_v32 = vadd.f32 %v2402_v28, %v432_v21  ;;  %v434_v33 = vmul.f32 %v1967_v22, %v2390_v19 }
  0x34   : > { %2130 = vmatmul.mubr.msk.f32.vlgmr.msra.gmra.mxu1 %vm553_vm0, %v443_v14  ;;  %2144 = vmatmul.mubr.msk.f32.vlgmr.msra.gmra.mxu0 %vm553_vm0, %v2479_v15  ;;  %v1968_v34 = vunpack.c.h.bf16 %v2019_v9  ;;  %v2512_v37 = vadd.f32 %v2402_v28, %v504_v24  ;;  %v506_v38 = vmul.f32 %v1999_v25, %v2390_v19  ;;  %v2000_v39 = vunpack.c.h.bf16 %v2027_v13  ;;  %v1923_v14 = vld [vmem:[%s2834_s3 + $0x18] sm:$0xff] }
  0x35   : > { %2156 = vmatpush3.msra.mxu1 %v1896_v59  ;;  %2132 = vmatprep.mubr.msk.f32.mxu1 %vm553_vm0, %v444_v16  ;;  %v2003_v40 = vunpack.c.l.bf16 %v2028_v26  ;;  %v447_v42 = vadd.f32 %v2402_v28, %v433_v29  ;;  %v2523_v47 = vadd.f32 %v2402_v28, %v505_v30  ;;  %v2004_v54 = vunpack.c.h.bf16 %v2028_v26  ;;  %v2030_v59 = vld [vmem:[%s2392_s18 + $0x70] sm:$0xff]   ;;  %v1516_v16 = vld [vmem:[%s2834_s3] sm:$0xff] }
  0x36   : > { %2146 = vmatprep.mubr.msk.f32.mxu0 %vm553_vm0, %v2489_v23  ;;  %2170 = vmatpush3.msra.mxu0 %v1906_v62  ;;  %v435_v48 = vmul.f32 %v1968_v34, %v2390_v19  ;;  %v507_v53 = vmul.f32 %v2000_v39, %v2390_v19  ;;  %v448_v55 = vadd.f32 %v2402_v28, %v434_v33  ;;  %v2007_v58 = vunpack.c.l.bf16 %v2029_v41 }
  0x37   : > { %2183 = vmatprep.subr.mxu1 %v1905_v35  ;;  %2197 = vmatprep.subr.mxu0 %v1924_v36  ;;  %v2532_v56 = vadd.f32 %v2402_v28, %v506_v38  ;;  %v533_v57 = vmul.f32 %v2003_v40, %v2390_v19  ;;  %v534_v62 = vmul.f32 %v2004_v54, %v2390_v19  ;;  %v2008_v63 = vunpack.c.h.bf16 %v2029_v41 }
  0x38   : > { %2133 = vmatmul.mubr.msk.f32.gmra.mxu1 %vm553_vm0, %v445_v27  ;;  %2147 = vmatmul.mubr.msk.f32.gmra.mxu0 %vm553_vm0, %v2500_v31  ;;  %v449_v60 = vadd.f32 %v2402_v28, %v435_v48  ;;  %v2541_v61 = vadd.f32 %v2402_v28, %v507_v53  ;;  %v535_v1 = vmul.f32 %v2007_v58, %v2390_v19  ;;  %v2011_v2 = vunpack.c.l.bf16 %v2030_v59 }
  0x39   : > { %2135 = vmatprep.mubr.msk.f32.mxu1 %vm553_vm0, %v446_v32  ;;  %2149 = vmatprep.mubr.msk.f32.mxu0 %vm553_vm0, %v2512_v37  ;;  %v541_v0 = vadd.f32 %v2402_v28, %v533_v57  ;;  %v542_v4 = vadd.f32 %v2402_v28, %v534_v62  ;;  %v536_v5 = vmul.f32 %v2008_v63, %v2390_v19  ;;  %v2012_v6 = vunpack.c.h.bf16 %v2030_v59 }
  0x3a   : > { %v543_v7 = vadd.f32 %v2402_v28, %v535_v1  ;;  %v537_v8 = vmul.f32 %v2011_v2, %v2390_v19  ;;  %v2015_v9 = vunpack.c.l.bf16 %v2031_v3  ;;  %v2016_v13 = vunpack.c.h.bf16 %v2031_v3 }
  0x3b   : > { %v544_v10 = vadd.f32 %v2402_v28, %v536_v5  ;;  %v538_v12 = vmul.f32 %v2012_v6, %v2390_v19 }
  0x3c   : > { %2136 = vmatmul.mubr.msk.f32.gmra.mxu1 %vm553_vm0, %v447_v42  ;;  %2150 = vmatmul.mubr.msk.f32.gmra.mxu0 %vm553_vm0, %v2523_v47  ;;  %v545_v17 = vadd.f32 %v2402_v28, %v537_v8  ;;  %v539_v18 = vmul.f32 %v2015_v9, %v2390_v19  ;;  %v540_v21 = vmul.f32 %v2016_v13, %v2390_v19  ;;  %v2290_v19 = vmov 0.0  }
  0x3d   : > { %2138 = vmatprep.mubr.msk.f32.mxu1 %vm553_vm0, %v448_v55  ;;  %2152 = vmatprep.mubr.msk.f32.mxu0 %vm553_vm0, %v2532_v56  ;;  %v546_v20 = vadd.f32 %v2402_v28, %v538_v12  ;;  %1638 = vst.msk [vmem:[#allocation2] sm:$0x1] %vm1637_vm1, %v2290_v19  ;;  %1639 = vst.msk [vmem:[#allocation2 + $0x10] sm:$0x1] %vm1637_vm1, %v2290_v19 }
  0x3e   : > { %v547_v22 = vadd.f32 %v2402_v28, %v539_v18  ;;  %v548_v24 = vadd.f32 %v2402_v28, %v540_v21  ;;  %1640 = vst.msk [vmem:[#allocation2 + $0x20] sm:$0x1] %vm1637_vm1, %v2290_v19  ;;  %1641 = vst.msk [vmem:[#allocation2 + $0x30] sm:$0x1] %vm1637_vm1, %v2290_v19 }
  0x3f   : > { %1642 = vst.msk [vmem:[#allocation2 + $0x40] sm:$0x1] %vm1637_vm1, %v2290_v19  ;;  %1643 = vst.msk [vmem:[#allocation2 + $0x50] sm:$0x1] %vm1637_vm1, %v2290_v19 }
  0x40   : > { %2139 = vmatmul.mubr.msk.f32.gmra.mxu1 %vm553_vm0, %v449_v60  ;;  %2153 = vmatmul.mubr.msk.f32.gmra.mxu0 %vm553_vm0, %v2541_v61  ;;  %1644 = vst.msk [vmem:[#allocation2 + $0x60] sm:$0x1] %vm1637_vm1, %v2290_v19  ;;  %1645 = vst.msk [vmem:[#allocation2 + $0x70] sm:$0x1] %vm1637_vm1, %v2290_v19 }
  0x41   : > { %2157 = vmatprep.mubr.msk.f32.mxu1 %vm553_vm0, %v541_v0  ;;  %2171 = vmatprep.mubr.msk.f32.mxu0 %vm553_vm0, %v541_v0 }
  0x44   : > { %2158 = vmatmul.mubr.msk.f32.vlgmr.msra.gmra.mxu1 %vm553_vm0, %v542_v4  ;;  %2172 = vmatmul.mubr.msk.f32.vlgmr.msra.gmra.mxu0 %vm553_vm0, %v542_v4 }
  0x45   : > { %2184 = vmatpush3.msra.mxu1 %v1905_v35  ;;  %2160 = vmatprep.mubr.msk.f32.mxu1 %vm553_vm0, %v543_v7 }
  0x46   : > { %2174 = vmatprep.mubr.msk.f32.mxu0 %vm553_vm0, %v543_v7  ;;  %2198 = vmatpush3.msra.mxu0 %v1924_v36 }
  0x47   : > { %2211 = vmatprep.subr.mxu1 %v1923_v14  ;;  %2225 = vmatprep.subr.mxu0 %v1516_v16 }
  0x48   : > { %2161 = vmatmul.mubr.msk.f32.gmra.mxu1 %vm553_vm0, %v544_v10  ;;  %2175 = vmatmul.mubr.msk.f32.gmra.mxu0 %vm553_vm0, %v544_v10 }
  0x49   : > { %2163 = vmatprep.mubr.msk.f32.mxu1 %vm553_vm0, %v545_v17  ;;  %2177 = vmatprep.mubr.msk.f32.mxu0 %vm553_vm0, %v545_v17 }
  0x4c   : > { %2164 = vmatmul.mubr.msk.f32.gmra.mxu1 %vm553_vm0, %v546_v20  ;;  %2178 = vmatmul.mubr.msk.f32.gmra.mxu0 %vm553_vm0, %v546_v20 }
  0x4d   : > { %2166 = vmatprep.mubr.msk.f32.mxu1 %vm553_vm0, %v547_v22  ;;  %2180 = vmatprep.mubr.msk.f32.mxu0 %vm553_vm0, %v547_v22 }
  0x50   : > { %2167 = vmatmul.mubr.msk.f32.gmra.mxu1 %vm553_vm0, %v548_v24  ;;  %2181 = vmatmul.mubr.msk.f32.gmra.mxu0 %vm553_vm0, %v548_v24 }
  0x51   : > { %2185 = vmatprep.mubr.msk.f32.mxu1 %vm553_vm0, %v2470_v11  ;;  %2199 = vmatprep.mubr.msk.f32.mxu0 %vm553_vm0, %v541_v0 }
  0x54   : > { %2186 = vmatmul.mubr.msk.f32.vlgmr.msra.gmra.mxu1 %vm553_vm0, %v2479_v15  ;;  %2200 = vmatmul.mubr.msk.f32.vlgmr.msra.gmra.mxu0 %vm553_vm0, %v542_v4 }
  0x55   : > { %2212 = vmatpush3.msra.mxu1 %v1923_v14  ;;  %2188 = vmatprep.mubr.msk.f32.mxu1 %vm553_vm0, %v2489_v23 }
  0x56   : > { %2202 = vmatprep.mubr.msk.f32.mxu0 %vm553_vm0, %v543_v7  ;;  %2226 = vmatpush3.msra.mxu0 %v1516_v16 }
  0x58   : > { %2189 = vmatmul.mubr.msk.f32.gmra.mxu1 %vm553_vm0, %v2500_v31  ;;  %2203 = vmatmul.mubr.msk.f32.gmra.mxu0 %vm553_vm0, %v544_v10 }
  0x59   : > { %2191 = vmatprep.mubr.msk.f32.mxu1 %vm553_vm0, %v2512_v37  ;;  %2205 = vmatprep.mubr.msk.f32.mxu0 %vm553_vm0, %v545_v17 }
  0x5c   : > { %2192 = vmatmul.mubr.msk.f32.gmra.mxu1 %vm553_vm0, %v2523_v47  ;;  %2206 = vmatmul.mubr.msk.f32.gmra.mxu0 %vm553_vm0, %v546_v20 }
  0x5d   : > { %2194 = vmatprep.mubr.msk.f32.mxu1 %vm553_vm0, %v2532_v56  ;;  %2208 = vmatprep.mubr.msk.f32.mxu0 %vm553_vm0, %v547_v22 }
  0x60   : > { %2195 = vmatmul.mubr.msk.f32.gmra.mxu1 %vm553_vm0, %v2541_v61  ;;  %2209 = vmatmul.mubr.msk.f32.gmra.mxu0 %vm553_vm0, %v548_v24 }
  0x61   : > { %2213 = vmatprep.mubr.msk.f32.mxu1 %vm553_vm0, %v2415_v43  ;;  %2227 = vmatprep.mubr.msk.f32.mxu0 %vm553_vm0, %v541_v0 }
  0x64   : > { %2214 = vmatmul.mubr.msk.f32.vlgmr.msra.gmra.mxu1 %vm553_vm0, %v2421_v45  ;;  %2228 = vmatmul.mubr.msk.f32.vlgmr.msra.gmra.mxu0 %vm553_vm0, %v542_v4 }
  0x65   : > { %2216 = vmatprep.mubr.msk.f32.mxu1 %vm553_vm0, %v2429_v49  ;;  %2230 = vmatprep.mubr.msk.f32.mxu0 %vm553_vm0, %v543_v7 }
  0x68   : > { %2217 = vmatmul.mubr.msk.f32.gmra.mxu1 %vm553_vm0, %v2435_v51  ;;  %2231 = vmatmul.mubr.msk.f32.gmra.mxu0 %vm553_vm0, %v544_v10 }
  0x69   : > { %2219 = vmatprep.mubr.msk.f32.mxu1 %vm553_vm0, %v2418_v44  ;;  %2233 = vmatprep.mubr.msk.f32.mxu0 %vm553_vm0, %v545_v17 }
  0x6c   : > { %2220 = vmatmul.mubr.msk.f32.gmra.mxu1 %vm553_vm0, %v2424_v46  ;;  %2234 = vmatmul.mubr.msk.f32.gmra.mxu0 %vm553_vm0, %v546_v20 }
  0x6d   : > { %2222 = vmatprep.mubr.msk.f32.mxu1 %vm553_vm0, %v2432_v50  ;;  %2236 = vmatprep.mubr.msk.f32.mxu0 %vm553_vm0, %v547_v22 }
  0x70   : > { %2223 = vmatmul.mubr.msk.f32.gmra.mxu1 %vm553_vm0, %v2438_v52  ;;  %2237 = vmatmul.mubr.msk.f32.gmra.mxu0 %vm553_vm0, %v548_v24 }
  0xec   : > { %v2117_v28 = vpop.f32.mrf.mxu0  ;;  %v2643_v43 = vpop.f32.mrf.mxu1 }
  0xee   : > { %v2645_v44 = vpop.f32.mrf.mxu0  ;;  %v2647_v45 = vpop.f32.mrf.mxu1 }
  0xf0   : > { %v2120_v46 = vpop.f32.mrf.mxu0  ;;  %v2649_v49 = vpop.f32.mrf.mxu1 }
  0xf2   : > { %v2651_v50 = vpop.f32.mrf.mxu0  ;;  %v2653_v51 = vpop.f32.mrf.mxu1 }
  0xf4   : > { %v2131_v52 = vpop.f32.mrf.mxu1  ;;  %v2655_v11 = vpop.f32.mrf.mxu0 }
  0xf5   : > { %v779_v22 = vadd.f32 %v2131_v52, %v2117_v28 }
  0xf6   : > { %v773_v15 = vpop.f32.mrf.mxu1  ;;  %v2657_v23 = vpop.f32.mrf.mxu0 }
  0xf8   : > { %v2134_v25 = vpop.f32.mrf.mxu1  ;;  %v2659_v26 = vpop.f32.mrf.mxu0 }
  0xfa   : > { %v783_v27 = vpop.f32.mrf.mxu1  ;;  %v2661_v29 = vpop.f32.mrf.mxu0 }
  0xfc   : > { %v2663_v30 = vpop.f32.mrf.mxu1  ;;  %v2665_v31 = vpop.f32.mrf.mxu0 }
  0xfe   : > { %v2667_v32 = vpop.f32.mrf.mxu1  ;;  %v2669_v33 = vpop.f32.mrf.mxu0 }
 0x100   : > { %v2671_v34 = vpop.f32.mrf.mxu1  ;;  %v2673_v35 = vpop.f32.mrf.mxu0 }
 0x102   : > { %v2675_v36 = vpop.f32.mrf.mxu1  ;;  %v2677_v37 = vpop.f32.mrf.mxu0 }
 0x104   : > { %v2679_v38 = vpop.f32.mrf.mxu1  ;;  %v2681_v39 = vpop.f32.mrf.mxu0 }
 0x106   : > { %v2683_v40 = vpop.f32.mrf.mxu1  ;;  %v1160_v41 = vpop.f32.mrf.mxu0 }
 0x108   : > { %v2685_v42 = vpop.f32.mrf.mxu1  ;;  %v2687_v47 = vpop.f32.mrf.mxu0 }
 0x10a   : > { %v2689_v48 = vpop.f32.mrf.mxu1  ;;  %v2691_v53 = vpop.f32.mrf.mxu0 }
 0x10c   : > { %v2693_v54 = vpop.f32.mrf.mxu1  ;;  %v2695_v55 = vpop.f32.mrf.mxu0 }
 0x10d   : > { %2837 = vst [vmem:[#allocation4_spill] sm:$0xff] %v2695_v55 }
 0x10e   : > { %v2697_v56 = vpop.f32.mrf.mxu1  ;;  %v2699_v57 = vpop.f32.mrf.mxu0 }
 0x110   : > { %v2701_v58 = vpop.f32.mrf.mxu1  ;;  %v2182_v59 = vpop.f32.mrf.mxu0 }
 0x111   : > { %v774_v59 = vadd.f32 %v773_v15, %v2645_v44 }
 0x112   : > { %v2703_v60 = vpop.f32.mrf.mxu1  ;;  %v2705_v61 = vpop.f32.mrf.mxu0 }
 0x113   : > { %2838 = vst [vmem:[#allocation5_spill] sm:$0xff] %v2705_v61  ;;  %v943_v15 = vadd.f32 %v2657_v23, %v774_v59  ;;  %v809_v23 = vadd.f32 %v2671_v34, %v2649_v49 }
 0x114   : > { %v2187_v62 = vpop.f32.mrf.mxu1  ;;  %v2201_v63 = vpop.f32.mrf.mxu0 }
 0x116   : > { %v1264_v0 = vpop.f32.mrf.mxu1  ;;  %v1372_v1 = vpop.f32.mrf.mxu0 }
 0x117   : > { %v1265_v61 = vadd.f32 %v1264_v0, %v1160_v41 }
 0x118   : > { %v2707_v2 = vpop.f32.mrf.mxu1  ;;  %v2204_v3 = vpop.f32.mrf.mxu0 }
 0x11a   : > { %v1274_v4 = vpop.f32.mrf.mxu1  ;;  %v1382_v5 = vpop.f32.mrf.mxu0 }
 0x11c   : > { %v2709_v6 = vpop.f32.mrf.mxu1  ;;  %v2207_v7 = vpop.f32.mrf.mxu0 }
 0x11d   : > { %2839 = vst [vmem:[#allocation6_spill] sm:$0xff] %v2709_v6 }
 0x11e   : > { %v2711_v8 = vpop.f32.mrf.mxu1  ;;  %v1392_v9 = vpop.f32.mrf.mxu0 }
 0x120   : > { %v2196_v10 = vpop.f32.mrf.mxu1  ;;  %v2713_v12 = vpop.f32.mrf.mxu0 }
 0x121   : > { %v789_v10 = vadd.f32 %v2134_v25, %v2120_v46  ;;  %v799_v25 = vadd.f32 %v2663_v30, %v2643_v43  ;;  %v804_v43 = vadd.f32 %v2675_v36, %v2653_v51 }
 0x122   : > { %v2715_v13 = vpop.f32.mrf.mxu1  ;;  %v2717_v14 = vpop.f32.mrf.mxu0 }
 0x123   : > { %2840 = vst [vmem:[#allocation7_spill] sm:$0xff] %v2715_v13  ;;  %v784_v13 = vadd.f32 %v783_v27, %v2651_v50  ;;  %v946_v50 = vadd.f32 %v2659_v26, %v789_v10  ;;  %v794_v27 = vadd.f32 %v2667_v32, %v2647_v45  ;;  %v1082_v26 = vadd.f32 %v2683_v40, %v943_v15 }
 0x124   : > { %v2215_v16 = vpop.f32.mrf.mxu1  ;;  %v2229_v17 = vpop.f32.mrf.mxu0  ;;  %v1270_v45 = vadd.f32 %v2187_v62, %v2681_v39 }
 0x125   : > { %v1483_v18 = vadd.f32 %v2215_v16, %v2201_v63  ;;  %v944_v16 = vadd.f32 %v2655_v11, %v779_v22  ;;  %v945_v41 = vadd.f32 %v2661_v29, %v784_v13  ;;  %v1275_v29 = vadd.f32 %v1274_v4, %v2691_v53 }
 0x126   : > { %v1477_v20 = vpop.f32.mrf.mxu1  ;;  %v1583_v21 = vpop.f32.mrf.mxu0  ;;  %v948_v13 = vadd.f32 %v2665_v31, %v799_v25  ;;  %v947_v49 = vadd.f32 %v2669_v33, %v794_v27  ;;  %v1085_v51 = vadd.f32 %v2685_v42, %v946_v50  ;;  %v949_v31 = vadd.f32 %v2677_v37, %v804_v43 }
 0x127   : > { %v1478_v24 = vadd.f32 %v1477_v20, %v1372_v1  ;;  %v1622_v19 = vadd.f32 %v1583_v21, %v1483_v18  ;;  %v1083_v0 = vadd.f32 %v2679_v38, %v944_v16  ;;  %v1084_v34 = vadd.f32 %v2689_v48, %v945_v41 }
 0x128   : > { %v2218_v6 = vpop.f32.mrf.mxu1  ;;  %v2232_v55 = vpop.f32.mrf.mxu0  ;;  %v1087_v33 = vadd.f32 %v2693_v54, %v948_v13  ;;  %v1649_v20 = vadd.f32 %v1275_v29, %v1085_v51  ;;  %v1285_v37 = vadd.f32 %v2711_v8, %v2699_v57  ;;  %v1086_v10 = vadd.f32 %v2697_v56, %v947_v49 }
 0x129   : > { %1629 = vst.msk [vmem:[#allocation2 + $0x1] sm:$0xff] %vm553_vm0, %v1478_v24  ;;  %1630 = vst.msk [vmem:[#allocation2 + $0x11] sm:$0xff] %vm553_vm0, %v1622_v19  ;;  %v1493_v28 = vadd.f32 %v2218_v6, %v2204_v3  ;;  %v1647_v6 = vadd.f32 %v1265_v61, %v1083_v0  ;;  %v1648_v42 = vadd.f32 %v1270_v45, %v1084_v34  ;;  %v2844_v0 = vld [vmem:[#allocation4_spill] sm:$0xff] }
 0x12a   : > { %v1487_v52 = vpop.f32.mrf.mxu1  ;;  %v1593_v63 = vpop.f32.mrf.mxu0  ;;  %v1651_v56 = vadd.f32 %v1285_v37, %v1087_v33 }
 0x12b   : > { %v1488_v44 = vadd.f32 %v1487_v52, %v1382_v5  ;;  %v1624_v46 = vadd.f32 %v1593_v63, %v1493_v28  ;;  %v1088_v52 = vadd.f32 %v2703_v60, %v949_v31  ;;  %v2842_v63 = vld [vmem:[#allocation5_spill] sm:$0xff] }
 0x12c   : > { %v2221_v1 = vpop.f32.mrf.mxu1  ;;  %v2235_v11 = vpop.f32.mrf.mxu0 }
 0x12d   : > { %v1623_v3 = vadd.f32 %v2229_v17, %v1488_v44  ;;  %1632 = vst.msk [vmem:[#allocation2 + $0x31] sm:$0xff] %vm553_vm0, %v1624_v46  ;;  %v1503_v5 = vadd.f32 %v2221_v1, %v2207_v7 }
 0x12e   : > { %v1497_v30 = vpop.f32.mrf.mxu1  ;;  %v1603_v32 = vpop.f32.mrf.mxu0 }
 0x12f   : > { %1631 = vst.msk [vmem:[#allocation2 + $0x21] sm:$0xff] %vm553_vm0, %v1623_v3  ;;  %v1498_v38 = vadd.f32 %v1497_v30, %v1392_v9  ;;  %v1626_v7 = vadd.f32 %v1603_v32, %v1503_v5  ;;  %v950_v9 = vadd.f32 %v2673_v35, %v809_v23  ;;  %v2845_v3 = vld [vmem:[#allocation6_spill] sm:$0xff] }
 0x130   : > { %v1654_v36 = vld [vmem:[#allocation2] sm:$0xff]  ;;  %v1655_v39 = vld [vmem:[#allocation2 + $0x10] sm:$0xff]  ;;  %v2224_v40 = vpop.f32.mrf.mxu1  ;;  %v2238_v62 = vpop.f32.mrf.mxu0  ;;  %v1290_v5 = vadd.f32 %v2845_v3, %v2844_v0 }
 0x131   : > { %v1662_v61 = vadd.f32 %v1654_v36, %v1082_v26  ;;  %v1663_v17 = vadd.f32 %v1655_v39, %v1647_v6  ;;  %v1625_v53 = vadd.f32 %v2232_v55, %v1498_v38  ;;  %1634 = vst.msk [vmem:[#allocation2 + $0x51] sm:$0xff] %vm553_vm0, %v1626_v7  ;;  %v1513_v4 = vadd.f32 %v2224_v40, %v2713_v12 }
 0x132   : > { %v1507_v48 = vpop.f32.mrf.mxu1  ;;  %v1613_v18 = vpop.f32.mrf.mxu0  ;;  %v1280_v55 = vadd.f32 %v2707_v2, %v2687_v47  ;;  %v1089_v28 = vadd.f32 %v2701_v58, %v950_v9  ;;  %v1652_v40 = vadd.f32 %v1290_v5, %v1088_v52 }
 0x133   : > { %v1692_v12 = vmul.f32 %v1662_v61, %v1662_v61  ;;  %v1722_v35 = vpack.c.bf16 %v1662_v61, %v1662_v61  ;;  %1633 = vst.msk [vmem:[#allocation2 + $0x41] sm:$0xff] %vm553_vm0, %v1625_v53  ;;  %v1693_v54 = vmul.f32 %v1663_v17, %v1663_v17  ;;  %v1723_v21 = vpack.c.bf16 %v1663_v17, %v1663_v17 }
 0x134   : > { %v1657_v22 = vld [vmem:[#allocation2 + $0x30] sm:$0xff]  ;;  %v1508_v24 = vadd.f32 %v1507_v48, %v2717_v14  ;;  %v1670_v19 = vsel %vm553_vm0, %v1662_v61, 0.0  ;;  %v1671_v47 = vsel %vm553_vm0, %v1663_v17, 0.0  ;;  %v1628_v59 = vadd.f32 %v1613_v18, %v1513_v4  ;;  %v2843_v14 = vld [vmem:[#allocation7_spill] sm:$0xff] }
 0x135   : > { %1731 = vst.msk [vmem:[%s2766_s16] sm:$0xf] %vm1730_vm2, %v1722_v35  ;;  %v1665_v2 = vadd.f32 %v1657_v22, %v1649_v20  ;;  %1732 = vst.msk [vmem:[%s2766_s16 + $0x4] sm:$0xf] %vm1730_vm2, %v1723_v21  ;;  %v1295_v16 = vadd.f32 %v2843_v14, %v2842_v63  ;;  %v1700_v44 = vsel %vm553_vm0, %v1692_v12, 0.0  ;;  %v1701_v46 = vsel %vm553_vm0, %v1693_v54, 0.0 }
 0x136   : > { %v1656_v57 = vld [vmem:[#allocation2 + $0x20] sm:$0xff]  ;;  %v1627_v8 = vadd.f32 %v2235_v11, %v1508_v24  ;;  %1636 = vst.msk [vmem:[#allocation2 + $0x71] sm:$0xff] %vm553_vm0, %v1628_v59  ;;  %v1672_v50 = vadd.f32 %v1671_v47, %v1670_v19  ;;  %v1650_v27 = vadd.f32 %v1280_v55, %v1086_v10  ;;  %v1702_v23 = vadd.f32 %v1701_v46, %v1700_v44 }
 0x137   : > { %v1664_v15 = vadd.f32 %v1656_v57, %v1648_v42  ;;  %v1695_v58 = vmul.f32 %v1665_v2, %v1665_v2  ;;  %v1725_v60 = vpack.c.bf16 %v1665_v2, %v1665_v2  ;;  %v1653_v30 = vadd.f32 %v1295_v16, %v1089_v28 }
 0x138   : > { %v1659_v25 = vld [vmem:[#allocation2 + $0x50] sm:$0xff]  ;;  %1635 = vst.msk [vmem:[#allocation2 + $0x61] sm:$0xff] %vm553_vm0, %v1627_v8  ;;  %v1675_v6 = vsel %vm553_vm0, %v1665_v2, 0.0 }
 0x139   : > { %v1673_v1 = vsel %vm553_vm0, %v1664_v15, 0.0  ;;  %v1694_v11 = vmul.f32 %v1664_v15, %v1664_v15  ;;  %v1724_v41 = vpack.c.bf16 %v1664_v15, %v1664_v15  ;;  %1734 = vst.msk [vmem:[%s2766_s16 + $0xc] sm:$0xf] %vm1730_vm2, %v1725_v60  ;;  %v1667_v45 = vadd.f32 %v1659_v25, %v1651_v56 }
 0x13a   : > { %v1674_v43 = vadd.f32 %v1673_v1, %v1672_v50  ;;  %v1658_v26 = vld [vmem:[#allocation2 + $0x40] sm:$0xff]  ;;  %v1705_v13 = vsel %vm553_vm0, %v1695_v58, 0.0 }
 0x13b   : > { %v1703_v32 = vsel %vm553_vm0, %v1694_v11, 0.0  ;;  %1733 = vst.msk [vmem:[%s2766_s16 + $0x8] sm:$0xf] %vm1730_vm2, %v1724_v41  ;;  %v1666_v29 = vadd.f32 %v1658_v26, %v1650_v27  ;;  %v1697_v49 = vmul.f32 %v1667_v45, %v1667_v45  ;;  %v1727_v39 = vpack.c.bf16 %v1667_v45, %v1667_v45 }
 0x13c   : > { %v1676_v38 = vadd.f32 %v1675_v6, %v1674_v43  ;;  %v1704_v7 = vadd.f32 %v1703_v32, %v1702_v23  ;;  %v1679_v4 = vsel %vm553_vm0, %v1667_v45, 0.0 }
 0x13d   : > { %v1677_v51 = vsel %vm553_vm0, %v1666_v29, 0.0  ;;  %v1696_v34 = vmul.f32 %v1666_v29, %v1666_v29  ;;  %v1726_v36 = vpack.c.bf16 %v1666_v29, %v1666_v29  ;;  %v1661_v17 = vld [vmem:[#allocation2 + $0x70] sm:$0xff]  ;;  %1736 = vst.msk [vmem:[%s2766_s16 + $0x14] sm:$0xf] %vm1730_vm2, %v1727_v39  ;;  %v1709_v18 = vsel %vm553_vm0, %v1697_v49, 0.0 }
 0x13e   : > { %v1706_v62 = vadd.f32 %v1705_v13, %v1704_v7  ;;  %v1678_v61 = vadd.f32 %v1677_v51, %v1676_v38  ;;  %v1669_v31 = vadd.f32 %v1661_v17, %v1653_v30 }
 0x13f   : > { %v1707_v53 = vsel %vm553_vm0, %v1696_v34, 0.0  ;;  %1735 = vst.msk [vmem:[%s2766_s16 + $0x10] sm:$0xf] %vm1730_vm2, %v1726_v36  ;;  %v1660_v9 = vld [vmem:[#allocation2 + $0x60] sm:$0xff] }
 0x140   : > { %v1680_v33 = vadd.f32 %v1679_v4, %v1678_v61  ;;  %v1708_v42 = vadd.f32 %v1707_v53, %v1706_v62  ;;  %v1668_v48 = vadd.f32 %v1660_v9, %v1652_v40  ;;  %v1699_v55 = vmul.f32 %v1669_v31, %v1669_v31 }
 0x141   : > { %v1729_v20 = vpack.c.bf16 %v1669_v31, %v1669_v31  ;;  %v1683_v24 = vsel %vm553_vm0, %v1669_v31, 0.0 }
 0x142   : > { %v1710_v12 = vadd.f32 %v1709_v18, %v1708_v42  ;;  %v1681_v35 = vsel %vm553_vm0, %v1668_v48, 0.0  ;;  %v1698_v37 = vmul.f32 %v1668_v48, %v1668_v48  ;;  %v1728_v54 = vpack.c.bf16 %v1668_v48, %v1668_v48 }
 0x143   : > { %v1682_v21 = vadd.f32 %v1681_v35, %v1680_v33  ;;  %1738 = vst.msk [vmem:[%s2766_s16 + $0x1c] sm:$0xf] %vm1730_vm2, %v1729_v20  ;;  %v1713_v2 = vsel %vm553_vm0, %v1699_v55, 0.0 }
 0x144   : > { %v1711_v22 = vsel %vm553_vm0, %v1698_v37, 0.0  ;;  %1737 = vst.msk [vmem:[%s2766_s16 + $0x18] sm:$0xf] %vm1730_vm2, %v1728_v54 }
 0x145   : > { %v1684_v19 = vadd.f32 %v1683_v24, %v1682_v21  ;;  %v1712_v47 = vadd.f32 %v1711_v22, %v1710_v12 }
 0x147   : > { %v1685_v59 = vrot.slane %v1684_v19, 4  ;;  %v1714_v10 = vadd.f32 %v1713_v2, %v1712_v47 }
 0x149   : > { %v1686_v28 = vadd.f32 %v1685_v59, %v1684_v19  ;;  %v1715_v52 = vrot.slane %v1714_v10, 4 }
 0x14b   : > { %v1687_v57 = vrot.slane %v1686_v28, 2  ;;  %v1716_v8 = vadd.f32 %v1715_v52, %v1714_v10 }
 0x14d   : > { %v1688_v63 = vadd.f32 %v1687_v57, %v1686_v28  ;;  %v1717_v14 = vrot.slane %v1716_v8, 2 }
 0x14f   : > { %v1689_v16 = vrot.slane %v1688_v63, 1  ;;  %v1718_v44 = vadd.f32 %v1717_v14, %v1716_v8 }
 0x151   : > { %v1690_v46 = vadd.f32 %v1689_v16, %v1688_v63  ;;  %v1719_v15 = vrot.slane %v1718_v44, 1 }
 0x153   : > { %1691 = vst.msk [vmem:[%s403_s24] sm:$0x1] %vm1637_vm1, %v1690_v46  ;;  %v1720_v56 = vadd.f32 %v1719_v15, %v1718_v44 }
 0x155   : > { %1721 = vst.msk [vmem:[%s403_s24 + $0x1] sm:$0x1] %vm1637_vm1, %v1720_v56 }
 0x156 PF: > { %p13_p9 = scmp.ge.s32.totalorder %s2338_s22, 4   ;;  %s2846_s18 = smov %s2284_s19 }
 0x157   : > { %s2847_s19 = smov %s2347_s25  ;;  %s2848_s20 = smov %s2338_s22 }
 0x158   :  { %15 = sbr.rel (!%p13_p9) target bundleno = 2 (0x2), region = 135 }

// kernel: bottleneck_unit.4
= control target key start
LH: loop header
LB: loop body
LE: loop exit
PB: predicated region body
PF: predicated region fallthrough
CT: control target
= control target key end

     0   :  { %vm275_vm0 = vcmask 1043456   ;;  %vm82_vm1 = vcmask 31744   ;;  %vm1495_vm2 = vcmask 60416   ;;  %vm813_vm3 = vcmask 64512   ;;  %s3330_s1 = inlined_call_operand.vmem [shape: f32[4,8], index: 1, kind: input, shape index: {}]   ;;  %s3331_s0 = inlined_call_operand.vmem [shape: f32[4,128,4], index: 0, kind: input, shape index: {}]   ;;  %s3332_s2 = inlined_call_operand.vmem [shape: f32[4,8], index: 2, kind: input, shape index: {}]   ;;  %s3333_s3 = inlined_call_operand.vmem [shape: bf16[4,128,8], index: 3, kind: output, shape index: {0}]   ;;  %s3334_s4 = inlined_call_operand.vmem [shape: bf16[128,8], index: 4, kind: output, shape index: {1}]   ;;  %s3335_s5 = inlined_call_operand.vmem [shape: f32[1,4,8], index: 5, kind: output, shape index: {2}]  }
   0x1   :  { %v81_v0 = vld [vmem:[%s3330_s1] sm:$0xf]  ;;  %v2143_v2 = vld [vmem:[%s3331_s0 + $0x8] sm:$0xff]  ;;  %v2151_v3 = vld [vmem:[%s3331_s0 + $0x10] sm:$0xff]  ;;  %vm947_vm4 = vcmask 57344  }
   0x2   :  { %v2138_v1 = vld [vmem:[%s3331_s0] sm:$0xff]  ;;  %1976 = vmatprep.subr.msk.mxu0 %vm275_vm0, %v81_v0  ;;  %2100 = vmatprep.subr.msk.mxu1 %vm275_vm0, %v81_v0  ;;  %v2163_v4 = vld [vmem:[%s3331_s0 + $0x18] sm:$0xff]  ;;  %v58_v7 = vld [vmem:[%s3331_s0 + $0x148] sm:$0xff] }
   0x3   :  { %1978 = vmatprep.mubr.msk.f32.mxu0 %vm82_vm1, %v2138_v1  ;;  %1977 = vmatpush3.msk.msra.mxu0 %vm275_vm0, %v81_v0  ;;  %v2168_v5 = vld [vmem:[%s3331_s0 + $0x20] sm:$0xff]  ;;  %v2183_v8 = vld [vmem:[%s3331_s0 + $0x28] sm:$0xff]  ;;  %v59_v9 = vld [vmem:[%s3331_s0 + $0x150] sm:$0xff] }
   0x4   :  { %1979 = vmatmul.mubr.msk.f32.vlgmr.msra.gmra.mxu0 %vm82_vm1, %v2143_v2  ;;  %2101 = vmatpush3.msk.msra.mxu1 %vm275_vm0, %v81_v0  ;;  %v57_v6 = vld [vmem:[%s3331_s0 + $0x140] sm:$0xff]  ;;  %v2192_v10 = vld [vmem:[%s3331_s0 + $0x30] sm:$0xff]  ;;  %v60_v11 = vld [vmem:[%s3331_s0 + $0x158] sm:$0xff] }
   0x5   :  { %1981 = vmatprep.mubr.msk.f32.mxu0 %vm82_vm1, %v2151_v3  ;;  %2038 = vmatprep.mubr.msk.f32.mxu1 %vm82_vm1, %v57_v6  ;;  %v664_v12 = vld [vmem:[%s3332_s2] sm:$0xf]  ;;  %v2213_v14 = vld [vmem:[%s3331_s0 + $0x38] sm:$0xff]  ;;  %v62_v16 = vld [vmem:[%s3331_s0 + $0x168] sm:$0xff] }
   0x6   :  { %2039 = vmatmul.mubr.msk.f32.vlgmr.msra.gmra.mxu1 %vm82_vm1, %v58_v7  ;;  %v61_v13 = vld [vmem:[%s3331_s0 + $0x160] sm:$0xff]  ;;  %2074 = vmatprep.subr.msk.mxu1 %vm275_vm0, %v664_v12  ;;  %v63_v17 = vld [vmem:[%s3331_s0 + $0x170] sm:$0xff]  ;;  %v2236_v18 = vld [vmem:[%s3331_s0 + $0x48] sm:$0xff] }
   0x7   :  { %2041 = vmatprep.mubr.msk.f32.mxu1 %vm82_vm1, %v59_v9  ;;  %2075 = vmatpush3.msk.msra.mxu1 %vm275_vm0, %v664_v12  ;;  %v2219_v15 = vld [vmem:[%s3331_s0 + $0x40] sm:$0xff]  ;;  %v2241_v19 = vld [vmem:[%s3331_s0 + $0x50] sm:$0xff]  ;;  %v64_v20 = vld [vmem:[%s3331_s0 + $0x178] sm:$0xff] }
   0x8   :  { %1982 = vmatmul.mubr.msk.f32.gmra.mxu0 %vm82_vm1, %v2163_v4  ;;  %v65_v21 = vld [vmem:[%s3331_s0 + $0x180] sm:$0xff]  ;;  %v2258_v22 = vld [vmem:[%s3331_s0 + $0x58] sm:$0xff]  ;;  %v66_v24 = vld [vmem:[%s3331_s0 + $0x188] sm:$0xff] }
   0x9   :  { %1984 = vmatprep.mubr.msk.f32.mxu0 %vm82_vm1, %v2168_v5  ;;  %v2263_v23 = vld [vmem:[%s3331_s0 + $0x60] sm:$0xff]  ;;  %v67_v25 = vld [vmem:[%s3331_s0 + $0x190] sm:$0xff]  ;;  %v2280_v26 = vld [vmem:[%s3331_s0 + $0x68] sm:$0xff] }
   0xa   :  { %2042 = vmatmul.mubr.msk.f32.gmra.mxu1 %vm82_vm1, %v60_v11  ;;  %v2285_v27 = vld [vmem:[%s3331_s0 + $0x70] sm:$0xff]  ;;  %v68_v28 = vld [vmem:[%s3331_s0 + $0x198] sm:$0xff]  ;;  %v69_v29 = vld [vmem:[%s3331_s0 + $0x1a0] sm:$0xff] }
   0xb   :  { %2044 = vmatprep.mubr.msk.f32.mxu1 %vm82_vm1, %v61_v13  ;;  %v2302_v30 = vld [vmem:[%s3331_s0 + $0x78] sm:$0xff]  ;;  %v33_v31 = vld [vmem:[%s3331_s0 + $0x80] sm:$0xff]  ;;  %v70_v32 = vld [vmem:[%s3331_s0 + $0x1a8] sm:$0xff] }
   0xc   :  { %1985 = vmatmul.mubr.msk.f32.gmra.mxu0 %vm82_vm1, %v2183_v8  ;;  %v71_v33 = vld [vmem:[%s3331_s0 + $0x1b0] sm:$0xff]  ;;  %v34_v34 = vld [vmem:[%s3331_s0 + $0x88] sm:$0xff]  ;;  %v72_v36 = vld [vmem:[%s3331_s0 + $0x1b8] sm:$0xff] }
   0xd   :  { %1987 = vmatprep.mubr.msk.f32.mxu0 %vm82_vm1, %v2192_v10  ;;  %v35_v35 = vld [vmem:[%s3331_s0 + $0x90] sm:$0xff]  ;;  %v73_v37 = vld [vmem:[%s3331_s0 + $0x1c0] sm:$0xff]  ;;  %v36_v38 = vld [vmem:[%s3331_s0 + $0x98] sm:$0xff] }
   0xe   :  { %2045 = vmatmul.mubr.msk.f32.gmra.mxu1 %vm82_vm1, %v62_v16  ;;  %v37_v39 = vld [vmem:[%s3331_s0 + $0xa0] sm:$0xff]  ;;  %v74_v40 = vld [vmem:[%s3331_s0 + $0x1c8] sm:$0xff]  ;;  %v75_v41 = vld [vmem:[%s3331_s0 + $0x1d0] sm:$0xff] }
   0xf   :  { %2047 = vmatprep.mubr.msk.f32.mxu1 %vm82_vm1, %v63_v17  ;;  %v38_v42 = vld [vmem:[%s3331_s0 + $0xa8] sm:$0xff]  ;;  %v39_v43 = vld [vmem:[%s3331_s0 + $0xb0] sm:$0xff]  ;;  %v76_v44 = vld [vmem:[%s3331_s0 + $0x1d8] sm:$0xff] }
  0x10   :  { %1988 = vmatmul.mubr.msk.f32.gmra.mxu0 %vm82_vm1, %v2213_v14  ;;  %v77_v45 = vld [vmem:[%s3331_s0 + $0x1e0] sm:$0xff]  ;;  %v40_v46 = vld [vmem:[%s3331_s0 + $0xb8] sm:$0xff]  ;;  %v78_v48 = vld [vmem:[%s3331_s0 + $0x1e8] sm:$0xff] }
  0x11   :  { %1990 = vmatprep.mubr.msk.f32.mxu0 %vm82_vm1, %v2219_v15  ;;  %v41_v47 = vld [vmem:[%s3331_s0 + $0xc0] sm:$0xff]  ;;  %v79_v49 = vld [vmem:[%s3331_s0 + $0x1f0] sm:$0xff]  ;;  %v42_v50 = vld [vmem:[%s3331_s0 + $0xc8] sm:$0xff] }
  0x12   :  { %2048 = vmatmul.mubr.msk.f32.gmra.mxu1 %vm82_vm1, %v64_v20  ;;  %v43_v51 = vld [vmem:[%s3331_s0 + $0xd0] sm:$0xff]  ;;  %v80_v52 = vld [vmem:[%s3331_s0 + $0x1f8] sm:$0xff]  ;;  %v45_v54 = vld [vmem:[%s3331_s0 + $0xe0] sm:$0xff] }
  0x13   :  { %2050 = vmatprep.mubr.msk.f32.mxu1 %vm82_vm1, %v65_v21  ;;  %v44_v53 = vld [vmem:[%s3331_s0 + $0xd8] sm:$0xff]  ;;  %v46_v55 = vld [vmem:[%s3331_s0 + $0xe8] sm:$0xff]  ;;  %v47_v56 = vld [vmem:[%s3331_s0 + $0xf0] sm:$0xff] }
  0x14   :  { %1991 = vmatmul.mubr.msk.f32.gmra.mxu0 %vm82_vm1, %v2236_v18  ;;  %v48_v57 = vld [vmem:[%s3331_s0 + $0xf8] sm:$0xff]  ;;  %v49_v58 = vld [vmem:[%s3331_s0 + $0x100] sm:$0xff]  ;;  %v50_v59 = vld [vmem:[%s3331_s0 + $0x108] sm:$0xff] }
  0x15   :  { %1993 = vmatprep.mubr.msk.f32.mxu0 %vm82_vm1, %v2241_v19  ;;  %v51_v60 = vld [vmem:[%s3331_s0 + $0x110] sm:$0xff]  ;;  %v52_v61 = vld [vmem:[%s3331_s0 + $0x118] sm:$0xff]  ;;  %v53_v62 = vld [vmem:[%s3331_s0 + $0x120] sm:$0xff] }
  0x16   :  { %2051 = vmatmul.mubr.msk.f32.gmra.mxu1 %vm82_vm1, %v66_v24  ;;  %v54_v63 = vld [vmem:[%s3331_s0 + $0x128] sm:$0xff]  ;;  %v55_v0 = vld [vmem:[%s3331_s0 + $0x130] sm:$0xff] }
  0x17   :  { %2053 = vmatprep.mubr.msk.f32.mxu1 %vm82_vm1, %v67_v25 }
  0x18   :  { %1994 = vmatmul.mubr.msk.f32.gmra.mxu0 %vm82_vm1, %v2258_v22 }
  0x19   :  { %1996 = vmatprep.mubr.msk.f32.mxu0 %vm82_vm1, %v2263_v23 }
  0x1a   :  { %2054 = vmatmul.mubr.msk.f32.gmra.mxu1 %vm82_vm1, %v68_v28 }
  0x1b   :  { %2056 = vmatprep.mubr.msk.f32.mxu1 %vm82_vm1, %v69_v29 }
  0x1c   :  { %1997 = vmatmul.mubr.msk.f32.gmra.mxu0 %vm82_vm1, %v2280_v26 }
  0x1d   :  { %1999 = vmatprep.mubr.msk.f32.mxu0 %vm82_vm1, %v2285_v27 }
  0x1e   :  { %2057 = vmatmul.mubr.msk.f32.gmra.mxu1 %vm82_vm1, %v70_v32 }
  0x1f   :  { %2059 = vmatprep.mubr.msk.f32.mxu1 %vm82_vm1, %v71_v33 }
  0x20   :  { %2000 = vmatmul.mubr.msk.f32.gmra.mxu0 %vm82_vm1, %v2302_v30 }
  0x21   :  { %2002 = vmatprep.mubr.msk.f32.mxu0 %vm82_vm1, %v33_v31 }
  0x22   :  { %2060 = vmatmul.mubr.msk.f32.gmra.mxu1 %vm82_vm1, %v72_v36 }
  0x23   :  { %2062 = vmatprep.mubr.msk.f32.mxu1 %vm82_vm1, %v73_v37 }
  0x24   :  { %2003 = vmatmul.mubr.msk.f32.gmra.mxu0 %vm82_vm1, %v34_v34 }
  0x25   :  { %2005 = vmatprep.mubr.msk.f32.mxu0 %vm82_vm1, %v35_v35 }
  0x26   :  { %2063 = vmatmul.mubr.msk.f32.gmra.mxu1 %vm82_vm1, %v74_v40 }
  0x27   :  { %2065 = vmatprep.mubr.msk.f32.mxu1 %vm82_vm1, %v75_v41 }
  0x28   :  { %2006 = vmatmul.mubr.msk.f32.gmra.mxu0 %vm82_vm1, %v36_v38 }
  0x29   :  { %2008 = vmatprep.mubr.msk.f32.mxu0 %vm82_vm1, %v37_v39 }
  0x2a   :  { %2066 = vmatmul.mubr.msk.f32.gmra.mxu1 %vm82_vm1, %v76_v44 }
  0x2b   :  { %2068 = vmatprep.mubr.msk.f32.mxu1 %vm82_vm1, %v77_v45 }
  0x2c   :  { %2009 = vmatmul.mubr.msk.f32.gmra.mxu0 %vm82_vm1, %v38_v42 }
  0x2d   :  { %2011 = vmatprep.mubr.msk.f32.mxu0 %vm82_vm1, %v39_v43 }
  0x2e   :  { %2069 = vmatmul.mubr.msk.f32.gmra.mxu1 %vm82_vm1, %v78_v48 }
  0x2f   :  { %2071 = vmatprep.mubr.msk.f32.mxu1 %vm82_vm1, %v79_v49 }
  0x30   :  { %2012 = vmatmul.mubr.msk.f32.gmra.mxu0 %vm82_vm1, %v40_v46 }
  0x31   :  { %2014 = vmatprep.mubr.msk.f32.mxu0 %vm82_vm1, %v41_v47 }
  0x32   :  { %2072 = vmatmul.mubr.msk.f32.gmra.mxu1 %vm82_vm1, %v80_v52 }
  0x33   :  { %2076 = vmatprep.mubr.msk.f32.mxu1 %vm82_vm1, %v2138_v1  ;;  %v56_v1 = vld [vmem:[%s3331_s0 + $0x138] sm:$0xff] }
  0x34   :  { %2015 = vmatmul.mubr.msk.f32.gmra.mxu0 %vm82_vm1, %v42_v50 }
  0x35   :  { %2017 = vmatprep.mubr.msk.f32.mxu0 %vm82_vm1, %v43_v51 }
  0x36   :  { %2077 = vmatmul.mubr.msk.f32.vlgmr.msra.gmra.mxu1 %vm82_vm1, %v2143_v2 }
  0x37   :  { %2079 = vmatprep.mubr.msk.f32.mxu1 %vm82_vm1, %v2151_v3 }
  0x38   :  { %2018 = vmatmul.mubr.msk.f32.gmra.mxu0 %vm82_vm1, %v44_v53 }
  0x39   :  { %2020 = vmatprep.mubr.msk.f32.mxu0 %vm82_vm1, %v45_v54 }
  0x3a   :  { %2080 = vmatmul.mubr.msk.f32.gmra.mxu1 %vm82_vm1, %v2163_v4 }
  0x3b   :  { %2082 = vmatprep.mubr.msk.f32.mxu1 %vm82_vm1, %v2168_v5 }
  0x3c   :  { %2021 = vmatmul.mubr.msk.f32.gmra.mxu0 %vm82_vm1, %v46_v55 }
  0x3d   :  { %2023 = vmatprep.mubr.msk.f32.mxu0 %vm82_vm1, %v47_v56 }
  0x3e   :  { %2083 = vmatmul.mubr.msk.f32.gmra.mxu1 %vm82_vm1, %v2183_v8 }
  0x3f   :  { %2085 = vmatprep.mubr.msk.f32.mxu1 %vm82_vm1, %v2192_v10 }
  0x40   :  { %2024 = vmatmul.mubr.msk.f32.gmra.mxu0 %vm82_vm1, %v48_v57 }
  0x41   :  { %2026 = vmatprep.mubr.msk.f32.mxu0 %vm82_vm1, %v49_v58 }
  0x42   :  { %2086 = vmatmul.mubr.msk.f32.gmra.mxu1 %vm82_vm1, %v2213_v14 }
  0x43   :  { %2088 = vmatprep.mubr.msk.f32.mxu1 %vm82_vm1, %v2219_v15 }
  0x44   :  { %2027 = vmatmul.mubr.msk.f32.gmra.mxu0 %vm82_vm1, %v50_v59 }
  0x45   :  { %2029 = vmatprep.mubr.msk.f32.mxu0 %vm82_vm1, %v51_v60 }
  0x46   :  { %2089 = vmatmul.mubr.msk.f32.gmra.mxu1 %vm82_vm1, %v2236_v18 }
  0x47   :  { %2091 = vmatprep.mubr.msk.f32.mxu1 %vm82_vm1, %v2241_v19 }
  0x48   :  { %2030 = vmatmul.mubr.msk.f32.gmra.mxu0 %vm82_vm1, %v52_v61 }
  0x49   :  { %2032 = vmatprep.mubr.msk.f32.mxu0 %vm82_vm1, %v53_v62 }
  0x4a   :  { %2092 = vmatmul.mubr.msk.f32.gmra.mxu1 %vm82_vm1, %v2258_v22 }
  0x4b   :  { %2094 = vmatprep.mubr.msk.f32.mxu1 %vm82_vm1, %v2263_v23 }
  0x4c   :  { %2033 = vmatmul.mubr.msk.f32.gmra.mxu0 %vm82_vm1, %v54_v63 }
  0x4d   :  { %2035 = vmatprep.mubr.msk.f32.mxu0 %vm82_vm1, %v55_v0 }
  0x4e   :  { %2095 = vmatmul.mubr.msk.f32.gmra.mxu1 %vm82_vm1, %v2280_v26 }
  0x4f   :  { %2097 = vmatprep.mubr.msk.f32.mxu1 %vm82_vm1, %v2285_v27 }
  0x50   :  { %2036 = vmatmul.mubr.msk.f32.gmra.mxu0 %vm82_vm1, %v56_v1 }
  0x52   :  { %2098 = vmatmul.mubr.msk.f32.gmra.mxu1 %vm82_vm1, %v2302_v30 }
  0xc4   :  { %v1980_v2 = vpop.f32.mrf.mxu0 }
  0xc5   :  { %v1815_v3 = vpack.c.bf16 %v1980_v2, %v1980_v2  ;;  %v950_v4 = vmul.f32 %v1980_v2, %v1980_v2  ;;  %v815_v10 = vsel %vm813_vm3, %v1980_v2, 0.0 }
  0xc6   :  { %v345_v5 = vpop.f32.mrf.mxu0  ;;  %v2492_v16 = vpop.f32.mrf.mxu1 }
  0xc7   :  { %1497 = vst.msk [vmem:[%s3333_s3 + $0x4] sm:$0xf] %vm1495_vm2, %v1815_v3  ;;  %v814_v6 = vsel %vm813_vm3, %v345_v5, 0.0  ;;  %v949_v7 = vmul.f32 %v345_v5, %v345_v5  ;;  %v1814_v8 = vpack.c.bf16 %v345_v5, %v345_v5  ;;  %v1014_v13 = vsel %vm813_vm3, %v950_v4, 0.0 }
  0xc8   :  { %v1983_v9 = vpop.f32.mrf.mxu0  ;;  %v816_v14 = vadd.f32 %v815_v10, %v814_v6  ;;  %v1855_v24 = vpack.c.bf16 %v2492_v16, %v2492_v16  ;;  %v2501_v25 = vpop.f32.mrf.mxu1 }
  0xc9   :  { %v1013_v11 = vsel %vm813_vm3, %v949_v7, 0.0  ;;  %1496 = vst.msk [vmem:[%s3333_s3] sm:$0xf] %vm1495_vm2, %v1814_v8  ;;  %v1817_v12 = vpack.c.bf16 %v1983_v9, %v1983_v9  ;;  %v952_v17 = vmul.f32 %v1983_v9, %v1983_v9  ;;  %v819_v26 = vsel %vm813_vm3, %v1983_v9, 0.0 }
  0xca   :  { %v355_v15 = vpop.f32.mrf.mxu0  ;;  %v1015_v21 = vadd.f32 %v1014_v13, %v1013_v11  ;;  %1537 = vst.msk [vmem:[%s3333_s3 + $0xa4] sm:$0xf] %vm1495_vm2, %v1855_v24  ;;  %v2513_v33 = vpop.f32.mrf.mxu1  ;;  %v1854_v41 = vpack.c.bf16 %v2501_v25, %v2501_v25 }
  0xcb   :  { %1499 = vst.msk [vmem:[%s3333_s3 + $0xc] sm:$0xf] %vm1495_vm2, %v1817_v12  ;;  %v817_v18 = vsel %vm813_vm3, %v355_v15, 0.0  ;;  %v951_v19 = vmul.f32 %v355_v15, %v355_v15  ;;  %v1816_v20 = vpack.c.bf16 %v355_v15, %v355_v15  ;;  %v1018_v34 = vsel %vm813_vm3, %v952_v17, 0.0 }
  0xcc   :  { %v818_v22 = vadd.f32 %v817_v18, %v816_v14  ;;  %v1986_v23 = vpop.f32.mrf.mxu0  ;;  %v2523_v42 = vpop.f32.mrf.mxu1  ;;  %1536 = vst.msk [vmem:[%s3333_s3 + $0xa0] sm:$0xf] %vm1495_vm2, %v1854_v41  ;;  %v1857_v58 = vpack.c.bf16 %v2513_v33, %v2513_v33 }
  0xcd   :  { %v1016_v27 = vsel %vm813_vm3, %v951_v19, 0.0  ;;  %1498 = vst.msk [vmem:[%s3333_s3 + $0x8] sm:$0xf] %vm1495_vm2, %v1816_v20  ;;  %v1819_v28 = vpack.c.bf16 %v1986_v23, %v1986_v23  ;;  %v954_v30 = vmul.f32 %v1986_v23, %v1986_v23  ;;  %v823_v43 = vsel %vm813_vm3, %v1986_v23, 0.0 }
  0xce   :  { %v1017_v29 = vadd.f32 %v1016_v27, %v1015_v21  ;;  %v365_v31 = vpop.f32.mrf.mxu0  ;;  %v820_v32 = vadd.f32 %v819_v26, %v818_v22  ;;  %v2536_v50 = vpop.f32.mrf.mxu1  ;;  %1539 = vst.msk [vmem:[%s3333_s3 + $0xac] sm:$0xf] %vm1495_vm2, %v1857_v58  ;;  %v1856_v11 = vpack.c.bf16 %v2523_v42, %v2523_v42 }
  0xcf   :  { %1501 = vst.msk [vmem:[%s3333_s3 + $0x14] sm:$0xf] %vm1495_vm2, %v1819_v28  ;;  %v821_v35 = vsel %vm813_vm3, %v365_v31, 0.0  ;;  %v953_v36 = vmul.f32 %v365_v31, %v365_v31  ;;  %v1818_v37 = vpack.c.bf16 %v365_v31, %v365_v31  ;;  %v1022_v46 = vsel %vm813_vm3, %v954_v30, 0.0 }
  0xd0   :  { %v822_v38 = vadd.f32 %v821_v35, %v820_v32  ;;  %v1019_v39 = vadd.f32 %v1018_v34, %v1017_v29  ;;  %v1989_v40 = vpop.f32.mrf.mxu0  ;;  %v2545_v59 = vpop.f32.mrf.mxu1  ;;  %1538 = vst.msk [vmem:[%s3333_s3 + $0xa8] sm:$0xf] %vm1495_vm2, %v1856_v11  ;;  %v1859_v30 = vpack.c.bf16 %v2536_v50, %v2536_v50 }
  0xd1   :  { %v1020_v44 = vsel %vm813_vm3, %v953_v36, 0.0  ;;  %1500 = vst.msk [vmem:[%s3333_s3 + $0x10] sm:$0xf] %vm1495_vm2, %v1818_v37  ;;  %v1821_v45 = vpack.c.bf16 %v1989_v40, %v1989_v40  ;;  %v956_v51 = vmul.f32 %v1989_v40, %v1989_v40  ;;  %v827_v60 = vsel %vm813_vm3, %v1989_v40, 0.0 }
  0xd2   :  { %v1021_v47 = vadd.f32 %v1020_v44, %v1019_v39  ;;  %v375_v48 = vpop.f32.mrf.mxu0  ;;  %v824_v49 = vadd.f32 %v823_v43, %v822_v38  ;;  %v2557_v3 = vpop.f32.mrf.mxu1  ;;  %1541 = vst.msk [vmem:[%s3333_s3 + $0xb4] sm:$0xf] %vm1495_vm2, %v1859_v30 }
  0xd3   :  { %1503 = vst.msk [vmem:[%s3333_s3 + $0x1c] sm:$0xf] %vm1495_vm2, %v1821_v45  ;;  %v825_v52 = vsel %vm813_vm3, %v375_v48, 0.0  ;;  %v955_v53 = vmul.f32 %v375_v48, %v375_v48  ;;  %v1820_v54 = vpack.c.bf16 %v375_v48, %v375_v48  ;;  %v1026_v4 = vsel %vm813_vm3, %v956_v51, 0.0 }
  0xd4   :  { %v826_v55 = vadd.f32 %v825_v52, %v824_v49  ;;  %v1023_v56 = vadd.f32 %v1022_v46, %v1021_v47  ;;  %v1992_v57 = vpop.f32.mrf.mxu0  ;;  %v2567_v12 = vpop.f32.mrf.mxu1  ;;  %v1858_v49 = vpack.c.bf16 %v2545_v59, %v2545_v59 }
  0xd5   :  { %v1024_v61 = vsel %vm813_vm3, %v955_v53, 0.0  ;;  %1502 = vst.msk [vmem:[%s3333_s3 + $0x18] sm:$0xf] %vm1495_vm2, %v1820_v54  ;;  %v1823_v62 = vpack.c.bf16 %v1992_v57, %v1992_v57  ;;  %v958_v0 = vmul.f32 %v1992_v57, %v1992_v57  ;;  %v831_v13 = vsel %vm813_vm3, %v1992_v57, 0.0 }
  0xd6   :  { %v1025_v63 = vadd.f32 %v1024_v61, %v1023_v56  ;;  %v385_v1 = vpop.f32.mrf.mxu0  ;;  %v828_v2 = vadd.f32 %v827_v60, %v826_v55  ;;  %v2580_v21 = vpop.f32.mrf.mxu1  ;;  %1540 = vst.msk [vmem:[%s3333_s3 + $0xb0] sm:$0xf] %vm1495_vm2, %v1858_v49 }
  0xd7   :  { %1505 = vst.msk [vmem:[%s3333_s3 + $0x24] sm:$0xf] %vm1495_vm2, %v1823_v62  ;;  %v829_v5 = vsel %vm813_vm3, %v385_v1, 0.0  ;;  %v957_v6 = vmul.f32 %v385_v1, %v385_v1  ;;  %v1822_v7 = vpack.c.bf16 %v385_v1, %v385_v1  ;;  %v1030_v17 = vsel %vm813_vm3, %v958_v0, 0.0 }
  0xd8   :  { %v830_v8 = vadd.f32 %v829_v5, %v828_v2  ;;  %v1027_v9 = vadd.f32 %v1026_v4, %v1025_v63  ;;  %v1995_v10 = vpop.f32.mrf.mxu0  ;;  %v2589_v31 = vpop.f32.mrf.mxu1  ;;  %v1861_v5 = vpack.c.bf16 %v2557_v3, %v2557_v3 }
  0xd9   :  { %v1028_v14 = vsel %vm813_vm3, %v957_v6, 0.0  ;;  %1504 = vst.msk [vmem:[%s3333_s3 + $0x20] sm:$0xf] %vm1495_vm2, %v1822_v7  ;;  %v1825_v15 = vpack.c.bf16 %v1995_v10, %v1995_v10  ;;  %v960_v22 = vmul.f32 %v1995_v10, %v1995_v10  ;;  %v835_v32 = vsel %vm813_vm3, %v1995_v10, 0.0 }
  0xda   :  { %v1029_v18 = vadd.f32 %v1028_v14, %v1027_v9  ;;  %v395_v19 = vpop.f32.mrf.mxu0  ;;  %v832_v20 = vadd.f32 %v831_v13, %v830_v8  ;;  %v2601_v40 = vpop.f32.mrf.mxu1  ;;  %1543 = vst.msk [vmem:[%s3333_s3 + $0xbc] sm:$0xf] %vm1495_vm2, %v1861_v5 }
  0xdb   :  { %1507 = vst.msk [vmem:[%s3333_s3 + $0x2c] sm:$0xf] %vm1495_vm2, %v1825_v15  ;;  %v833_v23 = vsel %vm813_vm3, %v395_v19, 0.0  ;;  %v959_v24 = vmul.f32 %v395_v19, %v395_v19  ;;  %v1824_v26 = vpack.c.bf16 %v395_v19, %v395_v19  ;;  %v1034_v41 = vsel %vm813_vm3, %v960_v22, 0.0 }
  0xdc   :  { %v834_v27 = vadd.f32 %v833_v23, %v832_v20  ;;  %v1031_v28 = vadd.f32 %v1030_v17, %v1029_v18  ;;  %v1998_v29 = vpop.f32.mrf.mxu0  ;;  %v2611_v51 = vpop.f32.mrf.mxu1 }
  0xdd   :  { %v1032_v34 = vsel %vm813_vm3, %v959_v24, 0.0  ;;  %1506 = vst.msk [vmem:[%s3333_s3 + $0x28] sm:$0xf] %vm1495_vm2, %v1824_v26  ;;  %v1827_v35 = vpack.c.bf16 %v1998_v29, %v1998_v29  ;;  %v962_v37 = vmul.f32 %v1998_v29, %v1998_v29  ;;  %v839_v52 = vsel %vm813_vm3, %v1998_v29, 0.0 }
  0xde   :  { %v1033_v36 = vadd.f32 %v1032_v34, %v1031_v28  ;;  %v405_v38 = vpop.f32.mrf.mxu0  ;;  %v836_v39 = vadd.f32 %v835_v32, %v834_v27  ;;  %v2624_v60 = vpop.f32.mrf.mxu1  ;;  %v990_v26 = vmul.f32 %v2492_v16, %v2492_v16  ;;  %v1860_v27 = vpack.c.bf16 %v2567_v12, %v2567_v12 }
  0xdf   :  { %1509 = vst.msk [vmem:[%s3333_s3 + $0x34] sm:$0xf] %vm1495_vm2, %v1827_v35  ;;  %v837_v43 = vsel %vm813_vm3, %v405_v38, 0.0  ;;  %v961_v44 = vmul.f32 %v405_v38, %v405_v38  ;;  %v1826_v45 = vpack.c.bf16 %v405_v38, %v405_v38  ;;  %v1038_v55 = vsel %vm813_vm3, %v962_v37, 0.0 }
  0xe0   :  { %v838_v46 = vadd.f32 %v837_v43, %v836_v39  ;;  %v1035_v47 = vadd.f32 %v1034_v41, %v1033_v36  ;;  %v2001_v48 = vpop.f32.mrf.mxu0  ;;  %v2633_v6 = vpop.f32.mrf.mxu1  ;;  %v2667_v34 = vsel %vm813_vm3, %v2492_v16, 0.0  ;;  %v989_v39 = vmul.f32 %v2501_v25, %v2501_v25  ;;  %1542 = vst.msk [vmem:[%s3333_s3 + $0xb8] sm:$0xf] %vm1495_vm2, %v1860_v27 }
  0xe1   :  { %v1036_v53 = vsel %vm813_vm3, %v961_v44, 0.0  ;;  %1508 = vst.msk [vmem:[%s3333_s3 + $0x30] sm:$0xf] %vm1495_vm2, %v1826_v45  ;;  %v1829_v54 = vpack.c.bf16 %v2001_v48, %v2001_v48  ;;  %v964_v61 = vmul.f32 %v2001_v48, %v2001_v48  ;;  %v843_v7 = vsel %vm813_vm3, %v2001_v48, 0.0 }
  0xe2   :  { %v1037_v56 = vadd.f32 %v1036_v53, %v1035_v47  ;;  %v415_v57 = vpop.f32.mrf.mxu0  ;;  %v840_v58 = vadd.f32 %v839_v52, %v838_v46  ;;  %v2645_v15 = vpop.f32.mrf.mxu1  ;;  %v2684_v48 = vsel %vm813_vm3, %v990_v26, 0.0  ;;  %v1863_v52 = vpack.c.bf16 %v2580_v21, %v2580_v21 }
  0xe3   :  { %1511 = vst.msk [vmem:[%s3333_s3 + $0x3c] sm:$0xf] %vm1495_vm2, %v1829_v54  ;;  %v841_v62 = vsel %vm813_vm3, %v415_v57, 0.0  ;;  %v963_v63 = vmul.f32 %v415_v57, %v415_v57  ;;  %v1828_v0 = vpack.c.bf16 %v415_v57, %v415_v57  ;;  %v1042_v17 = vsel %vm813_vm3, %v964_v61, 0.0 }
  0xe4   :  { %v842_v1 = vadd.f32 %v841_v62, %v840_v58  ;;  %v1039_v2 = vadd.f32 %v1038_v55, %v1037_v56  ;;  %v2004_v4 = vpop.f32.mrf.mxu0  ;;  %v2657_v28 = vpop.f32.mrf.mxu1  ;;  %v2698_v57 = vsel %vm813_vm3, %v2501_v25, 0.0  ;;  %v2701_v62 = vsel %vm813_vm3, %v989_v39, 0.0  ;;  %1545 = vst.msk [vmem:[%s3333_s3 + $0xc4] sm:$0xf] %vm1495_vm2, %v1863_v52 }
  0xe5   :  { %v1040_v8 = vsel %vm813_vm3, %v963_v63, 0.0  ;;  %1510 = vst.msk [vmem:[%s3333_s3 + $0x38] sm:$0xf] %vm1495_vm2, %v1828_v0  ;;  %v1831_v9 = vpack.c.bf16 %v2004_v4, %v2004_v4  ;;  %v966_v11 = vmul.f32 %v2004_v4, %v2004_v4  ;;  %v847_v29 = vsel %vm813_vm3, %v2004_v4, 0.0 }
  0xe6   :  { %v1041_v10 = vadd.f32 %v1040_v8, %v1039_v2  ;;  %v425_v13 = vpop.f32.mrf.mxu0  ;;  %v844_v14 = vadd.f32 %v843_v7, %v842_v1  ;;  %v2676_v41 = vpop.f32.mrf.mxu1  ;;  %v1865_v39 = vpack.c.bf16 %v2601_v40, %v2601_v40 }
  0xe7   :  { %1513 = vst.msk [vmem:[%s3333_s3 + $0x44] sm:$0xf] %vm1495_vm2, %v1831_v9  ;;  %v845_v18 = vsel %vm813_vm3, %v425_v13, 0.0  ;;  %v965_v19 = vmul.f32 %v425_v13, %v425_v13  ;;  %v1830_v20 = vpack.c.bf16 %v425_v13, %v425_v13  ;;  %v1046_v35 = vsel %vm813_vm3, %v966_v11, 0.0 }
  0xe8   :  { %v846_v22 = vadd.f32 %v845_v18, %v844_v14  ;;  %v1043_v23 = vadd.f32 %v1042_v17, %v1041_v10  ;;  %v2007_v24 = vpop.f32.mrf.mxu0  ;;  %v2688_v53 = vpop.f32.mrf.mxu1  ;;  %v992_v9 = vmul.f32 %v2513_v33, %v2513_v33  ;;  %v1862_v11 = vpack.c.bf16 %v2589_v31, %v2589_v31  ;;  %1547 = vst.msk [vmem:[%s3333_s3 + $0xcc] sm:$0xf] %vm1495_vm2, %v1865_v39 }
  0xe9   :  { %v1044_v30 = vsel %vm813_vm3, %v965_v19, 0.0  ;;  %1512 = vst.msk [vmem:[%s3333_s3 + $0x40] sm:$0xf] %vm1495_vm2, %v1830_v20  ;;  %v1833_v32 = vpack.c.bf16 %v2007_v24, %v2007_v24  ;;  %v968_v43 = vmul.f32 %v2007_v24, %v2007_v24  ;;  %v851_v54 = vsel %vm813_vm3, %v2007_v24, 0.0 }
  0xea   :  { %v1045_v36 = vadd.f32 %v1044_v30, %v1043_v23  ;;  %v435_v37 = vpop.f32.mrf.mxu0  ;;  %v848_v38 = vadd.f32 %v847_v29, %v846_v22  ;;  %v2707_v1 = vpop.f32.mrf.mxu1  ;;  %v2729_v18 = vsel %vm813_vm3, %v2513_v33, 0.0  ;;  %v991_v23 = vmul.f32 %v2523_v42, %v2523_v42  ;;  %1544 = vst.msk [vmem:[%s3333_s3 + $0xc0] sm:$0xf] %vm1495_vm2, %v1862_v11 }
  0xeb   :  { %1515 = vst.msk [vmem:[%s3333_s3 + $0x4c] sm:$0xf] %vm1495_vm2, %v1833_v32  ;;  %v849_v16 = vsel %vm813_vm3, %v435_v37, 0.0  ;;  %v967_v44 = vmul.f32 %v435_v37, %v435_v37  ;;  %v1832_v45 = vpack.c.bf16 %v435_v37, %v435_v37  ;;  %v1050_v2 = vsel %vm813_vm3, %v968_v43, 0.0 }
  0xec   :  { %v850_v46 = vadd.f32 %v849_v16, %v848_v38  ;;  %v1047_v47 = vadd.f32 %v1046_v35, %v1045_v36  ;;  %v2010_v49 = vpop.f32.mrf.mxu0  ;;  %v2719_v13 = vpop.f32.mrf.mxu1  ;;  %v2746_v35 = vsel %vm813_vm3, %v992_v9, 0.0  ;;  %v2816_v39 = vsel %vm813_vm3, %v2545_v59, 0.0 }
  0xed   :  { %v1048_v55 = vsel %vm813_vm3, %v967_v44, 0.0  ;;  %1514 = vst.msk [vmem:[%s3333_s3 + $0x48] sm:$0xf] %vm1495_vm2, %v1832_v45  ;;  %v1835_v56 = vpack.c.bf16 %v2010_v49, %v2010_v49  ;;  %v970_v61 = vmul.f32 %v2010_v49, %v2010_v49  ;;  %v855_v14 = vsel %vm813_vm3, %v2010_v49, 0.0 }
  0xee   :  { %v1049_v58 = vadd.f32 %v1048_v55, %v1047_v47  ;;  %v445_v63 = vpop.f32.mrf.mxu0  ;;  %v852_v0 = vadd.f32 %v851_v54, %v850_v46  ;;  %v2738_v27 = vpop.f32.mrf.mxu1  ;;  %v2755_v44 = vsel %vm813_vm3, %v2523_v42, 0.0  ;;  %v2763_v47 = vsel %vm813_vm3, %v991_v23, 0.0 }
  0xef   :  { %1517 = vst.msk [vmem:[%s3333_s3 + $0x54] sm:$0xf] %vm1495_vm2, %v1835_v56  ;;  %v853_v25 = vsel %vm813_vm3, %v445_v63, 0.0  ;;  %v969_v4 = vmul.f32 %v445_v63, %v445_v63  ;;  %v1834_v5 = vpack.c.bf16 %v445_v63, %v445_v63  ;;  %v1054_v20 = vsel %vm813_vm3, %v970_v61, 0.0 }
  0xf0   :  { %v854_v7 = vadd.f32 %v853_v25, %v852_v0  ;;  %v1051_v8 = vadd.f32 %v1050_v2, %v1049_v58  ;;  %v2013_v10 = vpop.f32.mrf.mxu0  ;;  %v2750_v43 = vpop.f32.mrf.mxu1  ;;  %v994_v0 = vmul.f32 %v2536_v50, %v2536_v50 }
  0xf1   :  { %v1052_v17 = vsel %vm813_vm3, %v969_v4, 0.0  ;;  %1516 = vst.msk [vmem:[%s3333_s3 + $0x50] sm:$0xf] %vm1495_vm2, %v1834_v5  ;;  %v1837_v19 = vpack.c.bf16 %v2013_v10, %v2013_v10  ;;  %v972_v29 = vmul.f32 %v2013_v10, %v2013_v10  ;;  %v859_v16 = vsel %vm813_vm3, %v2013_v10, 0.0 }
  0xf2   :  { %v1053_v22 = vadd.f32 %v1052_v17, %v1051_v8  ;;  %v455_v24 = vpop.f32.mrf.mxu0  ;;  %v856_v26 = vadd.f32 %v855_v14, %v854_v7  ;;  %v2769_v42 = vpop.f32.mrf.mxu1  ;;  %v1864_v5 = vpack.c.bf16 %v2611_v51, %v2611_v51  ;;  %v2785_v8 = vsel %vm813_vm3, %v2536_v50, 0.0 }
  0xf3   :  { %1519 = vst.msk [vmem:[%s3333_s3 + $0x5c] sm:$0xf] %vm1495_vm2, %v1837_v19  ;;  %v857_v33 = vsel %vm813_vm3, %v455_v24, 0.0  ;;  %v971_v30 = vmul.f32 %v455_v24, %v455_v24  ;;  %v1836_v32 = vpack.c.bf16 %v455_v24, %v455_v24  ;;  %v1058_v56 = vsel %vm813_vm3, %v972_v29, 0.0 }
  0xf4   :  { %v858_v36 = vadd.f32 %v857_v33, %v856_v26  ;;  %v1055_v37 = vadd.f32 %v1054_v20, %v1053_v22  ;;  %v2016_v38 = vpop.f32.mrf.mxu0  ;;  %v2781_v7 = vpop.f32.mrf.mxu1  ;;  %v993_v17 = vmul.f32 %v2545_v59, %v2545_v59  ;;  %1546 = vst.msk [vmem:[%s3333_s3 + $0xc8] sm:$0xf] %vm1495_vm2, %v1864_v5  ;;  %v2808_v33 = vsel %vm813_vm3, %v994_v0, 0.0 }
  0xf5   :  { %v1056_v45 = vsel %vm813_vm3, %v971_v30, 0.0  ;;  %1518 = vst.msk [vmem:[%s3333_s3 + $0x58] sm:$0xf] %vm1495_vm2, %v1836_v32  ;;  %v1839_v46 = vpack.c.bf16 %v2016_v38, %v2016_v38  ;;  %v974_v52 = vmul.f32 %v2016_v38, %v2016_v38  ;;  %v863_v9 = vsel %vm813_vm3, %v2016_v38, 0.0 }
  0xf6   :  { %v1057_v49 = vadd.f32 %v1056_v45, %v1055_v37  ;;  %v465_v54 = vpop.f32.mrf.mxu0  ;;  %v860_v55 = vadd.f32 %v859_v16, %v858_v36  ;;  %v2800_v50 = vpop.f32.mrf.mxu1  ;;  %v1867_v37 = vpack.c.bf16 %v2624_v60, %v2624_v60  ;;  %v996_v0 = vmul.f32 %v2557_v3, %v2557_v3 }
  0xf7   :  { %1521 = vst.msk [vmem:[%s3333_s3 + $0x64] sm:$0xf] %vm1495_vm2, %v1839_v46  ;;  %v861_v58 = vsel %vm813_vm3, %v465_v54, 0.0  ;;  %v973_v61 = vmul.f32 %v465_v54, %v465_v54  ;;  %v1838_v63 = vpack.c.bf16 %v465_v54, %v465_v54  ;;  %v1062_v14 = vsel %vm813_vm3, %v974_v52, 0.0 }
  0xf8   :  { %v862_v2 = vadd.f32 %v861_v58, %v860_v55  ;;  %v1059_v25 = vadd.f32 %v1058_v56, %v1057_v49  ;;  %v2019_v4 = vpop.f32.mrf.mxu0  ;;  %v2812_v38 = vpop.f32.mrf.mxu1  ;;  %v2825_v49 = vsel %vm813_vm3, %v993_v17, 0.0  ;;  %1549 = vst.msk [vmem:[%s3333_s3 + $0xd4] sm:$0xf] %vm1495_vm2, %v1867_v37  ;;  %v1866_v5 = vpack.c.bf16 %v2633_v6, %v2633_v6 }
  0xf9   :  { %v1060_v10 = vsel %vm813_vm3, %v973_v61, 0.0  ;;  %1520 = vst.msk [vmem:[%s3333_s3 + $0x60] sm:$0xf] %vm1495_vm2, %v1838_v63  ;;  %v1841_v11 = vpack.c.bf16 %v2019_v4, %v2019_v4  ;;  %v976_v23 = vmul.f32 %v2019_v4, %v2019_v4  ;;  %v867_v16 = vsel %vm813_vm3, %v2019_v4, 0.0 }
  0xfa   :  { %v1061_v19 = vadd.f32 %v1060_v10, %v1059_v25  ;;  %v475_v20 = vpop.f32.mrf.mxu0  ;;  %v864_v22 = vadd.f32 %v863_v9, %v862_v2  ;;  %v2841_v9 = vpop.f32.mrf.mxu1  ;;  %v2845_v10 = vsel %vm813_vm3, %v2557_v3, 0.0  ;;  %1548 = vst.msk [vmem:[%s3333_s3 + $0xd0] sm:$0xf] %vm1495_vm2, %v1866_v5  ;;  %v998_v5 = vmul.f32 %v2580_v21, %v2580_v21 }
  0xfb   :  { %1523 = vst.msk [vmem:[%s3333_s3 + $0x6c] sm:$0xf] %vm1495_vm2, %v1841_v11  ;;  %v865_v24 = vsel %vm813_vm3, %v475_v20, 0.0  ;;  %v975_v26 = vmul.f32 %v475_v20, %v475_v20  ;;  %v1840_v29 = vpack.c.bf16 %v475_v20, %v475_v20  ;;  %v1066_v59 = vsel %vm813_vm3, %v976_v23, 0.0 }
  0xfc   :  { %v866_v30 = vadd.f32 %v865_v24, %v864_v22  ;;  %v1063_v32 = vadd.f32 %v1062_v14, %v1061_v19  ;;  %v2022_v36 = vpop.f32.mrf.mxu0  ;;  %v995_v19 = vmul.f32 %v2567_v12, %v2567_v12 }
  0xfd   :  { %v1064_v45 = vsel %vm813_vm3, %v975_v26, 0.0  ;;  %1522 = vst.msk [vmem:[%s3333_s3 + $0x68] sm:$0xf] %vm1495_vm2, %v1840_v29  ;;  %v1843_v46 = vpack.c.bf16 %v2022_v36, %v2022_v36  ;;  %v978_v54 = vmul.f32 %v2022_v36, %v2022_v36  ;;  %v871_v11 = vsel %vm813_vm3, %v2022_v36, 0.0 }
  0xfe   :  { %v1065_v52 = vadd.f32 %v1064_v45, %v1063_v32  ;;  %v485_v55 = vpop.f32.mrf.mxu0  ;;  %v868_v56 = vadd.f32 %v867_v16, %v866_v30  ;;  %v2866_v32 = vsel %vm813_vm3, %v996_v0, 0.0  ;;  %v1869_v45 = vpack.c.bf16 %v2645_v15, %v2645_v15 }
  0xff   :  { %1525 = vst.msk [vmem:[%s3333_s3 + $0x74] sm:$0xf] %vm1495_vm2, %v1843_v46  ;;  %v869_v58 = vsel %vm813_vm3, %v485_v55, 0.0  ;;  %v977_v61 = vmul.f32 %v485_v55, %v485_v55  ;;  %v1842_v63 = vpack.c.bf16 %v485_v55, %v485_v55  ;;  %v1070_v20 = vsel %vm813_vm3, %v978_v54, 0.0  ;;  %v2870_v46 = vpop.f32.mrf.mxu1 }
 0x100   :  { %v870_v2 = vadd.f32 %v869_v58, %v868_v56  ;;  %v1067_v25 = vadd.f32 %v1066_v59, %v1065_v52  ;;  %v2025_v4 = vpop.f32.mrf.mxu0  ;;  %v2874_v52 = vsel %vm813_vm3, %v2567_v12, 0.0  ;;  %v2883_v59 = vsel %vm813_vm3, %v995_v19, 0.0  ;;  %1551 = vst.msk [vmem:[%s3333_s3 + $0xdc] sm:$0xf] %vm1495_vm2, %v1869_v45 }
 0x101   :  { %v1068_v14 = vsel %vm813_vm3, %v977_v61, 0.0  ;;  %1524 = vst.msk [vmem:[%s3333_s3 + $0x70] sm:$0xf] %vm1495_vm2, %v1842_v63  ;;  %v1845_v17 = vpack.c.bf16 %v2025_v4, %v2025_v4  ;;  %v980_v3 = vmul.f32 %v2025_v4, %v2025_v4  ;;  %v875_v54 = vsel %vm813_vm3, %v2025_v4, 0.0 }
 0x102   :  { %v1069_v22 = vadd.f32 %v1068_v14, %v1067_v25  ;;  %v495_v23 = vpop.f32.mrf.mxu0  ;;  %v872_v24 = vadd.f32 %v871_v11, %v870_v2  ;;  %v1868_v19 = vpack.c.bf16 %v2657_v28, %v2657_v28 }
 0x103   :  { %1527 = vst.msk [vmem:[%s3333_s3 + $0x7c] sm:$0xf] %vm1495_vm2, %v1845_v17  ;;  %v873_v26 = vsel %vm813_vm3, %v495_v23, 0.0  ;;  %v979_v29 = vmul.f32 %v495_v23, %v495_v23  ;;  %v1844_v30 = vpack.c.bf16 %v495_v23, %v495_v23  ;;  %v1074_v12 = vsel %vm813_vm3, %v980_v3, 0.0 }
 0x104   :  { %v874_v36 = vadd.f32 %v873_v26, %v872_v24  ;;  %v1071_v37 = vadd.f32 %v1070_v20, %v1069_v22  ;;  %v2028_v16 = vpop.f32.mrf.mxu0  ;;  %v2899_v20 = vpop.f32.mrf.mxu1  ;;  %v2903_v22 = vsel %vm813_vm3, %v2580_v21, 0.0  ;;  %v997_v26 = vmul.f32 %v2589_v31, %v2589_v31  ;;  %1550 = vst.msk [vmem:[%s3333_s3 + $0xd8] sm:$0xf] %vm1495_vm2, %v1868_v19 }
 0x105   :  { %v1072_v55 = vsel %vm813_vm3, %v979_v29, 0.0  ;;  %1526 = vst.msk [vmem:[%s3333_s3 + $0x78] sm:$0xf] %vm1495_vm2, %v1844_v30  ;;  %v1847_v56 = vpack.c.bf16 %v2028_v16, %v2028_v16  ;;  %v982_v61 = vmul.f32 %v2028_v16, %v2028_v16  ;;  %v879_v23 = vsel %vm813_vm3, %v2028_v16, 0.0 }
 0x106   :  { %v1073_v58 = vadd.f32 %v1072_v55, %v1071_v37  ;;  %v505_v63 = vpop.f32.mrf.mxu0  ;;  %v876_v0 = vadd.f32 %v875_v54, %v874_v36  ;;  %v2924_v55 = vsel %vm813_vm3, %v998_v5, 0.0  ;;  %v2942_v5 = vsel %vm813_vm3, %v997_v26, 0.0 }
 0x107   :  { %1529 = vst.msk [vmem:[%s3333_s3 + $0x84] sm:$0xf] %vm1495_vm2, %v1847_v56  ;;  %v877_v2 = vsel %vm813_vm3, %v505_v63, 0.0  ;;  %v981_v25 = vmul.f32 %v505_v63, %v505_v63  ;;  %v1846_v4 = vpack.c.bf16 %v505_v63, %v505_v63  ;;  %v1078_v29 = vsel %vm813_vm3, %v982_v61, 0.0 }
 0x108   :  { %v878_v11 = vadd.f32 %v877_v2, %v876_v0  ;;  %v1075_v14 = vadd.f32 %v1074_v12, %v1073_v58  ;;  %v2031_v17 = vpop.f32.mrf.mxu0  ;;  %v1871_v61 = vpack.c.bf16 %v2676_v41, %v2676_v41  ;;  %v2928_v0 = vpop.f32.mrf.mxu1  ;;  %v2932_v12 = vsel %vm813_vm3, %v2589_v31, 0.0 }
 0x109   :  { %v1076_v24 = vsel %vm813_vm3, %v981_v25, 0.0  ;;  %1528 = vst.msk [vmem:[%s3333_s3 + $0x80] sm:$0xf] %vm1495_vm2, %v1846_v4  ;;  %v1849_v3 = vpack.c.bf16 %v2031_v17, %v2031_v17  ;;  %v984_v37 = vmul.f32 %v2031_v17, %v2031_v17  ;;  %v1000_v2 = vmul.f32 %v2601_v40, %v2601_v40 }
 0x10a   :  { %v1077_v30 = vadd.f32 %v1076_v24, %v1075_v14  ;;  %v515_v21 = vpop.f32.mrf.mxu0  ;;  %v880_v36 = vadd.f32 %v879_v23, %v878_v11  ;;  %v999_v11 = vmul.f32 %v2611_v51, %v2611_v51  ;;  %v883_v31 = vsel %vm813_vm3, %v2031_v17, 0.0  ;;  %1553 = vst.msk [vmem:[%s3333_s3 + $0xe4] sm:$0xf] %vm1495_vm2, %v1871_v61 }
 0x10b   :  { %1531 = vst.msk [vmem:[%s3333_s3 + $0x8c] sm:$0xf] %vm1495_vm2, %v1849_v3  ;;  %v881_v16 = vsel %vm813_vm3, %v515_v21, 0.0  ;;  %v983_v45 = vmul.f32 %v515_v21, %v515_v21  ;;  %v1848_v54 = vpack.c.bf16 %v515_v21, %v515_v21  ;;  %v1082_v23 = vsel %vm813_vm3, %v984_v37, 0.0 }
 0x10c   :  { %v882_v56 = vadd.f32 %v881_v16, %v880_v36  ;;  %v1079_v58 = vadd.f32 %v1078_v29, %v1077_v30  ;;  %v2034_v63 = vpop.f32.mrf.mxu0  ;;  %v1870_v24 = vpack.c.bf16 %v2688_v53, %v2688_v53  ;;  %v2959_v16 = vpop.f32.mrf.mxu1  ;;  %v2963_v37 = vsel %vm813_vm3, %v2601_v40, 0.0 }
 0x10d   :  { %v1080_v25 = vsel %vm813_vm3, %v983_v45, 0.0  ;;  %1530 = vst.msk [vmem:[%s3333_s3 + $0x88] sm:$0xf] %vm1495_vm2, %v1848_v54  ;;  %v1851_v4 = vpack.c.bf16 %v2034_v63, %v2034_v63  ;;  %v986_v26 = vmul.f32 %v2034_v63, %v2034_v63  ;;  %v2966_v45 = vsel %vm813_vm3, %v1000_v2, 0.0 }
 0x10e   :  { %v1081_v14 = vadd.f32 %v1080_v25, %v1079_v58  ;;  %v525_v19 = vpop.f32.mrf.mxu0  ;;  %v884_v3 = vadd.f32 %v883_v31, %v882_v56  ;;  %1552 = vst.msk [vmem:[%s3333_s3 + $0xe0] sm:$0xf] %vm1495_vm2, %v1870_v24  ;;  %v1873_v56 = vpack.c.bf16 %v2707_v1, %v2707_v1  ;;  %v2976_v58 = vsel %vm813_vm3, %v2611_v51, 0.0 }
 0x10f   :  { %1533 = vst.msk [vmem:[%s3333_s3 + $0x94] sm:$0xf] %vm1495_vm2, %v1851_v4  ;;  %v885_v17 = vsel %vm813_vm3, %v525_v19, 0.0  ;;  %v985_v29 = vmul.f32 %v525_v19, %v525_v19  ;;  %v1850_v21 = vpack.c.bf16 %v525_v19, %v525_v19  ;;  %v2979_v61 = vsel %vm813_vm3, %v999_v11, 0.0 }
 0x110   :  { %v1083_v30 = vadd.f32 %v1082_v23, %v1081_v14  ;;  %v2037_v36 = vpop.f32.mrf.mxu0  ;;  %v886_v54 = vadd.f32 %v885_v17, %v884_v3  ;;  %v1002_v4 = vmul.f32 %v2624_v60, %v2624_v60  ;;  %v1001_v31 = vmul.f32 %v2633_v6, %v2633_v6  ;;  %1555 = vst.msk [vmem:[%s3333_s3 + $0xec] sm:$0xf] %vm1495_vm2, %v1873_v56 }
 0x111   :  { %v1084_v40 = vsel %vm813_vm3, %v985_v29, 0.0  ;;  %1532 = vst.msk [vmem:[%s3333_s3 + $0x90] sm:$0xf] %vm1495_vm2, %v1850_v21  ;;  %v1853_v2 = vpack.c.bf16 %v2037_v36, %v2037_v36  ;;  %v887_v51 = vsel %vm813_vm3, %v2034_v63, 0.0  ;;  %v1086_v11 = vsel %vm813_vm3, %v986_v26, 0.0  ;;  %v3003_v63 = vpop.f32.mrf.mxu1 }
 0x112   :  { %v535_v25 = vpop.f32.mrf.mxu0  ;;  %v1085_v14 = vadd.f32 %v1084_v40, %v1083_v30  ;;  %v1872_v19 = vpack.c.bf16 %v2719_v13, %v2719_v13  ;;  %v888_v23 = vadd.f32 %v887_v51, %v886_v54  ;;  %v988_v3 = vmul.f32 %v2037_v36, %v2037_v36 }
 0x113   :  { %1535 = vst.msk [vmem:[%s3333_s3 + $0x9c] sm:$0xf] %vm1495_vm2, %v1853_v2  ;;  %v889_v24 = vsel %vm813_vm3, %v535_v25, 0.0  ;;  %v987_v17 = vmul.f32 %v535_v25, %v535_v25  ;;  %v1852_v30 = vpack.c.bf16 %v535_v25, %v535_v25  ;;  %v3007_v26 = vsel %vm813_vm3, %v2624_v60, 0.0 }
 0x114   :  { %v1087_v29 = vadd.f32 %v1086_v11, %v1085_v14  ;;  %v1004_v21 = vmul.f32 %v2645_v15, %v2645_v15  ;;  %1554 = vst.msk [vmem:[%s3333_s3 + $0xe8] sm:$0xf] %vm1495_vm2, %v1872_v19  ;;  %v890_v54 = vadd.f32 %v889_v24, %v888_v23  ;;  %v1875_v56 = vpack.c.bf16 %v2738_v27, %v2738_v27 }
 0x115   :  { %v1003_v40 = vmul.f32 %v2657_v28, %v2657_v28  ;;  %v891_v2 = vsel %vm813_vm3, %v2037_v36, 0.0  ;;  %v1088_v60 = vsel %vm813_vm3, %v987_v17, 0.0  ;;  %1534 = vst.msk [vmem:[%s3333_s3 + $0x98] sm:$0xf] %vm1495_vm2, %v1852_v30  ;;  %v1874_v25 = vpack.c.bf16 %v2750_v43, %v2750_v43  ;;  %v3038_v36 = vpop.f32.mrf.mxu1 }
 0x116   :  { %v3028_v51 = vsel %vm813_vm3, %v1002_v4, 0.0  ;;  %v3032_v14 = vsel %vm813_vm3, %v2633_v6, 0.0  ;;  %v892_v11 = vadd.f32 %v891_v2, %v890_v54  ;;  %v1089_v19 = vadd.f32 %v1088_v60, %v1087_v29  ;;  %1557 = vst.msk [vmem:[%s3333_s3 + $0xf4] sm:$0xf] %vm1495_vm2, %v1875_v56 }
 0x117   :  { %v3041_v23 = vsel %vm813_vm3, %v1001_v31, 0.0  ;;  %v3045_v4 = vsel %vm813_vm3, %v2645_v15, 0.0  ;;  %v1090_v24 = vsel %vm813_vm3, %v988_v3, 0.0  ;;  %1556 = vst.msk [vmem:[%s3333_s3 + $0xf0] sm:$0xf] %vm1495_vm2, %v1874_v25  ;;  %v1877_v6 = vpack.c.bf16 %v2769_v42, %v2769_v42  ;;  %v3083_v2 = vpop.f32.mrf.mxu1 }
 0x118   :  { %v3055_v17 = vsel %vm813_vm3, %v1004_v21, 0.0  ;;  %v3059_v31 = vsel %vm813_vm3, %v2657_v28, 0.0  ;;  %v894_v15 = vadd.f32 %v2698_v57, %v892_v11  ;;  %v1091_v29 = vadd.f32 %v1090_v24, %v1089_v19 }
 0x119   :  { %v3063_v3 = vsel %vm813_vm3, %v1003_v40, 0.0  ;;  %1559 = vst.msk [vmem:[%s3333_s3 + $0xfc] sm:$0xf] %vm1495_vm2, %v1877_v6  ;;  %v1876_v30 = vpack.c.bf16 %v2781_v7, %v2781_v7  ;;  %v1148_v21 = vsel %vm813_vm3, %v2800_v50, 0.0  ;;  %v1186_v28 = vmul.f32 %v2800_v50, %v2800_v50 }
 0x11a   :  { %v3077_v57 = vmul.f32 %v2676_v41, %v2676_v41  ;;  %v896_v54 = vadd.f32 %v2667_v34, %v894_v15  ;;  %v1093_v56 = vadd.f32 %v2701_v62, %v1091_v29  ;;  %v1879_v40 = vpack.c.bf16 %v2800_v50, %v2800_v50 }
 0x11b   :  { %1558 = vst.msk [vmem:[%s3333_s3 + $0xf8] sm:$0xf] %vm1495_vm2, %v1876_v30  ;;  %v1202_v60 = vsel %vm813_vm3, %v1186_v28, 0.0  ;;  %v1147_v25 = vsel %vm813_vm3, %v2812_v38, 0.0  ;;  %v1185_v34 = vmul.f32 %v2812_v38, %v2812_v38  ;;  %v1878_v62 = vpack.c.bf16 %v2812_v38, %v2812_v38  ;;  %v3117_v28 = vpop.f32.mrf.mxu1 }
 0x11c   :  { %v898_v50 = vadd.f32 %v2755_v44, %v896_v54  ;;  %v1095_v11 = vadd.f32 %v2684_v48, %v1093_v56  ;;  %1625 = vst.msk [vmem:[%s3334_s4 + $0x4] sm:$0xf] %vm1495_vm2, %v1879_v40  ;;  %v1149_v19 = vadd.f32 %v1148_v21, %v1147_v25  ;;  %v1152_v24 = vsel %vm813_vm3, %v2841_v9, 0.0 }
 0x11d   :  { %v1201_v6 = vsel %vm813_vm3, %v1185_v34, 0.0  ;;  %1624 = vst.msk [vmem:[%s3334_s4] sm:$0xf] %vm1495_vm2, %v1878_v62  ;;  %v1188_v44 = vmul.f32 %v2841_v9, %v2841_v9  ;;  %v1881_v48 = vpack.c.bf16 %v2841_v9, %v2841_v9  ;;  %v1150_v38 = vsel %vm813_vm3, %v2870_v46, 0.0 }
 0x11e   :  { %v900_v15 = vadd.f32 %v2729_v18, %v898_v50  ;;  %v1097_v29 = vadd.f32 %v2763_v47, %v1095_v11  ;;  %v1203_v30 = vadd.f32 %v1202_v60, %v1201_v6  ;;  %v1151_v21 = vadd.f32 %v1150_v38, %v1149_v19 }
 0x11f   :  { %v3121_v54 = vmul.f32 %v2688_v53, %v2688_v53  ;;  %v1206_v56 = vsel %vm813_vm3, %v1188_v44, 0.0  ;;  %1627 = vst.msk [vmem:[%s3334_s4 + $0xc] sm:$0xf] %vm1495_vm2, %v1881_v48  ;;  %v1187_v18 = vmul.f32 %v2870_v46, %v2870_v46  ;;  %v1880_v47 = vpack.c.bf16 %v2870_v46, %v2870_v46 }
 0x120   :  { %v902_v9 = vadd.f32 %v2816_v39, %v900_v15  ;;  %v1099_v40 = vadd.f32 %v2746_v35, %v1097_v29  ;;  %v1190_v60 = vmul.f32 %v2899_v20, %v2899_v20  ;;  %v1883_v25 = vpack.c.bf16 %v2899_v20, %v2899_v20 }
 0x121   :  { %v1204_v34 = vsel %vm813_vm3, %v1187_v18, 0.0  ;;  %1626 = vst.msk [vmem:[%s3334_s4 + $0x8] sm:$0xf] %vm1495_vm2, %v1880_v47  ;;  %v1153_v62 = vadd.f32 %v1152_v24, %v1151_v21  ;;  %v1154_v46 = vsel %vm813_vm3, %v2928_v0, 0.0  ;;  %v1189_v35 = vmul.f32 %v2928_v0, %v2928_v0  ;;  %v3155_v24 = vpop.f32.mrf.mxu1 }
 0x122   :  { %v904_v39 = vadd.f32 %v2785_v8, %v902_v9  ;;  %v1101_v50 = vadd.f32 %v2825_v49, %v1099_v40  ;;  %v1205_v11 = vadd.f32 %v1204_v34, %v1203_v30  ;;  %v1156_v19 = vsel %vm813_vm3, %v2899_v20, 0.0  ;;  %1629 = vst.msk [vmem:[%s3334_s4 + $0x14] sm:$0xf] %vm1495_vm2, %v1883_v25 }
 0x123   :  { %v1210_v6 = vsel %vm813_vm3, %v1190_v60, 0.0  ;;  %v1155_v44 = vadd.f32 %v1154_v46, %v1153_v62  ;;  %v1208_v48 = vsel %vm813_vm3, %v1189_v35, 0.0  ;;  %v1882_v8 = vpack.c.bf16 %v2928_v0, %v2928_v0  ;;  %v2096_v47 = vpop.f32.mrf.mxu1 }
 0x124   :  { %v906_v49 = vadd.f32 %v2874_v52, %v904_v39  ;;  %v1103_v38 = vadd.f32 %v2808_v33, %v1101_v50  ;;  %v1207_v20 = vadd.f32 %v1206_v56, %v1205_v11  ;;  %v1192_v15 = vmul.f32 %v2959_v16, %v2959_v16 }
 0x125   :  { %1628 = vst.msk [vmem:[%s3334_s4 + $0x10] sm:$0xf] %vm1495_vm2, %v1882_v8  ;;  %v1885_v29 = vpack.c.bf16 %v2959_v16, %v2959_v16  ;;  %v1157_v30 = vadd.f32 %v1156_v19, %v1155_v44  ;;  %v1158_v0 = vsel %vm813_vm3, %v3003_v63, 0.0  ;;  %v1191_v52 = vmul.f32 %v3003_v63, %v3003_v63  ;;  %v794_v11 = vpop.f32.mrf.mxu1 }
 0x126   :  { %v908_v33 = vadd.f32 %v2845_v10, %v906_v49  ;;  %v1105_v21 = vadd.f32 %v2883_v59, %v1103_v38  ;;  %v1209_v56 = vadd.f32 %v1208_v48, %v1207_v20  ;;  %v1160_v18 = vsel %vm813_vm3, %v2959_v16, 0.0 }
 0x127   :  { %v1214_v9 = vsel %vm813_vm3, %v1192_v15, 0.0  ;;  %1631 = vst.msk [vmem:[%s3334_s4 + $0x1c] sm:$0xf] %vm1495_vm2, %v1885_v29  ;;  %v1159_v40 = vadd.f32 %v1158_v0, %v1157_v30  ;;  %v1212_v60 = vsel %vm813_vm3, %v1191_v52, 0.0  ;;  %v1884_v10 = vpack.c.bf16 %v3003_v63, %v3003_v63  ;;  %v2099_v30 = vpop.f32.mrf.mxu1 }
 0x128   :  { %v910_v59 = vadd.f32 %v2932_v12, %v908_v33  ;;  %v1107_v25 = vadd.f32 %v2866_v32, %v1105_v21  ;;  %v1211_v34 = vadd.f32 %v1210_v6, %v1209_v56  ;;  %v1194_v16 = vmul.f32 %v3038_v36, %v3038_v36 }
 0x129   :  { %1630 = vst.msk [vmem:[%s3334_s4 + $0x18] sm:$0xf] %vm1495_vm2, %v1884_v10  ;;  %v1887_v62 = vpack.c.bf16 %v3038_v36, %v3038_v36  ;;  %v1161_v46 = vadd.f32 %v1160_v18, %v1159_v40  ;;  %v1162_v63 = vsel %vm813_vm3, %v3083_v2, 0.0  ;;  %v1193_v12 = vmul.f32 %v3083_v2, %v3083_v2 }
 0x12a   :  { %v912_v32 = vadd.f32 %v2903_v22, %v910_v59  ;;  %v1109_v35 = vadd.f32 %v2942_v5, %v1107_v25  ;;  %v1213_v39 = vadd.f32 %v1212_v60, %v1211_v34  ;;  %v1164_v50 = vsel %vm813_vm3, %v3038_v36, 0.0 }
 0x12b   :  { %v1218_v19 = vsel %vm813_vm3, %v1194_v16, 0.0  ;;  %1633 = vst.msk [vmem:[%s3334_s4 + $0x24] sm:$0xf] %vm1495_vm2, %v1887_v62  ;;  %v1163_v6 = vadd.f32 %v1162_v63, %v1161_v46  ;;  %v1216_v44 = vsel %vm813_vm3, %v1193_v12, 0.0  ;;  %v1886_v22 = vpack.c.bf16 %v3083_v2, %v3083_v2 }
 0x12c   :  { %v1111_v5 = vadd.f32 %v2924_v55, %v1109_v35  ;;  %v914_v48 = vadd.f32 %v2976_v58, %v912_v32  ;;  %v1215_v8 = vadd.f32 %v1214_v9, %v1213_v39  ;;  %v1196_v36 = vmul.f32 %v3117_v28, %v3117_v28 }
 0x12d   :  { %1632 = vst.msk [vmem:[%s3334_s4 + $0x20] sm:$0xf] %vm1495_vm2, %v1886_v22  ;;  %v1889_v49 = vpack.c.bf16 %v3117_v28, %v3117_v28  ;;  %v1165_v38 = vadd.f32 %v1164_v50, %v1163_v6  ;;  %v1166_v2 = vsel %vm813_vm3, %v3155_v24, 0.0  ;;  %v1195_v55 = vmul.f32 %v3155_v24, %v3155_v24 }
 0x12e   :  { %v916_v58 = vadd.f32 %v2963_v37, %v914_v48  ;;  %v1113_v20 = vadd.f32 %v2979_v61, %v1111_v5  ;;  %v1217_v15 = vadd.f32 %v1216_v44, %v1215_v8  ;;  %v1168_v29 = vsel %vm813_vm3, %v3117_v28, 0.0 }
 0x12f   :  { %v1222_v0 = vsel %vm813_vm3, %v1196_v36, 0.0  ;;  %1635 = vst.msk [vmem:[%s3334_s4 + $0x2c] sm:$0xf] %vm1495_vm2, %v1889_v49  ;;  %v1167_v52 = vadd.f32 %v1166_v2, %v1165_v38  ;;  %v1220_v33 = vsel %vm813_vm3, %v1195_v55, 0.0  ;;  %v1888_v37 = vpack.c.bf16 %v3155_v24, %v3155_v24 }
 0x130   :  { %v918_v61 = vadd.f32 %v3032_v14, %v916_v58  ;;  %v1115_v21 = vadd.f32 %v2966_v45, %v1113_v20  ;;  %v1219_v56 = vadd.f32 %v1218_v19, %v1217_v15  ;;  %v1198_v28 = vmul.f32 %v2096_v47, %v2096_v47  ;;  %v804_v45 = vpop.f32.mrf.mxu1 }
 0x131   :  { %1634 = vst.msk [vmem:[%s3334_s4 + $0x28] sm:$0xf] %vm1495_vm2, %v1888_v37  ;;  %v1891_v18 = vpack.c.bf16 %v2096_v47, %v2096_v47  ;;  %v1169_v9 = vadd.f32 %v1168_v29, %v1167_v52  ;;  %v1170_v40 = vsel %vm813_vm3, %v794_v11, 0.0  ;;  %v1197_v60 = vmul.f32 %v794_v11, %v794_v11 }
 0x132   :  { %v920_v10 = vadd.f32 %v3007_v26, %v918_v61  ;;  %v1117_v24 = vadd.f32 %v3041_v23, %v1115_v21  ;;  %v1221_v59 = vadd.f32 %v1220_v33, %v1219_v56  ;;  %v1172_v14 = vsel %vm813_vm3, %v2096_v47, 0.0 }
 0x133   :  { %v1226_v25 = vsel %vm813_vm3, %v1198_v28, 0.0  ;;  %1637 = vst.msk [vmem:[%s3334_s4 + $0x34] sm:$0xf] %vm1495_vm2, %v1891_v18  ;;  %v1171_v34 = vadd.f32 %v1170_v40, %v1169_v9  ;;  %v1224_v16 = vsel %vm813_vm3, %v1197_v60, 0.0  ;;  %v1890_v62 = vpack.c.bf16 %v794_v11, %v794_v11 }
 0x134   :  { %v922_v46 = vadd.f32 %v3059_v31, %v920_v10  ;;  %v1119_v26 = vadd.f32 %v3028_v51, %v1117_v24  ;;  %v1223_v23 = vadd.f32 %v1222_v0, %v1221_v59  ;;  %v1200_v63 = vmul.f32 %v2099_v30, %v2099_v30 }
 0x135   :  { %1636 = vst.msk [vmem:[%s3334_s4 + $0x30] sm:$0xf] %vm1495_vm2, %v1890_v62  ;;  %v1893_v47 = vpack.c.bf16 %v2099_v30, %v2099_v30  ;;  %v1173_v12 = vadd.f32 %v1172_v14, %v1171_v34  ;;  %v1174_v32 = vsel %vm813_vm3, %v804_v45, 0.0  ;;  %v1199_v35 = vmul.f32 %v804_v45, %v804_v45 }
 0x136   :  { %v924_v39 = vadd.f32 %v3045_v4, %v922_v46  ;;  %v1121_v50 = vadd.f32 %v3063_v3, %v1119_v26  ;;  %v1225_v11 = vadd.f32 %v1224_v16, %v1223_v23  ;;  %v1176_v31 = vsel %vm813_vm3, %v2099_v30, 0.0 }
 0x137   :  { %v925_v51 = vsel %vm813_vm3, %v2688_v53, 0.0  ;;  %1639 = vst.msk [vmem:[%s3334_s4 + $0x3c] sm:$0xf] %vm1495_vm2, %v1893_v47  ;;  %v1175_v19 = vadd.f32 %v1174_v32, %v1173_v12  ;;  %v1228_v6 = vsel %vm813_vm3, %v1199_v35, 0.0  ;;  %v1892_v44 = vpack.c.bf16 %v804_v45, %v804_v45 }
 0x138   :  { %v927_v4 = vsel %vm813_vm3, %v2676_v41, 0.0  ;;  %v926_v22 = vadd.f32 %v925_v51, %v924_v39  ;;  %v1123_v3 = vadd.f32 %v3055_v17, %v1121_v50  ;;  %v1227_v5 = vadd.f32 %v1226_v25, %v1225_v11 }
 0x139   :  { %v1124_v48 = vsel %vm813_vm3, %v3121_v54, 0.0  ;;  %v1007_v53 = vmul.f32 %v2719_v13, %v2719_v13  ;;  %v1230_v8 = vsel %vm813_vm3, %v1200_v63, 0.0  ;;  %v1177_v36 = vadd.f32 %v1176_v31, %v1175_v19  ;;  %1638 = vst.msk [vmem:[%s3334_s4 + $0x38] sm:$0xf] %vm1495_vm2, %v1892_v44 }
 0x13a   :  { %v928_v49 = vadd.f32 %v927_v4, %v926_v22  ;;  %v1125_v41 = vadd.f32 %v1124_v48, %v1123_v3  ;;  %v1229_v38 = vadd.f32 %v1228_v6, %v1227_v5  ;;  %v1126_v17 = vsel %vm813_vm3, %v3077_v57, 0.0 }
 0x13b   :  { %v1008_v54 = vmul.f32 %v2707_v1, %v2707_v1  ;;  %v929_v2 = vsel %vm813_vm3, %v2719_v13, 0.0  ;;  %v1178_v55 = vrot.slane %v1177_v36, 4  ;;  %v931_v29 = vsel %vm813_vm3, %v2707_v1, 0.0 }
 0x13c   :  { %v930_v58 = vadd.f32 %v929_v2, %v928_v49  ;;  %v1127_v20 = vadd.f32 %v1126_v17, %v1125_v41  ;;  %v1231_v15 = vadd.f32 %v1230_v8, %v1229_v38  ;;  %v1128_v30 = vsel %vm813_vm3, %v1007_v53, 0.0 }
 0x13d   :  { %v1009_v0 = vmul.f32 %v2750_v43, %v2750_v43  ;;  %v1179_v52 = vadd.f32 %v1178_v55, %v1177_v36  ;;  %v1130_v61 = vsel %vm813_vm3, %v1008_v54, 0.0  ;;  %v1010_v13 = vmul.f32 %v2738_v27, %v2738_v27 }
 0x13e   :  { %v932_v57 = vadd.f32 %v931_v29, %v930_v58  ;;  %v1129_v33 = vadd.f32 %v1128_v30, %v1127_v20  ;;  %v1232_v37 = vrot.slane %v1231_v15, 4  ;;  %v933_v21 = vsel %vm813_vm3, %v2750_v43, 0.0 }
 0x13f   :  { %v1180_v56 = vrot.slane %v1179_v52, 2  ;;  %v935_v9 = vsel %vm813_vm3, %v2738_v27, 0.0  ;;  %v1132_v40 = vsel %vm813_vm3, %v1009_v0, 0.0  ;;  %v1011_v60 = vmul.f32 %v2781_v7, %v2781_v7 }
 0x140   :  { %v934_v28 = vadd.f32 %v933_v21, %v932_v57  ;;  %v1131_v1 = vadd.f32 %v1130_v61, %v1129_v33  ;;  %v1233_v18 = vadd.f32 %v1232_v37, %v1231_v15  ;;  %v1134_v45 = vsel %vm813_vm3, %v1010_v13, 0.0 }
 0x141   :  { %v1181_v10 = vadd.f32 %v1180_v56, %v1179_v52  ;;  %v1012_v43 = vmul.f32 %v2769_v42, %v2769_v42  ;;  %v937_v25 = vsel %vm813_vm3, %v2781_v7, 0.0  ;;  %v939_v46 = vsel %vm813_vm3, %v2769_v42, 0.0 }
 0x142   :  { %v1133_v24 = vadd.f32 %v1132_v40, %v1131_v1  ;;  %v936_v59 = vadd.f32 %v935_v9, %v934_v28  ;;  %v1234_v14 = vrot.slane %v1233_v18, 2  ;;  %v1136_v26 = vsel %vm813_vm3, %v1011_v60, 0.0 }
 0x143   :  { %v1182_v34 = vrot.slane %v1181_v10, 1  ;;  %v1138_v32 = vsel %vm813_vm3, %v1012_v43, 0.0 }
 0x144   :  { %v938_v16 = vadd.f32 %v937_v25, %v936_v59  ;;  %v1135_v27 = vadd.f32 %v1134_v45, %v1133_v24  ;;  %v1235_v62 = vadd.f32 %v1234_v14, %v1233_v18 }
 0x145   :  { %v1183_v23 = vadd.f32 %v1182_v34, %v1181_v10 }
 0x146   :  { %v940_v63 = vadd.f32 %v939_v46, %v938_v16  ;;  %v1137_v47 = vadd.f32 %v1136_v26, %v1135_v27  ;;  %v1236_v12 = vrot.slane %v1235_v62, 1 }
 0x147   :  { %1184 = vst.msk [vmem:[%s3335_s5 + $0x2] sm:$0x1] %vm947_vm4, %v1183_v23 }
 0x148   :  { %v941_v7 = vrot.slane %v940_v63, 4  ;;  %v1139_v35 = vadd.f32 %v1138_v32, %v1137_v47  ;;  %v1237_v39 = vadd.f32 %v1236_v12, %v1235_v62 }
 0x14a   :  { %v942_v50 = vadd.f32 %v941_v7, %v940_v63  ;;  %v1140_v11 = vrot.slane %v1139_v35, 4  ;;  %1238 = vst.msk [vmem:[%s3335_s5 + $0x3] sm:$0x1] %vm947_vm4, %v1237_v39 }
 0x14c   :  { %v943_v42 = vrot.slane %v942_v50, 2  ;;  %v1141_v31 = vadd.f32 %v1140_v11, %v1139_v35 }
 0x14e   :  { %v944_v51 = vadd.f32 %v943_v42, %v942_v50  ;;  %v1142_v19 = vrot.slane %v1141_v31, 2 }
 0x150   :  { %v945_v6 = vrot.slane %v944_v51, 1  ;;  %v1143_v44 = vadd.f32 %v1142_v19, %v1141_v31 }
 0x152   :  { %v946_v4 = vadd.f32 %v945_v6, %v944_v51  ;;  %v1144_v22 = vrot.slane %v1143_v44, 1 }
 0x154   :  { %948 = vst.msk [vmem:[%s3335_s5] sm:$0x1] %vm947_vm4, %v946_v4  ;;  %v1145_v3 = vadd.f32 %v1144_v22, %v1143_v44 }
 0x156   :  { %1146 = vst.msk [vmem:[%s3335_s5 + $0x1] sm:$0x1] %vm947_vm4, %v1145_v3 }

</bundles_post_ra>
